<compile_context>
chip_gen: v7x
topology: tpu7x:2x2x1
jax: 0.10.0
libtpu: 0.0.40
codegen_flags: <defaults>
</compile_context>

<pallas_src>
import functools
import math

import jax
import jax.numpy as jnp
from jax.experimental import pallas as pl
from jax.experimental.pallas import tpu as pltpu


def _round_up(v, m):
    return ((v + m - 1) // m) * m


# ----------------------------- Pallas kernel -----------------------------
# Second PointConv MLP layer + masked max aggregation over neighbor slots.
#   pre  : (tm*K, Hp) bf16   = ReLU(layer-1 output), layer 1 hoisted outside
#   mask : (tm, K)    f32    1.0 for valid neighbor slots, else 0.0
#   w2   : (Hp, Cp)   bf16,  b2 : (1, Cp) f32   (constant blocks, DMA'd once)
#   out  : (tm, Cp)   f32    = max_k mask * ReLU(pre @ w2 + b2)
def pointconv_kernel(pre_ref, mask_ref, w2_ref, b2_ref, out_ref):
    tm, k = mask_ref.shape
    cp = out_ref.shape[-1]
    # MXU: bf16 x bf16 with f32 accumulation; contraction dim Hp is lane-dense.
    h = jnp.dot(pre_ref[...], w2_ref[...], preferred_element_type=jnp.float32)
    h = jnp.maximum(h + b2_ref[...], 0.0)                       # (tm*K, Cp) f32
    # h >= 0 after ReLU, so zeroing invalid slots and taking max implements a
    # masked max with default 0 for rows without any valid neighbor (no -inf).
    h = h.reshape(tm, k, cp) * mask_ref[...][:, :, None]        # (tm, K, Cp)
    out_ref[...] = jnp.max(h, axis=1)                           # (tm, Cp)


def _choose_tm(M, K, Hp, Cp, vmem_budget=12 * 1024 * 1024):
    """Pick the row tile: as large as a conservative VMEM budget allows
    (double-buffered bf16 input block + f32 in-kernel temporaries +
    double-buffered f32 output), capped at 512 rows, while keeping >= 2 grid
    steps so both v7x TensorCores get work. Stays under the 16 MiB default
    scoped VMEM on v5e without needing vmem_limit_bytes."""
    per_row = 2 * (K * Hp * 2) + 2 * (K * Cp * 4) + 2 * (Cp * 4)
    cap = max(8, vmem_budget // per_row)
    tm = min(cap, 512, max(8, -(-M // 2)))
    return max(8, (tm // 8) * 8)


def pointconv_pallas(pre, mask, w2p, b2p, tm=None):
    """pre: (M, K, Hp) bf16, mask: (M, K) f32, w2p: (Hp, Cp) bf16, b2p: (1, Cp) f32."""
    M, K, Hp = pre.shape
    Cp = w2p.shape[1]
    if tm is None:
        tm = _choose_tm(M, K, Hp, Cp)
    Mp = _round_up(M, tm)
    if Mp != M:  # pad rows; padded rows have mask==0 -> output 0, sliced off below
        pre = jnp.pad(pre, ((0, Mp - M), (0, 0), (0, 0)))
        mask = jnp.pad(mask, ((0, Mp - M), (0, 0)))
    pre2d = pre.reshape(Mp * K, Hp)  # wrapper-side flatten: free layout plumbing

    out = pl.pallas_call(
        pointconv_kernel,
        out_shape=jax.ShapeDtypeStruct((Mp, Cp), jnp.float32),
        grid=(Mp // tm,),
        in_specs=[
            pl.BlockSpec((tm * K, Hp), lambda i: (i, 0)),
            pl.BlockSpec((tm, K), lambda i: (i, 0)),
            # constant block index -> weights/bias are DMA'd to VMEM only once
            pl.BlockSpec((Hp, Cp), lambda i: (0, 0)),
            pl.BlockSpec((1, Cp), lambda i: (0, 0)),
        ],
        out_specs=pl.BlockSpec((tm, Cp), lambda i: (i, 0)),
        compiler_params=pltpu.CompilerParams(dimension_semantics=("parallel",)),
    )(pre2d, mask, w2p, b2p)
    return out[:M]


# ----------------------------- JAX glue: FPS ------------------------------
def fps_batched(pos_b, num_samples):
    """Farthest-point sampling per batch (equal-sized contiguous batches).
    pos_b: (B, Nb, 3) -> local indices (B, num_samples).
    # TODO(synk): torch_cluster fps uses a random start point; we start at 0.
    """
    B, Nb, _ = pos_b.shape
    start = jnp.zeros((B,), dtype=jnp.int32)
    idx0 = jnp.zeros((B, num_samples), dtype=jnp.int32).at[:, 0].set(start)
    dists0 = jnp.full((B, Nb), jnp.inf, dtype=jnp.float32)

    def body(i, carry):
        idx, dists, last = carry
        last_pos = pos_b[jnp.arange(B), last]                       # (B, 3)
        d = jnp.sum((pos_b - last_pos[:, None, :]) ** 2, axis=-1)   # (B, Nb)
        dists = jnp.minimum(dists, d)
        nxt = jnp.argmax(dists, axis=-1).astype(jnp.int32)
        idx = idx.at[:, i].set(nxt)
        return idx, dists, nxt

    idx, _, _ = jax.lax.fori_loop(1, num_samples, body, (idx0, dists0, start))
    return idx


# --------------------------- JAX glue: radius ------------------------------
def radius_neighbors(pos_b, idx_local, r, K):
    """For each sampled point, up to K (nearest) neighbors within radius r,
    restricted to the same batch. Uses top_k instead of a full argsort."""
    pos_s = jnp.take_along_axis(pos_b, idx_local[:, :, None], axis=1)     # (B,m,3)
    d2 = jnp.sum((pos_s[:, :, None, :] - pos_b[:, None, :, :]) ** 2, -1)  # (B,m,Nb)
    neg_k, order = jax.lax.top_k(-d2, K)                                  # K nearest
    mask = ((-neg_k) <= r * r).astype(jnp.float32)
    # TODO(synk): torch_cluster `radius` keeps the first max_num_neighbors in
    # scan order; we keep the K nearest (only differs when > K are in range).
    return order.astype(jnp.int32), mask


# ------------------------------- SAModule ----------------------------------
def sa_module(x, pos, B, Nb, ratio, r, K, params, tm=None):
    w1, b1, w2, b2 = params
    N, C_in = x.shape
    H = w1.shape[1]
    C_out = w2.shape[1]
    pos_b = pos.reshape(B, Nb, 3)
    m = int(math.ceil(ratio * Nb))

    # ---- graph construction: idx = fps(...), row/col = radius(...) ----
    idx_local = fps_batched(pos_b, m)                                # (B, m)
    offsets = (jnp.arange(B, dtype=jnp.int32) * Nb)[:, None]         # (B, 1)
    sample_global = (idx_local + offsets).reshape(-1)                # (M,)
    nbr_local, mask = radius_neighbors(pos_b, idx_local, r, K)
    nbr_global = (nbr_local + offsets[:, :, None]).reshape(-1, K)    # (M, K)
    mask = mask.reshape(-1, K)                                       # (M, K)

    # ---- hoist MLP layer 1 out of the per-edge path (per point, not per edge)
    #   [x_j, pos_j - pos_i] @ W1 + b1 = (x_j@W1x + pos_j@W1p + b1) - pos_i@W1p
    # Pad hidden / output channels to lane-dense multiples of 128.
    Hp = max(128, _round_up(H, 128))
    Cp = max(128, _round_up(C_out, 128))
    w1p = jnp.pad(w1, ((0, 0), (0, Hp - H)))
    b1p = jnp.pad(b1, ((0, 0), (0, Hp - H)))
    w2p = jnp.pad(w2, ((0, Hp - H), (0, Cp - C_out))).astype(jnp.bfloat16)
    b2p = jnp.pad(b2, ((0, 0), (0, Cp - C_out)))
    w1x, w1pos = w1p[:C_in], w1p[C_in:]

    a = x @ w1x + pos @ w1pos + b1p                                  # (N, Hp) f32
    c = pos[sample_global] @ w1pos                                   # (M, Hp) f32

    # Layer-1 ReLU fused into the XLA gather; cast to bf16 to halve kernel DMA.
    # TODO(synk): for large N, gather `a` rows inside the kernel via
    # PrefetchScalarGridSpec-indexed DMA instead of materializing (M, K, Hp).
    pre = jnp.maximum(a[nbr_global] - c[:, None, :], 0.0).astype(jnp.bfloat16)

    x_out = pointconv_pallas(pre, mask, w2p, b2p, tm=tm)[:, :C_out]  # (M, C_out)
    pos_out = pos[sample_global]
    batch_out = jnp.repeat(jnp.arange(B, dtype=jnp.int32), m)
    return x_out, pos_out, batch_out


def init_mlp_params(key, d_in, hidden, d_out):
    # TODO(synk): the torch_geometric MLP also contains BatchNorm1d; this
    # synthetic nn uses Linear+ReLU layers only.
    k1, k2, k3, k4 = jax.random.split(key, 4)
    w1 = jax.random.normal(k1, (d_in, hidden), jnp.float32) / math.sqrt(d_in)
    b1 = 0.01 * jax.random.normal(k2, (1, hidden), jnp.float32)
    w2 = jax.random.normal(k3, (hidden, d_out), jnp.float32) / math.sqrt(hidden)
    b2 = 0.01 * jax.random.normal(k4, (1, d_out), jnp.float32)
    return w1, b1, w2, b2


if __name__ == "__main__":
    B, Nb, C_in = 2, 64, 4            # 2 batches, 64 points each
    ratio, r = 0.5, 0.4               # SAModule(ratio, r, nn)
    max_num_neighbors = 64
    K = min(max_num_neighbors, Nb)
    hidden, C_out = 64, 128

    key = jax.random.PRNGKey(0)
    kx, kp, kw = jax.random.split(key, 3)
    N = B * Nb
    pos = jax.random.uniform(kp, (N, 3), dtype=jnp.float32)
    x = jax.random.normal(kx, (N, C_in), dtype=jnp.float32)
    batch = jnp.repeat(jnp.arange(B, dtype=jnp.int32), Nb)

    params = init_mlp_params(kw, C_in + 3, hidden, C_out)

    sa = jax.jit(functools.partial(sa_module, B=B, Nb=Nb, ratio=ratio, r=r,
                                   K=K, params=params))
    x_out, pos_out, batch_out = sa(x, pos)
    jax.block_until_ready((x_out, pos_out, batch_out))

    M = B * int(math.ceil(ratio * Nb))
    assert x_out.shape == (M, C_out), x_out.shape
    assert pos_out.shape == (M, 3), pos_out.shape
    assert batch_out.shape == (M,), batch_out.shape
    assert bool(jnp.all(jnp.isfinite(x_out)))
    print("KERNEL_OK")
</pallas_src>

<mosaic_0001>
module attributes {stable_mosaic.version = 11 : i64} {
  func.func @pointconv_kernel(%arg0: i32, %arg1: memref<2048x128xbf16, #tpu.memory_space<vmem>>, %arg2: memref<32x64xf32, #tpu.memory_space<vmem>>, %arg3: memref<128x128xbf16, #tpu.memory_space<vmem>>, %arg4: memref<1x128xf32, #tpu.memory_space<vmem>>, %arg5: memref<32x128xf32, #tpu.memory_space<vmem>>) attributes {dimension_semantics = [#tpu.dimension_semantics<parallel>], iteration_bounds = array<i64: 2>, scalar_prefetch = 0 : i64, scratch_operands = 0 : i64, tpu.core_type = #tpu.core_type<tc>, window_params = [{transform_indices = @transform_0, window_bounds = array<i64: 2048, 128>}, {transform_indices = @transform_1, window_bounds = array<i64: 32, 64>}, {pipeline_mode = #tpu.pipeline_mode<synchronous>, transform_indices = @transform_2, window_bounds = array<i64: 128, 128>}, {pipeline_mode = #tpu.pipeline_mode<synchronous>, transform_indices = @transform_3, window_bounds = array<i64: 1, 128>}, {transform_indices = @transform_4, window_bounds = array<i64: 32, 128>}]} {
    %c0 = arith.constant 0 : index
    %c0_0 = arith.constant 0 : index
    %0 = vector.load %arg1[%c0, %c0_0] : memref<2048x128xbf16, #tpu.memory_space<vmem>>, vector<2048x128xbf16>
    %c0_1 = arith.constant 0 : index
    %c0_2 = arith.constant 0 : index
    %1 = vector.load %arg3[%c0_1, %c0_2] : memref<128x128xbf16, #tpu.memory_space<vmem>>, vector<128x128xbf16>
    %cst = arith.constant dense<0.000000e+00> : vector<2048x128xf32>
    %2 = tpu.matmul %0, %1, %cst {dimension_numbers = #tpu.dot_dimension_numbers<[1], [0], [0], [1], [0, 0, 1, 1], [], []>} : vector<2048x128xbf16>, vector<128x128xbf16>, vector<2048x128xf32> -> vector<2048x128xf32>
    %c0_3 = arith.constant 0 : index
    %c0_4 = arith.constant 0 : index
    %3 = vector.load %arg4[%c0_3, %c0_4] : memref<1x128xf32, #tpu.memory_space<vmem>>, vector<1x128xf32>
    %4 = vector.broadcast %3 : vector<1x128xf32> to vector<2048x128xf32>
    %5 = arith.addf %2, %4 : vector<2048x128xf32>
    %cst_5 = arith.constant 0.000000e+00 : f32
    %6 = vector.broadcast %cst_5 : f32 to vector<2048x128xf32>
    %7 = arith.maximumf %5, %6 : vector<2048x128xf32>
    %8 = vector.shape_cast %7 : vector<2048x128xf32> to vector<32x64x128xf32>
    %c0_6 = arith.constant 0 : index
    %c0_7 = arith.constant 0 : index
    %9 = vector.load %arg2[%c0_6, %c0_7] : memref<32x64xf32, #tpu.memory_space<vmem>>, vector<32x64xf32>
    %10 = vector.shape_cast %9 : vector<32x64xf32> to vector<32x64x1xf32>
    %11 = vector.broadcast %10 : vector<32x64x1xf32> to vector<32x64x128xf32>
    %12 = arith.mulf %8, %11 : vector<32x64x128xf32>
    %cst_8 = arith.constant dense<0xFF800000> : vector<32x128xf32>
    %13 = vector.multi_reduction <maximumf>, %12, %cst_8 [1] : vector<32x64x128xf32> to vector<32x128xf32>
    %c0_9 = arith.constant 0 : index
    %c0_10 = arith.constant 0 : index
    %14 = vector.load %arg5[%c0_9, %c0_10] : memref<32x128xf32, #tpu.memory_space<vmem>>, vector<32x128xf32>
    tpu.vector_store %arg5[%c0_9, %c0_10], %13 {strides = array<i32>} : memref<32x128xf32, #tpu.memory_space<vmem>>, vector<32x128xf32>,
    return
  }
  func.func @transform_0(%arg0: i32) -> (i32, i32) {
    %c0_i32 = arith.constant 0 : i32
    %c0_i32_0 = arith.constant 0 : i32
    return %arg0, %c0_i32 : i32, i32
  }
  func.func @transform_1(%arg0: i32) -> (i32, i32) {
    %c0_i32 = arith.constant 0 : i32
    %c0_i32_0 = arith.constant 0 : i32
    return %arg0, %c0_i32 : i32, i32
  }
  func.func @transform_2(%arg0: i32) -> (i32, i32) {
    %c0_i32 = arith.constant 0 : i32
    %c0_i32_0 = arith.constant 0 : i32
    %c0_i32_1 = arith.constant 0 : i32
    return %c0_i32, %c0_i32_0 : i32, i32
  }
  func.func @transform_3(%arg0: i32) -> (i32, i32) {
    %c0_i32 = arith.constant 0 : i32
    %c0_i32_0 = arith.constant 0 : i32
    %c0_i32_1 = arith.constant 0 : i32
    return %c0_i32, %c0_i32_0 : i32, i32
  }
  func.func @transform_4(%arg0: i32) -> (i32, i32) {
    %c0_i32 = arith.constant 0 : i32
    %c0_i32_0 = arith.constant 0 : i32
    return %arg0, %c0_i32 : i32, i32
  }
}

</mosaic_0001>

<bundles_post_ra>
// kernel: custom-call.4
= control target key start
LH: loop header
LB: loop body
LE: loop exit
PB: predicated region body
PF: predicated region fallthrough
CT: control target
= control target key end

     0   :  { %s6_s0 = inlined_call_operand.vmem [shape: f32[2,64], index: 0, kind: output, shape index: {}]  }

// kernel: neg.2
= control target key start
LH: loop header
LB: loop body
LE: loop exit
PB: predicated region body
PF: predicated region fallthrough
CT: control target
= control target key end

     0   :  { %s136_s0 = inlined_call_operand.vmem [shape: f32[2,32,64], index: 0, kind: input, shape index: {}]   ;;  %s137_s1 = inlined_call_operand.vmem [shape: f32[2,32,64], index: 1, kind: output, shape index: {}]  }
   0x1   :  { %v2_v0 = vld [vmem:[%s136_s0] sm:$0xff]  ;;  %v66_v2 = vld [vmem:[%s136_s0 + $0x8] sm:$0xff]  ;;  %v70_v7 = vld [vmem:[%s136_s0 + $0x10] sm:$0xff] }
   0x2   :  { %v64_v1 = vld [vmem:[%s136_s0 + $0x20] sm:$0xff]  ;;  %v5_v3 = vxor.u32 2147483648, %v2_v0  ;;  %v20_v5 = vxor.u32 2147483648, %v66_v2  ;;  %v68_v6 = vld [vmem:[%s136_s0 + $0x28] sm:$0xff]  ;;  %v72_v8 = vld [vmem:[%s136_s0 + $0x30] sm:$0xff]  ;;  %v36_v10 = vxor.u32 2147483648, %v70_v7 }
   0x3   :  { %v12_v4 = vxor.u32 2147483648, %v64_v1  ;;  %v28_v9 = vxor.u32 2147483648, %v68_v6  ;;  %v44_v11 = vxor.u32 2147483648, %v72_v8  ;;  %v74_v12 = vld [vmem:[%s136_s0 + $0x18] sm:$0xff] }
   0x4   :  { %v76_v13 = vld [vmem:[%s136_s0 + $0x38] sm:$0xff]  ;;  %7 = vst [vmem:[%s137_s1] sm:$0xff] %v5_v3  ;;  %67 = vst [vmem:[%s137_s1 + $0x8] sm:$0xff] %v20_v5  ;;  %v52_v14 = vxor.u32 2147483648, %v74_v12 }
   0x5   :  { %65 = vst [vmem:[%s137_s1 + $0x20] sm:$0xff] %v12_v4  ;;  %v60_v15 = vxor.u32 2147483648, %v76_v13  ;;  %69 = vst [vmem:[%s137_s1 + $0x28] sm:$0xff] %v28_v9 }
   0x6   :  { %71 = vst [vmem:[%s137_s1 + $0x10] sm:$0xff] %v36_v10  ;;  %73 = vst [vmem:[%s137_s1 + $0x30] sm:$0xff] %v44_v11 }
   0x7   :  { %75 = vst [vmem:[%s137_s1 + $0x18] sm:$0xff] %v52_v14  ;;  %77 = vst [vmem:[%s137_s1 + $0x38] sm:$0xff] %v60_v15 }

// kernel: sa_module.1
= control target key start
LH: loop header
LB: loop body
LE: loop exit
PB: predicated region body
PF: predicated region fallthrough
CT: control target
= control target key end

     0   :  { %9 = vsyncpa [#allocation3], 0  ;;  %s7443_s0 = inlined_call_operand.vmem [shape: bf16[4096,128], index: 0, kind: input, shape index: {}]   ;;  %s7444_s1 = inlined_call_operand.vmem [shape: f32[64,64], index: 1, kind: input, shape index: {}]   ;;  %s7445_s2 = inlined_call_operand.vmem [shape: bf16[128,128], index: 2, kind: input, shape index: {}]   ;;  %s7446_s3 = inlined_call_operand.vmem [shape: f32[1,128], index: 3, kind: input, shape index: {}]   ;;  %s7447_s4 = inlined_call_operand.hbm [shape: f32[64,128], index: 4, kind: output, shape index: {}]  }
   0x1   :  { %11 = vsyncpa [#allocation3 + $0x1], 0  ;;  %s5437_s15 = smov 0   ;;  %s5439_s16 = smov 0  }
   0x2   :  { %s5441_s17 = smov 0   ;;  %s5443_s18 = smov 0  }
   0x3 LB: > { %s5458_s19 = sadd.s32 4294967295, %s5407_s18   ;;  %s4589_s20 = sadd.s32 4294967294, %s5407_s18   ;;  %s5407_s18 = sphi %s5443_s18, %s7924_s18   ;;  %s5403_s17 = sphi %s5441_s17, %s7923_s17   ;;  %s5399_s16 = sphi %s5439_s16, %s7922_s16   ;;  %s5395_s15 = sphi %s5437_s15, %s7921_s15  }
   0x4   : > { %s5462_s21 = sadd.s32 1, %s5407_s18   ;;  %s118_s22 = sadd.s32 1, %s5403_s17 }
   0x5   : > { %s115_s23 = ssub.s32 %s5407_s18, %s5462_s21  ;;  %p128_p0 = scmp.ne.s32.totalorder %s5403_s17, %s5399_s16 }
   0x6   : > { %p116_p1 = scmp.eq.s32.totalorder %s115_s23, 0  ;;  %p129_p2 = scmp.eq.s32.totalorder %s5458_s19, 1 }
   0x7   : > { %p134_p3 = scmp.ne.s32.totalorder %s5399_s16, %s5395_s15  ;;  %p135_p4 = scmp.eq.s32.totalorder %s4589_s20, 1 }
   0x8   : > { %s5473_s24 = scalar_select %p116_p1, %s5403_s17, %s118_s22  }
   0x9   : > { %p5475_p5 = por %p129_p2, %p128_p0  ;;  %p5479_p6 = por %p135_p4, %p134_p3 }
   0xa   : > { %p4592_p7 = scmp.ge.s32.totalorder %s5407_s18, 1  ;;  %p177_p8 = scmp.lt.s32.totalorder %s5407_s18, 3 }
   0xc   : > { %p178_p9 = pnand %p4592_p7, %p177_p8 }
   0xe   : > { %181 = sbr.rel (%p178_p9) target bundleno = 695 (0x2b7), region = 36 }
  0x15   : > { %v5206_v0 = vld [vmem:[%s7445_s2] sm:$0xff]   ;;  %s4596_s29 = sshll.u32 %s5458_s19, 2  ;;  %v2634_v1 = vlaneseq  ;;  %v5207_v2 = vld [vmem:[%s7445_s2 + $0x8] sm:$0xff]   ;;  %v5208_v5 = vld [vmem:[%s7445_s2 + $0x10] sm:$0xff]   ;;  %s4594_s12 = sshll.u32 %s5458_s19, 8  ;;  %vm4458_vm0 = vcmask 1041409  }
  0x16   : > { %p215_p10 = scmp.lt.s32.totalorder %s4596_s29, 7  ;;  %4877 = vmatprep.subr.bf16.mxu0 %v5206_v0  ;;  %5149 = vmatprep.subr.bf16.mxu1 %v5206_v0  ;;  %v5209_v8 = vld [vmem:[%s7445_s2 + $0x18] sm:$0xff]   ;;  %p209_p11 = scmp.lt.s32.totalorder %s4594_s12, 511  ;;  %v5210_v9 = vld [vmem:[%s7445_s2 + $0x20] sm:$0xff]   ;;  %v5211_v11 = vld [vmem:[%s7445_s2 + $0x28] sm:$0xff]   ;;  %vm4460_vm1 = vcmask 1042434  }
  0x17   : > { %v5492_v3 = vshrl.u32 %v2634_v1, 7  ;;  %4878 = vmatpush3.bf16.msra.mxu0 %v5206_v0  ;;  %5157 = vmatpush3.bf16.msra.mxu1 %v5206_v0  ;;  %v5212_v13 = vld [vmem:[%s7445_s2 + $0x30] sm:$0xff]   ;;  %v5213_v15 = vld [vmem:[%s7445_s2 + $0x38] sm:$0xff]   ;;  %vm4462_vm2 = vcmask 1043459   ;;  %vm4464_vm3 = vcmask 1044484   ;;  %vm4466_vm4 = vcmask 1045509  }
  0x18   : > { %s7926_s29 = smov (!%p215_p10, %s4596_s29), 7  ;;  %4879 = vmatprep.subr.bf16.mxu0 %v5207_v2  ;;  %5150 = vmatprep.subr.bf16.mxu1 %v5207_v2  ;;  %s7928_s12 = smov (!%p209_p11, %s4594_s12), 511  ;;  %vm4468_vm5 = vcmask 1046534   ;;  %vm4470_vm6 = vcmask 1047559  }
  0x19   : > { %v5495_v4 = vsub.s32 0, %v5492_v3  ;;  %s4597_s8 = sshll.u32 %s7926_s29, 3  ;;  %s4595_s23 = sshll.u32 %s7928_s12, 2  ;;  %v5527_v12 = vsub.s32 1, %v5492_v3  ;;  %v5540_v18 = vsub.s32 2, %v5492_v3  ;;  %v5554_v29 = vsub.s32 3, %v5492_v3 }
  0x1a   : > { %s5503_s11 = scalar_lea.vmem %s7444_s1, %s4597_s8  ;;  %s5520_s29 = scalar_lea.vmem %s7443_s0, %s4595_s23  ;;  %v5567_v39 = vsub.s32 4, %v5492_v3  ;;  %v5580_v49 = vsub.s32 5, %v5492_v3  ;;  %v5593_v59 = vsub.s32 6, %v5492_v3 }
  0x1b   : > { %7485 = vst [vmem:[#allocation5_spill] sm:$0xff] %v5495_v4  ;;  %4880 = vmatpush3.bf16.msra.mxu0 %v5207_v2  ;;  %v5506_v6 = vld [vmem:[%s5503_s11] sm:$0xff]  ;;  %5158 = vmatpush3.bf16.msra.mxu1 %v5207_v2  ;;  %7486 = vst [vmem:[#allocation6_spill] sm:$0xff] %v5527_v12  ;;  %v5215_v16 = vld [vmem:[%s5520_s29 + $0x8] sm:$0xff]   ;;  %s205_s22 = sand.u32 1, %s5399_s16   ;;  %s4740_s30 = sshll.u32 %s5458_s19, 9 }
  0x1c   : > { %v2637_v7 = vrot.slane %v5506_v6, %v5495_v4  ;;  %4881 = vmatprep.subr.bf16.mxu0 %v5208_v5  ;;  %5151 = vmatprep.subr.bf16.mxu1 %v5208_v5  ;;  %v5214_v10 = vld [vmem:[%s5520_s29] sm:$0xff]   ;;  %v2672_v14 = vrot.slane %v5506_v6, %v5527_v12  ;;  %v5216_v17 = vld [vmem:[%s5520_s29 + $0x10] sm:$0xff]   ;;  %v5236_v20 = vld [vmem:[%s5520_s29 + $0x208] sm:$0xff]   ;;  %v2707_v21 = vrot.slane %v5506_v6, %v5540_v18  ;;  %s4593_s23 = sshll.u32 %s205_s22, 5  ;;  %s7393_s8 = scalar_lea.hbm %s7447_s4, %s4740_s30 }
  0x1d   : > { %4893 = vmatprep.mubr.bf16.mxu0 %v5214_v10  ;;  %v5234_v19 = vld [vmem:[%s5520_s29 + $0x200] sm:$0xff]   ;;  %v5217_v22 = vld [vmem:[%s5520_s29 + $0x18] sm:$0xff]   ;;  %v5238_v23 = vld [vmem:[%s5520_s29 + $0x210] sm:$0xff]   ;;  %v2742_v32 = vrot.slane %v5506_v6, %v5554_v29  ;;  %v2777_v42 = vrot.slane %v5506_v6, %v5567_v39  ;;  %7487 = vst [vmem:[#allocation7_spill] sm:$0xff] %v5580_v49  ;;  %v2812_v52 = vrot.slane %v5506_v6, %v5580_v49  ;;  %s7243_s27 = scalar_lea.vmem [#allocation2], %s4593_s23  ;;  %s7402_s19 = scalar_lea.sflag [#allocation3], %s205_s22 }
  0x1e   : > { %2647 = vbcast.lane.b32.xlu1 %v2637_v7, 272  ;;  %2639 = vbcast.lane.b32.xlu0 %v2637_v7, 256  ;;  %v5218_v24 = vld [vmem:[%s5520_s29 + $0x20] sm:$0xff]   ;;  %v5240_v25 = vld [vmem:[%s5520_s29 + $0x218] sm:$0xff]   ;;  %v5219_v27 = vld [vmem:[%s5520_s29 + $0x28] sm:$0xff]   ;;  %7488 = vst [vmem:[#allocation8_spill] sm:$0xff] %v5593_v59  ;;  %v2847_v63 = vrot.slane %v5506_v6, %v5593_v59 }
  0x1f   : > { %4882 = vmatpush3.bf16.msra.mxu0 %v5208_v5  ;;  %5159 = vmatpush3.bf16.msra.mxu1 %v5208_v5  ;;  %v5242_v26 = vld [vmem:[%s5520_s29 + $0x220] sm:$0xff]   ;;  %v5220_v28 = vld [vmem:[%s5520_s29 + $0x30] sm:$0xff]   ;;  %v5244_v30 = vld [vmem:[%s5520_s29 + $0x228] sm:$0xff]   ;;  %s4515_s5 = sshll.u32 %s7243_s27, 4  ;;  %s5409_s10 = smov [#allocation2]   ;;  %s7395_s5 = int_to_ptr.vmem [resolvable:$true] %s4515_s5 }
  0x20   : > { %4883 = vmatprep.subr.bf16.mxu0 %v5209_v8  ;;  %5152 = vmatprep.subr.bf16.mxu1 %v5209_v8  ;;  %v5246_v31 = vld [vmem:[%s5520_s29 + $0x230] sm:$0xff]   ;;  %v5221_v33 = vld [vmem:[%s5520_s29 + $0x38] sm:$0xff]   ;;  %v5222_v34 = vld [vmem:[%s5520_s29 + $0x40] sm:$0xff]   ;;  %s5345_s9 = scalar_lea.vmem %s7395_s5, 512  ;;  %s5349_s12 = sshll.u32 %s5409_s10, 4  ;;  %s5350_s12 = int_to_ptr.vmem [resolvable:$false] %s5349_s12 }
  0x21   : > { %5021 = vmatprep.mubr.bf16.mxu1 %v5234_v19  ;;  %v5248_v35 = vld [vmem:[%s5520_s29 + $0x238] sm:$0xff]   ;;  %v5250_v36 = vld [vmem:[%s5520_s29 + $0x240] sm:$0xff]   ;;  %v5223_v37 = vld [vmem:[%s5520_s29 + $0x48] sm:$0xff]   ;;  %p5346_p12 = scmp.ne.s32.totalorder %s7395_s5, %s5345_s9  ;;  %s5351_s13 = scalar_lea.vmem %s5350_s12, 1024 }
  0x22   : > { %2651 = vbcast.lane.b32.xlu1 %v2637_v7, 280  ;;  %2643 = vbcast.lane.b32.xlu0 %v2637_v7, 264  ;;  %v5224_v38 = vld [vmem:[%s5520_s29 + $0x50] sm:$0xff]   ;;  %v5252_v40 = vld [vmem:[%s5520_s29 + $0x248] sm:$0xff]   ;;  %v5225_v43 = vld [vmem:[%s5520_s29 + $0x58] sm:$0xff]   ;;  %p5352_p1 = scmp.lt.s32.totalorder %s7395_s5, %s5350_s12  ;;  %p5353_p2 = scmp.lt.s32.totalorder %s5351_s13, %s5345_s9 }
  0x23   : > { %4884 = vmatpush3.bf16.msra.mxu0 %v5209_v8  ;;  %5160 = vmatpush3.bf16.msra.mxu1 %v5209_v8  ;;  %v5254_v41 = vld [vmem:[%s5520_s29 + $0x250] sm:$0xff]   ;;  %v5226_v44 = vld [vmem:[%s5520_s29 + $0x60] sm:$0xff]   ;;  %v5256_v45 = vld [vmem:[%s5520_s29 + $0x258] sm:$0xff]   ;;  %v5606_v8 = vsub.s32 7, %v5492_v3  ;;  %p5347_p13 = pnand %p5346_p12, %p5475_p5 }
  0x24   : > { %4885 = vmatprep.subr.bf16.mxu0 %v5210_v9  ;;  %5153 = vmatprep.subr.bf16.mxu1 %v5210_v9  ;;  %v5258_v46 = vld [vmem:[%s5520_s29 + $0x260] sm:$0xff]   ;;  %v5227_v47 = vld [vmem:[%s5520_s29 + $0x68] sm:$0xff]   ;;  %v5228_v48 = vld [vmem:[%s5520_s29 + $0x70] sm:$0xff]   ;;  %p5354_p3 = por %p5353_p2, %p5352_p1 }
  0x25   : > { %v5260_v50 = vld [vmem:[%s5520_s29 + $0x268] sm:$0xff]   ;;  %v5262_v51 = vld [vmem:[%s5520_s29 + $0x270] sm:$0xff]   ;;  %v5229_v53 = vld [vmem:[%s5520_s29 + $0x78] sm:$0xff]   ;;  %7489 = vst [vmem:[#allocation9_spill] sm:$0xff] %v5606_v8  ;;  %p5348_p0 = pneg %p5347_p13 }
  0x26   : > { %2659 = vbcast.lane.b32.xlu1 %v2637_v7, 296  ;;  %2655 = vbcast.lane.b32.xlu0 %v2637_v7, 288  ;;  %v5230_v54 = vld [vmem:[%s5520_s29 + $0x80] sm:$0xff]   ;;  %v5264_v55 = vld [vmem:[%s5520_s29 + $0x278] sm:$0xff]   ;;  %v5231_v57 = vld [vmem:[%s5520_s29 + $0x88] sm:$0xff]  }
  0x27   : > { %4886 = vmatpush3.bf16.msra.mxu0 %v5210_v9  ;;  %5161 = vmatpush3.bf16.msra.mxu1 %v5210_v9  ;;  %v5266_v56 = vld [vmem:[%s5520_s29 + $0x280] sm:$0xff]   ;;  %v5232_v58 = vld [vmem:[%s5520_s29 + $0x90] sm:$0xff]   ;;  %v5268_v60 = vld [vmem:[%s5520_s29 + $0x288] sm:$0xff]   ;;  %p5355_p4 = pnand %p5354_p3, %p5348_p0 }
  0x28   : > { %4887 = vmatprep.subr.bf16.mxu0 %v5211_v11  ;;  %5154 = vmatprep.subr.bf16.mxu1 %v5211_v11  ;;  %v5270_v61 = vld [vmem:[%s5520_s29 + $0x290] sm:$0xff]   ;;  %v5233_v62 = vld [vmem:[%s5520_s29 + $0x98] sm:$0xff]   ;;  %v5235_v0 = vld [vmem:[%s5520_s29 + $0xa0] sm:$0xff]  }
  0x29   : > { %v5272_v1 = vld [vmem:[%s5520_s29 + $0x298] sm:$0xff]   ;;  %v5274_v2 = vld [vmem:[%s5520_s29 + $0x2a0] sm:$0xff]   ;;  %v5237_v5 = vld [vmem:[%s5520_s29 + $0xa8] sm:$0xff]  }
  0x2a   : > { %2667 = vbcast.lane.b32.xlu1 %v2637_v7, 312  ;;  %2663 = vbcast.lane.b32.xlu0 %v2637_v7, 304  ;;  %v5239_v7 = vld [vmem:[%s5520_s29 + $0xb0] sm:$0xff]   ;;  %v5276_v9 = vld [vmem:[%s5520_s29 + $0x2a8] sm:$0xff]   ;;  %v5280_v3 = vld [vmem:[%s5520_s29 + $0x2b8] sm:$0xff]  }
  0x2b   : > { %4888 = vmatpush3.bf16.msra.mxu0 %v5211_v11  ;;  %5162 = vmatpush3.bf16.msra.mxu1 %v5211_v11  ;;  %v5278_v10 = vld [vmem:[%s5520_s29 + $0x2b0] sm:$0xff]   ;;  %v2882_v11 = vrot.slane %v5506_v6, %v5606_v8  ;;  %v5245_v19 = vld [vmem:[%s5520_s29 + $0xc8] sm:$0xff]  }
  0x2c   : > { %4889 = vmatprep.subr.bf16.mxu0 %v5212_v13  ;;  %5155 = vmatprep.subr.bf16.mxu1 %v5212_v13  ;;  %v5247_v6 = vld [vmem:[%s5520_s29 + $0xd0] sm:$0xff]  }
  0x2e   : > { %2678 = vbcast.lane.b32.xlu1 %v2672_v14, 264  ;;  %2674 = vbcast.lane.b32.xlu0 %v2672_v14, 256 }
  0x2f   : > { %4890 = vmatpush3.bf16.msra.mxu0 %v5212_v13  ;;  %5163 = vmatpush3.bf16.msra.mxu1 %v5212_v13  ;;  %v5241_v13 = vld [vmem:[%s5520_s29 + $0xb8] sm:$0xff]  }
  0x30   : > { %4891 = vmatprep.subr.bf16.mxu0 %v5213_v15  ;;  %5156 = vmatprep.subr.bf16.mxu1 %v5213_v15 }
  0x32   : > { %2686 = vbcast.lane.b32.xlu1 %v2672_v14, 280  ;;  %2682 = vbcast.lane.b32.xlu0 %v2672_v14, 272 }
  0x33   : > { %4892 = vmatpush3.bf16.msra.mxu0 %v5213_v15  ;;  %5164 = vmatpush3.bf16.msra.mxu1 %v5213_v15  ;;  %v5282_v15 = vld [vmem:[%s5520_s29 + $0x2c0] sm:$0xff]  }
  0x36   : > { %2694 = vbcast.lane.b32.xlu1 %v2672_v14, 296  ;;  %2690 = vbcast.lane.b32.xlu0 %v2672_v14, 288 }
  0x37   : > { %4894 = vmatmul.mubr.bf16.vlgmr.msra.gmra.mrb[0].mxu0 %v5215_v16  ;;  %5022 = vmatmul.mubr.bf16.vlgmr.msra.gmra.mrb[0].mxu1 %v5236_v20 }
  0x38   : > { %4897 = vmatprep.mubr.bf16.mxu0 %v5216_v17  ;;  %5025 = vmatprep.mubr.bf16.mxu1 %v5238_v23  ;;  %v5284_v23 = vld [vmem:[%s5520_s29 + $0x2c8] sm:$0xff]  }
  0x3a   : > { %2702 = vbcast.lane.b32.xlu1 %v2672_v14, 312  ;;  %2698 = vbcast.lane.b32.xlu0 %v2672_v14, 304  ;;  %v5243_v14 = vld [vmem:[%s5520_s29 + $0xc0] sm:$0xff]  }
  0x3e   : > { %2713 = vbcast.lane.b32.xlu1 %v2707_v21, 264  ;;  %2709 = vbcast.lane.b32.xlu0 %v2707_v21, 256 }
  0x3f   : > { %4898 = vmatmul.mubr.bf16.gmra.mrb[4].mxu0 %v5217_v22  ;;  %5026 = vmatmul.mubr.bf16.gmra.mrb[4].mxu1 %v5240_v25  ;;  %v5627_v22 = vld [vmem:[%s5503_s11 + $0x8] sm:$0xff] }
  0x40   : > { %4901 = vmatprep.mubr.bf16.mxu0 %v5218_v24  ;;  %5029 = vmatprep.mubr.bf16.mxu1 %v5242_v26  ;;  %v5286_v24 = vld [vmem:[%s5520_s29 + $0x2d0] sm:$0xff]  }
  0x42   : > { %2721 = vbcast.lane.b32.xlu1 %v2707_v21, 280  ;;  %2717 = vbcast.lane.b32.xlu0 %v2707_v21, 272 }
  0x46   : > { %2729 = vbcast.lane.b32.xlu1 %v2707_v21, 296  ;;  %2725 = vbcast.lane.b32.xlu0 %v2707_v21, 288 }
  0x47   : > { %4902 = vmatmul.mubr.bf16.gmra.mrb[8].mxu0 %v5219_v27  ;;  %5030 = vmatmul.mubr.bf16.gmra.mrb[8].mxu1 %v5244_v30  ;;  %v2917_v27 = vrot.slane %v5627_v22, %v5495_v4 }
  0x48   : > { %4905 = vmatprep.mubr.bf16.mxu0 %v5220_v28  ;;  %5033 = vmatprep.mubr.bf16.mxu1 %v5246_v31  ;;  %v5249_v28 = vld [vmem:[%s5520_s29 + $0xd8] sm:$0xff]  }
  0x4a   : > { %2737 = vbcast.lane.b32.xlu1 %v2707_v21, 312  ;;  %2733 = vbcast.lane.b32.xlu0 %v2707_v21, 304 }
  0x4e   : > { %2748 = vbcast.lane.b32.xlu1 %v2742_v32, 264  ;;  %2744 = vbcast.lane.b32.xlu0 %v2742_v32, 256 }
  0x4f   : > { %4906 = vmatmul.mubr.bf16.gmra.mrb[12].mxu0 %v5221_v33  ;;  %5034 = vmatmul.mubr.bf16.gmra.mrb[12].mxu1 %v5248_v35  ;;  %v5288_v33 = vld [vmem:[%s5520_s29 + $0x2d8] sm:$0xff]  }
  0x50   : > { %4909 = vmatprep.mubr.bf16.mxu0 %v5222_v34  ;;  %5037 = vmatprep.mubr.bf16.mxu1 %v5250_v36  ;;  %v5290_v36 = vld [vmem:[%s5520_s29 + $0x2e0] sm:$0xff]  }
  0x52   : > { %2756 = vbcast.lane.b32.xlu1 %v2742_v32, 280  ;;  %2752 = vbcast.lane.b32.xlu0 %v2742_v32, 272 }
  0x56   : > { %2764 = vbcast.lane.b32.xlu1 %v2742_v32, 296  ;;  %2760 = vbcast.lane.b32.xlu0 %v2742_v32, 288 }
  0x57   : > { %4910 = vmatmul.mubr.bf16.gmra.mrb[16].mxu0 %v5223_v37  ;;  %5038 = vmatmul.mubr.bf16.gmra.mrb[16].mxu1 %v5252_v40  ;;  %v5253_v37 = vld [vmem:[%s5520_s29 + $0xe8] sm:$0xff]  }
  0x58   : > { %4913 = vmatprep.mubr.bf16.mxu0 %v5224_v38  ;;  %5041 = vmatprep.mubr.bf16.mxu1 %v5254_v41  ;;  %v5255_v41 = vld [vmem:[%s5520_s29 + $0xf0] sm:$0xff]  }
  0x5a   : > { %2772 = vbcast.lane.b32.xlu1 %v2742_v32, 312  ;;  %2768 = vbcast.lane.b32.xlu0 %v2742_v32, 304  ;;  %v5251_v32 = vld [vmem:[%s5520_s29 + $0xe0] sm:$0xff]  }
  0x5e   : > { %2783 = vbcast.lane.b32.xlu1 %v2777_v42, 264  ;;  %2779 = vbcast.lane.b32.xlu0 %v2777_v42, 256 }
  0x5f   : > { %4914 = vmatmul.mubr.bf16.gmra.mrb[20].mxu0 %v5225_v43  ;;  %5042 = vmatmul.mubr.bf16.gmra.mrb[20].mxu1 %v5256_v45  ;;  %v5294_v45 = vld [vmem:[%s5520_s29 + $0x2f0] sm:$0xff]  }
  0x60   : > { %4917 = vmatprep.mubr.bf16.mxu0 %v5226_v44  ;;  %5045 = vmatprep.mubr.bf16.mxu1 %v5258_v46  ;;  %v2952_v46 = vrot.slane %v5627_v22, %v5527_v12 }
  0x62   : > { %2791 = vbcast.lane.b32.xlu1 %v2777_v42, 280  ;;  %2787 = vbcast.lane.b32.xlu0 %v2777_v42, 272 }
  0x66   : > { %2799 = vbcast.lane.b32.xlu1 %v2777_v42, 296  ;;  %2795 = vbcast.lane.b32.xlu0 %v2777_v42, 288 }
  0x67   : > { %4918 = vmatmul.mubr.bf16.gmra.mrb[24].mxu0 %v5227_v47  ;;  %5046 = vmatmul.mubr.bf16.gmra.mrb[24].mxu1 %v5260_v50  ;;  %v5257_v47 = vld [vmem:[%s5520_s29 + $0xf8] sm:$0xff]  }
  0x68   : > { %4921 = vmatprep.mubr.bf16.mxu0 %v5228_v48  ;;  %5049 = vmatprep.mubr.bf16.mxu1 %v5262_v51  ;;  %v5259_v51 = vld [vmem:[%s5520_s29 + $0x100] sm:$0xff]  }
  0x6a   : > { %2807 = vbcast.lane.b32.xlu1 %v2777_v42, 312  ;;  %2803 = vbcast.lane.b32.xlu0 %v2777_v42, 304  ;;  %v5292_v42 = vld [vmem:[%s5520_s29 + $0x2e8] sm:$0xff]  }
  0x6e   : > { %2818 = vbcast.lane.b32.xlu1 %v2812_v52, 264  ;;  %2814 = vbcast.lane.b32.xlu0 %v2812_v52, 256 }
  0x6f   : > { %4922 = vmatmul.mubr.bf16.gmra.mrb[28].mxu0 %v5229_v53  ;;  %5050 = vmatmul.mubr.bf16.gmra.mrb[28].mxu1 %v5264_v55  ;;  %v5298_v55 = vld [vmem:[%s5520_s29 + $0x300] sm:$0xff]  }
  0x70   : > { %4925 = vmatprep.mubr.bf16.mxu0 %v5230_v54  ;;  %5053 = vmatprep.mubr.bf16.mxu1 %v5266_v56  ;;  %v5261_v56 = vld [vmem:[%s5520_s29 + $0x108] sm:$0xff]  }
  0x72   : > { %2826 = vbcast.lane.b32.xlu1 %v2812_v52, 280  ;;  %2822 = vbcast.lane.b32.xlu0 %v2812_v52, 272 }
  0x76   : > { %2834 = vbcast.lane.b32.xlu1 %v2812_v52, 296  ;;  %2830 = vbcast.lane.b32.xlu0 %v2812_v52, 288 }
  0x77   : > { %4926 = vmatmul.mubr.bf16.gmra.mrb[32].mxu0 %v5231_v57  ;;  %5054 = vmatmul.mubr.bf16.gmra.mrb[32].mxu1 %v5268_v60  ;;  %v5263_v60 = vld [vmem:[%s5520_s29 + $0x110] sm:$0xff]  }
  0x78   : > { %4929 = vmatprep.mubr.bf16.mxu0 %v5232_v58  ;;  %5057 = vmatprep.mubr.bf16.mxu1 %v5270_v61  ;;  %v5300_v61 = vld [vmem:[%s5520_s29 + $0x308] sm:$0xff]  }
  0x7a   : > { %2842 = vbcast.lane.b32.xlu1 %v2812_v52, 312  ;;  %2838 = vbcast.lane.b32.xlu0 %v2812_v52, 304  ;;  %v5296_v52 = vld [vmem:[%s5520_s29 + $0x2f8] sm:$0xff]  }
  0x7e   : > { %2853 = vbcast.lane.b32.xlu1 %v2847_v63, 264  ;;  %2849 = vbcast.lane.b32.xlu0 %v2847_v63, 256 }
  0x7f   : > { %4930 = vmatmul.mubr.bf16.gmra.mrb[36].mxu0 %v5233_v62  ;;  %5058 = vmatmul.mubr.bf16.gmra.mrb[36].mxu1 %v5272_v1  ;;  %v2987_v1 = vrot.slane %v5627_v22, %v5540_v18 }
  0x80   : > { %4933 = vmatprep.mubr.bf16.mxu0 %v5235_v0  ;;  %5061 = vmatprep.mubr.bf16.mxu1 %v5274_v2  ;;  %v5302_v0 = vld [vmem:[%s5520_s29 + $0x310] sm:$0xff]   ;;  %v5265_v2 = vld [vmem:[%s5520_s29 + $0x118] sm:$0xff]  }
  0x82   : > { %2861 = vbcast.lane.b32.xlu1 %v2847_v63, 280  ;;  %2857 = vbcast.lane.b32.xlu0 %v2847_v63, 272 }
  0x86   : > { %2869 = vbcast.lane.b32.xlu1 %v2847_v63, 296  ;;  %2865 = vbcast.lane.b32.xlu0 %v2847_v63, 288 }
  0x87   : > { %4934 = vmatmul.mubr.bf16.gmra.mrb[40].mxu0 %v5237_v5  ;;  %5062 = vmatmul.mubr.bf16.gmra.mrb[40].mxu1 %v5276_v9  ;;  %v5267_v9 = vld [vmem:[%s5520_s29 + $0x120] sm:$0xff]  }
  0x88   : > { %4937 = vmatprep.mubr.bf16.mxu0 %v5239_v7  ;;  %5065 = vmatprep.mubr.bf16.mxu1 %v5278_v10  ;;  %v5304_v10 = vld [vmem:[%s5520_s29 + $0x318] sm:$0xff]  }
  0x8a   : > { %2877 = vbcast.lane.b32.xlu1 %v2847_v63, 312  ;;  %2873 = vbcast.lane.b32.xlu0 %v2847_v63, 304 }
  0x8e   : > { %2888 = vbcast.lane.b32.xlu1 %v2882_v11, 264  ;;  %2884 = vbcast.lane.b32.xlu0 %v2882_v11, 256 }
  0x8f   : > { %4938 = vmatmul.mubr.bf16.gmra.mrb[44].mxu0 %v5241_v13  ;;  %5066 = vmatmul.mubr.bf16.gmra.mrb[44].mxu1 %v5280_v3  ;;  %v5269_v3 = vld [vmem:[%s5520_s29 + $0x128] sm:$0xff]  }
  0x90   : > { %v5616_v16 = vpop.permute.xlu1 %2647  ;;  %v5618_v17 = vpop.permute.xlu0 %2639  ;;  %4941 = vmatprep.mubr.bf16.mxu0 %v5243_v14  ;;  %5069 = vmatprep.mubr.bf16.mxu1 %v5282_v15  ;;  %v5306_v14 = vld [vmem:[%s5520_s29 + $0x320] sm:$0xff]  }
  0x92   : > { %2896 = vbcast.lane.b32.xlu1 %v2882_v11, 280  ;;  %2892 = vbcast.lane.b32.xlu0 %v2882_v11, 272 }
  0x94   : > { %v5622_v20 = vpop.permute.xlu1 %2651  ;;  %v5624_v21 = vpop.permute.xlu0 %2643 }
  0x96   : > { %2904 = vbcast.lane.b32.xlu1 %v2882_v11, 296  ;;  %2900 = vbcast.lane.b32.xlu0 %v2882_v11, 288 }
  0x97   : > { %4942 = vmatmul.mubr.bf16.gmra.mrb[48].mxu0 %v5245_v19  ;;  %5070 = vmatmul.mubr.bf16.gmra.mrb[48].mxu1 %v5284_v23  ;;  %v5308_v23 = vld [vmem:[%s5520_s29 + $0x328] sm:$0xff]  }
  0x98   : > { %v5631_v25 = vpop.permute.xlu1 %2659  ;;  %v5633_v26 = vpop.permute.xlu0 %2655  ;;  %4945 = vmatprep.mubr.bf16.mxu0 %v5247_v6  ;;  %5073 = vmatprep.mubr.bf16.mxu1 %v5286_v24  ;;  %v5271_v6 = vld [vmem:[%s5520_s29 + $0x130] sm:$0xff]  }
  0x9a   : > { %2912 = vbcast.lane.b32.xlu1 %v2882_v11, 312  ;;  %2908 = vbcast.lane.b32.xlu0 %v2882_v11, 304 }
  0x9c   : > { %v5638_v30 = vpop.permute.xlu1 %2667  ;;  %v5640_v31 = vpop.permute.xlu0 %2663 }
  0x9e   : > { %2923 = vbcast.lane.b32.xlu1 %v2917_v27, 264  ;;  %2919 = vbcast.lane.b32.xlu0 %v2917_v27, 256 }
  0x9f   : > { %4946 = vmatmul.mubr.bf16.gmra.mrb[52].mxu0 %v5249_v28  ;;  %5074 = vmatmul.mubr.bf16.gmra.mrb[52].mxu1 %v5288_v33  ;;  %v5310_v28 = vld [vmem:[%s5520_s29 + $0x330] sm:$0xff]   ;;  %v5273_v33 = vld [vmem:[%s5520_s29 + $0x138] sm:$0xff]  }
  0xa0   : > { %v5644_v34 = vpop.permute.xlu1 %2678  ;;  %v5646_v35 = vpop.permute.xlu0 %2674  ;;  %4949 = vmatprep.mubr.bf16.mxu0 %v5251_v32  ;;  %5077 = vmatprep.mubr.bf16.mxu1 %v5290_v36  ;;  %v3022_v32 = vrot.slane %v5627_v22, %v5554_v29 }
  0xa2   : > { %2931 = vbcast.lane.b32.xlu1 %v2917_v27, 280  ;;  %2927 = vbcast.lane.b32.xlu0 %v2917_v27, 272 }
  0xa4   : > { %v5650_v38 = vpop.permute.xlu1 %2686  ;;  %v5652_v40 = vpop.permute.xlu0 %2682 }
  0xa6   : > { %2939 = vbcast.lane.b32.xlu1 %v2917_v27, 296  ;;  %2935 = vbcast.lane.b32.xlu0 %v2917_v27, 288 }
  0xa7   : > { %4950 = vmatmul.mubr.bf16.gmra.mrb[56].mxu0 %v5253_v37  ;;  %5078 = vmatmul.mubr.bf16.gmra.mrb[56].mxu1 %v5292_v42  ;;  %v5312_v42 = vld [vmem:[%s5520_s29 + $0x338] sm:$0xff]  }
  0xa8   : > { %v5656_v43 = vpop.permute.xlu1 %2694  ;;  %v5658_v44 = vpop.permute.xlu0 %2690  ;;  %4953 = vmatprep.mubr.bf16.mxu0 %v5255_v41  ;;  %5081 = vmatprep.mubr.bf16.mxu1 %v5294_v45  ;;  %v5275_v41 = vld [vmem:[%s5520_s29 + $0x140] sm:$0xff]  }
  0xaa   : > { %2947 = vbcast.lane.b32.xlu1 %v2917_v27, 312  ;;  %2943 = vbcast.lane.b32.xlu0 %v2917_v27, 304 }
  0xac   : > { %v5664_v48 = vpop.permute.xlu1 %2702  ;;  %v5666_v50 = vpop.permute.xlu0 %2698 }
  0xae   : > { %2958 = vbcast.lane.b32.xlu1 %v2952_v46, 264  ;;  %2954 = vbcast.lane.b32.xlu0 %v2952_v46, 256 }
  0xaf   : > { %4954 = vmatmul.mubr.bf16.gmra.mrb[60].mxu0 %v5257_v47  ;;  %5082 = vmatmul.mubr.bf16.gmra.mrb[60].mxu1 %v5296_v52  ;;  %v5314_v47 = vld [vmem:[%s5520_s29 + $0x340] sm:$0xff]  }
  0xb0   : > { %v5670_v53 = vpop.permute.xlu1 %2713  ;;  %v5672_v54 = vpop.permute.xlu0 %2709  ;;  %4957 = vmatprep.mubr.bf16.mxu0 %v5259_v51  ;;  %5085 = vmatprep.mubr.bf16.mxu1 %v5298_v55  ;;  %v5277_v51 = vld [vmem:[%s5520_s29 + $0x148] sm:$0xff]  }
  0xb2   : > { %2966 = vbcast.lane.b32.xlu1 %v2952_v46, 280  ;;  %2962 = vbcast.lane.b32.xlu0 %v2952_v46, 272 }
  0xb4   : > { %v5676_v57 = vpop.permute.xlu1 %2721  ;;  %v5678_v58 = vpop.permute.xlu0 %2717 }
  0xb6   : > { %2974 = vbcast.lane.b32.xlu1 %v2952_v46, 296  ;;  %2970 = vbcast.lane.b32.xlu0 %v2952_v46, 288 }
  0xb7   : > { %4958 = vmatmul.mubr.bf16.gmra.mrb[64].mxu0 %v5261_v56  ;;  %5086 = vmatmul.mubr.bf16.gmra.mrb[64].mxu1 %v5300_v61  ;;  %v5279_v56 = vld [vmem:[%s5520_s29 + $0x150] sm:$0xff]  }
  0xb8   : > { %v5682_v62 = vpop.permute.xlu1 %2729  ;;  %v5684_v63 = vpop.permute.xlu0 %2725  ;;  %4961 = vmatprep.mubr.bf16.mxu0 %v5263_v60  ;;  %5089 = vmatprep.mubr.bf16.mxu1 %v5302_v0  ;;  %v5316_v60 = vld [vmem:[%s5520_s29 + $0x348] sm:$0xff]  }
  0xba   : > { %2982 = vbcast.lane.b32.xlu1 %v2952_v46, 312  ;;  %2978 = vbcast.lane.b32.xlu0 %v2952_v46, 304 }
  0xbc   : > { %v5690_v5 = vpop.permute.xlu1 %2737  ;;  %v5692_v7 = vpop.permute.xlu0 %2733 }
  0xbe   : > { %2993 = vbcast.lane.b32.xlu1 %v2987_v1, 264  ;;  %2989 = vbcast.lane.b32.xlu0 %v2987_v1, 256 }
  0xbf   : > { %4962 = vmatmul.mubr.bf16.gmra.mrb[68].mxu0 %v5265_v2  ;;  %5090 = vmatmul.mubr.bf16.gmra.mrb[68].mxu1 %v5304_v10  ;;  %v3057_v2 = vrot.slane %v5627_v22, %v5567_v39 }
  0xc0   : > { %v5696_v11 = vpop.permute.xlu1 %2748  ;;  %v5698_v13 = vpop.permute.xlu0 %2744  ;;  %4965 = vmatprep.mubr.bf16.mxu0 %v5267_v9  ;;  %5093 = vmatprep.mubr.bf16.mxu1 %v5306_v14  ;;  %v5281_v9 = vld [vmem:[%s5520_s29 + $0x158] sm:$0xff]  }
  0xc2   : > { %3001 = vbcast.lane.b32.xlu1 %v2987_v1, 280  ;;  %2997 = vbcast.lane.b32.xlu0 %v2987_v1, 272 }
  0xc4   : > { %v5702_v15 = vpop.permute.xlu1 %2756  ;;  %v5704_v19 = vpop.permute.xlu0 %2752 }
  0xc6   : > { %3009 = vbcast.lane.b32.xlu1 %v2987_v1, 296  ;;  %3005 = vbcast.lane.b32.xlu0 %v2987_v1, 288 }
  0xc7   : > { %4966 = vmatmul.mubr.bf16.gmra.mrb[72].mxu0 %v5269_v3  ;;  %5094 = vmatmul.mubr.bf16.gmra.mrb[72].mxu1 %v5308_v23  ;;  %v5283_v3 = vld [vmem:[%s5520_s29 + $0x160] sm:$0xff]  }
  0xc8   : > { %v5708_v24 = vpop.permute.xlu1 %2764  ;;  %v5710_v27 = vpop.permute.xlu0 %2760  ;;  %4969 = vmatprep.mubr.bf16.mxu0 %v5271_v6  ;;  %5097 = vmatprep.mubr.bf16.mxu1 %v5310_v28  ;;  %v5320_v6 = vld [vmem:[%s5520_s29 + $0x358] sm:$0xff]  }
  0xca   : > { %3017 = vbcast.lane.b32.xlu1 %v2987_v1, 312  ;;  %3013 = vbcast.lane.b32.xlu0 %v2987_v1, 304  ;;  %v5318_v1 = vld [vmem:[%s5520_s29 + $0x350] sm:$0xff]  }
  0xcc   : > { %v5716_v36 = vpop.permute.xlu1 %2772  ;;  %v5718_v37 = vpop.permute.xlu0 %2768 }
  0xce   : > { %3028 = vbcast.lane.b32.xlu1 %v3022_v32, 264  ;;  %3024 = vbcast.lane.b32.xlu0 %v3022_v32, 256 }
  0xcf   : > { %4970 = vmatmul.mubr.bf16.gmra.mrb[76].mxu0 %v5273_v33  ;;  %5098 = vmatmul.mubr.bf16.gmra.mrb[76].mxu1 %v5312_v42  ;;  %v5285_v33 = vld [vmem:[%s5520_s29 + $0x168] sm:$0xff]  }
  0xd0   : > { %v5722_v45 = vpop.permute.xlu1 %2783  ;;  %v5724_v46 = vpop.permute.xlu0 %2779  ;;  %4973 = vmatprep.mubr.bf16.mxu0 %v5275_v41  ;;  %5101 = vmatprep.mubr.bf16.mxu1 %v5314_v47  ;;  %v5287_v47 = vld [vmem:[%s5520_s29 + $0x170] sm:$0xff]  }
  0xd2   : > { %3036 = vbcast.lane.b32.xlu1 %v3022_v32, 280  ;;  %3032 = vbcast.lane.b32.xlu0 %v3022_v32, 272 }
  0xd4   : > { %v5728_v52 = vpop.permute.xlu1 %2791  ;;  %v5730_v55 = vpop.permute.xlu0 %2787 }
  0xd6   : > { %3044 = vbcast.lane.b32.xlu1 %v3022_v32, 296  ;;  %3040 = vbcast.lane.b32.xlu0 %v3022_v32, 288 }
  0xd7   : > { %4974 = vmatmul.mubr.bf16.gmra.mrb[80].mxu0 %v5277_v51  ;;  %5102 = vmatmul.mubr.bf16.gmra.mrb[80].mxu1 %v5316_v60  ;;  %v5323_v51 = vld [vmem:[%s5520_s29 + $0x368] sm:$0xff]  }
  0xd8   : > { %v5734_v61 = vpop.permute.xlu1 %2799  ;;  %v5736_v0 = vpop.permute.xlu0 %2795  ;;  %4977 = vmatprep.mubr.bf16.mxu0 %v5279_v56  ;;  %5105 = vmatprep.mubr.bf16.mxu1 %v5318_v1  ;;  %v5324_v1 = vld [vmem:[%s5520_s29 + $0x370] sm:$0xff]  }
  0xda   : > { %3052 = vbcast.lane.b32.xlu1 %v3022_v32, 312  ;;  %3048 = vbcast.lane.b32.xlu0 %v3022_v32, 304  ;;  %v5322_v32 = vld [vmem:[%s5520_s29 + $0x360] sm:$0xff]  }
  0xdc   : > { %v5742_v10 = vpop.permute.xlu1 %2807  ;;  %v5744_v14 = vpop.permute.xlu0 %2803 }
  0xdd   : > { %7490 = vst [vmem:[#allocation10_spill] sm:$0xff] %v5742_v10  ;;  %7491 = vst [vmem:[#allocation11_spill] sm:$0xff] %v5744_v14 }
  0xde   : > { %3063 = vbcast.lane.b32.xlu1 %v3057_v2, 264  ;;  %3059 = vbcast.lane.b32.xlu0 %v3057_v2, 256 }
  0xdf   : > { %4978 = vmatmul.mubr.bf16.gmra.mrb[84].mxu0 %v5281_v9  ;;  %5106 = vmatmul.mubr.bf16.gmra.mrb[84].mxu1 %v5320_v6  ;;  %v3092_v9 = vrot.slane %v5627_v22, %v5580_v49  ;;  %v5326_v49 = vld [vmem:[%s5520_s29 + $0x380] sm:$0xff]  }
  0xe0   : > { %v5748_v23 = vpop.permute.xlu1 %2818  ;;  %v5750_v28 = vpop.permute.xlu0 %2814  ;;  %4981 = vmatprep.mubr.bf16.mxu0 %v5283_v3  ;;  %5109 = vmatprep.mubr.bf16.mxu1 %v5322_v32  ;;  %v5289_v3 = vld [vmem:[%s5520_s29 + $0x178] sm:$0xff]  }
  0xe1   : > { %7492 = vst [vmem:[#allocation12_spill] sm:$0xff] %v5748_v23  ;;  %7493 = vst [vmem:[#allocation13_spill] sm:$0xff] %v5750_v28 }
  0xe2   : > { %3071 = vbcast.lane.b32.xlu1 %v3057_v2, 280  ;;  %3067 = vbcast.lane.b32.xlu0 %v3057_v2, 272 }
  0xe4   : > { %v5754_v41 = vpop.permute.xlu1 %2826  ;;  %v5756_v42 = vpop.permute.xlu0 %2822 }
  0xe5   : > { %7494 = vst [vmem:[#allocation14_spill] sm:$0xff] %v5754_v41  ;;  %7495 = vst [vmem:[#allocation15_spill] sm:$0xff] %v5756_v42  ;;  %v5334_v42 = vld [vmem:[%s5520_s29 + $0x3c0] sm:$0xff]  }
  0xe6   : > { %3079 = vbcast.lane.b32.xlu1 %v3057_v2, 296  ;;  %3075 = vbcast.lane.b32.xlu0 %v3057_v2, 288 }
  0xe7   : > { %4982 = vmatmul.mubr.bf16.gmra.mrb[88].mxu0 %v5285_v33  ;;  %5110 = vmatmul.mubr.bf16.gmra.mrb[88].mxu1 %v5323_v51  ;;  %v5291_v33 = vld [vmem:[%s5520_s29 + $0x180] sm:$0xff]   ;;  %v5293_v51 = vld [vmem:[%s5520_s29 + $0x188] sm:$0xff]  }
  0xe8   : > { %v5760_v56 = vpop.permute.xlu1 %2834  ;;  %v5762_v60 = vpop.permute.xlu0 %2830  ;;  %4985 = vmatprep.mubr.bf16.mxu0 %v5287_v47  ;;  %5113 = vmatprep.mubr.bf16.mxu1 %v5324_v1  ;;  %v5325_v47 = vld [vmem:[%s5520_s29 + $0x378] sm:$0xff]  }
  0xe9   : > { %7496 = vst [vmem:[#allocation16_spill] sm:$0xff] %v5760_v56  ;;  %7497 = vst [vmem:[#allocation17_spill] sm:$0xff] %v5762_v60 }
  0xea   : > { %3087 = vbcast.lane.b32.xlu1 %v3057_v2, 312  ;;  %3083 = vbcast.lane.b32.xlu0 %v3057_v2, 304 }
  0xec   : > { %v5768_v6 = vpop.permute.xlu1 %2842  ;;  %v5770_v32 = vpop.permute.xlu0 %2838 }
  0xed   : > { %7498 = vst [vmem:[#allocation18_spill] sm:$0xff] %v5768_v6  ;;  %7499 = vst [vmem:[#allocation19_spill] sm:$0xff] %v5770_v32  ;;  %v5295_v32 = vld [vmem:[%s5520_s29 + $0x190] sm:$0xff]  }
  0xee   : > { %3098 = vbcast.lane.b32.xlu1 %v3092_v9, 264  ;;  %3094 = vbcast.lane.b32.xlu0 %v3092_v9, 256 }
  0xef   : > { %4986 = vmatmul.mubr.bf16.gmra.mrb[92].mxu0 %v5289_v3  ;;  %5114 = vmatmul.mubr.bf16.gmra.mrb[92].mxu1 %v5325_v47  ;;  %v5327_v3 = vld [vmem:[%s5520_s29 + $0x388] sm:$0xff]   ;;  %v3127_v47 = vrot.slane %v5627_v22, %v5593_v59  ;;  %v5307_v59 = vld [vmem:[%s5520_s29 + $0x1c0] sm:$0xff]  }
  0xf0   : > { %v5774_v56 = vpop.permute.xlu1 %2853  ;;  %v5776_v2 = vpop.permute.xlu0 %2849  ;;  %4989 = vmatprep.mubr.bf16.mxu0 %v5291_v33  ;;  %5117 = vmatprep.mubr.bf16.mxu1 %v5326_v49 }
  0xf1   : > { %7500 = vst [vmem:[#allocation20_spill] sm:$0xff] %v5774_v56  ;;  %7501 = vst [vmem:[#allocation21_spill] sm:$0xff] %v5776_v2  ;;  %v5328_v2 = vld [vmem:[%s5520_s29 + $0x390] sm:$0xff]  }
  0xf2   : > { %3106 = vbcast.lane.b32.xlu1 %v3092_v9, 280  ;;  %3102 = vbcast.lane.b32.xlu0 %v3092_v9, 272 }
  0xf4   : > { %v5780_v6 = vpop.permute.xlu1 %2861  ;;  %v5782_v1 = vpop.permute.xlu0 %2857 }
  0xf5   : > { %7502 = vst [vmem:[#allocation22_spill] sm:$0xff] %v5780_v6  ;;  %7503 = vst [vmem:[#allocation23_spill] sm:$0xff] %v5782_v1  ;;  %v5297_v6 = vld [vmem:[%s5520_s29 + $0x198] sm:$0xff]   ;;  %v5299_v1 = vld [vmem:[%s5520_s29 + $0x1a0] sm:$0xff]  }
  0xf6   : > { %3114 = vbcast.lane.b32.xlu1 %v3092_v9, 296  ;;  %3110 = vbcast.lane.b32.xlu0 %v3092_v9, 288 }
  0xf7   : > { %4990 = vmatmul.mubr.bf16.gmra.mrb[96].mxu0 %v5293_v51  ;;  %5118 = vmatmul.mubr.bf16.gmra.mrb[96].mxu1 %v5327_v3  ;;  %v5301_v3 = vld [vmem:[%s5520_s29 + $0x1a8] sm:$0xff]  }
  0xf8   : > { %v5786_v56 = vpop.permute.xlu1 %2869  ;;  %v5788_v33 = vpop.permute.xlu0 %2865  ;;  %4993 = vmatprep.mubr.bf16.mxu0 %v5295_v32  ;;  %5121 = vmatprep.mubr.bf16.mxu1 %v5328_v2  ;;  %v5329_v32 = vld [vmem:[%s5520_s29 + $0x398] sm:$0xff]   ;;  %v5303_v2 = vld [vmem:[%s5520_s29 + $0x1b0] sm:$0xff]  }
  0xf9   : > { %7504 = vst [vmem:[#allocation24_spill] sm:$0xff] %v5786_v56  ;;  %7505 = vst [vmem:[#allocation25_spill] sm:$0xff] %v5788_v33  ;;  %v5330_v33 = vld [vmem:[%s5520_s29 + $0x3a0] sm:$0xff]  }
  0xfa   : > { %3122 = vbcast.lane.b32.xlu1 %v3092_v9, 312  ;;  %3118 = vbcast.lane.b32.xlu0 %v3092_v9, 304 }
  0xfc   : > { %v5794_v49 = vpop.permute.xlu1 %2877  ;;  %v5796_v51 = vpop.permute.xlu0 %2873 }
  0xfd   : > { %7506 = vst [vmem:[#allocation26_spill] sm:$0xff] %v5794_v49  ;;  %7507 = vst [vmem:[#allocation27_spill] sm:$0xff] %v5796_v51 }
  0xfe   : > { %3133 = vbcast.lane.b32.xlu1 %v3127_v47, 264  ;;  %3129 = vbcast.lane.b32.xlu0 %v3127_v47, 256 }
  0xff   : > { %4994 = vmatmul.mubr.bf16.gmra.mrb[100].mxu0 %v5297_v6  ;;  %5122 = vmatmul.mubr.bf16.gmra.mrb[100].mxu1 %v5329_v32  ;;  %v5331_v6 = vld [vmem:[%s5520_s29 + $0x3a8] sm:$0xff]   ;;  %v5820_v32 = vld [vmem:[%s7446_s3] ss:$0 sm:$0xff] }
 0x100   : > { %v5800_v56 = vpop.permute.xlu1 %2888  ;;  %v5802_v9 = vpop.permute.xlu0 %2884  ;;  %4997 = vmatprep.mubr.bf16.mxu0 %v5299_v1  ;;  %5125 = vmatprep.mubr.bf16.mxu1 %v5330_v33  ;;  %v5824_v33 = vrot.slane %v5627_v22, %v5606_v8 }
 0x101   : > { %7508 = vst [vmem:[#allocation28_spill] sm:$0xff] %v5800_v56  ;;  %7509 = vst [vmem:[#allocation29_spill] sm:$0xff] %v5802_v9  ;;  %v5332_v9 = vld [vmem:[%s5520_s29 + $0x3b0] sm:$0xff]  }
 0x102   : > { %3141 = vbcast.lane.b32.xlu1 %v3127_v47, 280  ;;  %3137 = vbcast.lane.b32.xlu0 %v3127_v47, 272 }
 0x104   : > { %v5806_v49 = vpop.permute.xlu1 %2896  ;;  %v5808_v51 = vpop.permute.xlu0 %2892 }
 0x105   : > { %7510 = vst [vmem:[#allocation30_spill] sm:$0xff] %v5806_v49  ;;  %7511 = vst [vmem:[#allocation31_spill] sm:$0xff] %v5808_v51  ;;  %v5305_v51 = vld [vmem:[%s5520_s29 + $0x1b8] sm:$0xff]  }
 0x106   : > { %3149 = vbcast.lane.b32.xlu1 %v3127_v47, 296  ;;  %3145 = vbcast.lane.b32.xlu0 %v3127_v47, 288 }
 0x107   : > { %4998 = vmatmul.mubr.bf16.gmra.mrb[104].mxu0 %v5301_v3  ;;  %5126 = vmatmul.mubr.bf16.gmra.mrb[104].mxu1 %v5331_v6 }
 0x108   : > { %v5812_v56 = vpop.permute.xlu1 %2904  ;;  %v5814_v1 = vpop.permute.xlu0 %2900  ;;  %5001 = vmatprep.mubr.bf16.mxu0 %v5303_v2  ;;  %5129 = vmatprep.mubr.bf16.mxu1 %v5332_v9 }
 0x109   : > { %7512 = vst [vmem:[#allocation32_spill] sm:$0xff] %v5812_v56  ;;  %7513 = vst [vmem:[#allocation33_spill] sm:$0xff] %v5814_v1 }
 0x10a   : > { %3157 = vbcast.lane.b32.xlu1 %v3127_v47, 312  ;;  %3153 = vbcast.lane.b32.xlu0 %v3127_v47, 304  ;;  %v4895_v49 = vpop.f32.mrb[0].mxu0  ;;  %v5836_v22 = vpop.f32.mrb[0].mxu1 }
 0x10b   : > { %v1351_v3 = vpop.f32.mrb[1].mxu0  ;;  %v1360_v47 = vadd.f32 %v4895_v49, %v5820_v32  ;;  %v5841_v8 = vpop.f32.mrb[1].mxu1 }
 0x10c   : > { %v1352_v56 = vadd.f32 %v5820_v32, %v1351_v3  ;;  %v5828_v2 = vpop.permute.xlu1 %2912  ;;  %v5830_v1 = vpop.permute.xlu0 %2908  ;;  %7516 = vst [vmem:[#allocation36_spill] sm:$0xff] %v5841_v8 }
 0x10d   : > { %7514 = vst [vmem:[#allocation34_spill] sm:$0xff] %v5828_v2  ;;  %7515 = vst [vmem:[#allocation35_spill] sm:$0xff] %v5830_v1  ;;  %v4896_v60 = vpop.f32.mrb[2].mxu0  ;;  %v5333_v1 = vld [vmem:[%s5520_s29 + $0x3b8] sm:$0xff]   ;;  %v2376_v23 = vmax.f32 %v1360_v47, 0.0  ;;  %v5848_v10 = vpop.f32.mrb[2].mxu1 }
 0x10e   : > { %v1354_v41 = vpop.f32.mrb[3].mxu0  ;;  %3168 = vbcast.lane.b32.xlu1 %v5824_v33, 264  ;;  %3164 = vbcast.lane.b32.xlu0 %v5824_v33, 256  ;;  %v2374_v6 = vmax.f32 %v1352_v56, 0.0  ;;  %v1363_v3 = vadd.f32 %v4896_v60, %v5820_v32  ;;  %7519 = vst [vmem:[#allocation39_spill] sm:$0xff] %v5848_v10  ;;  %v5852_v56 = vpop.f32.mrb[3].mxu1 }
 0x10f   : > { %v1355_v2 = vadd.f32 %v5820_v32, %v1354_v41  ;;  %5002 = vmatmul.mubr.bf16.gmra.mrb[108].mxu0 %v5305_v51  ;;  %7520 = vst [vmem:[#allocation40_spill] sm:$0xff] %v5852_v56  ;;  %5130 = vmatmul.mubr.bf16.gmra.mrb[108].mxu1 %v5333_v1  ;;  %v5311_v10 = vld [vmem:[%s5520_s29 + $0x1d0] sm:$0xff]   ;;  %v3756_v56 = vmul.f32 %v5616_v16, %v2376_v23 }
 0x110   : > { %v5843_v9 = vpop.permute.xlu1 %2923  ;;  %v5845_v49 = vpop.permute.xlu0 %2919  ;;  %5005 = vmatprep.mubr.bf16.mxu0 %v5307_v59  ;;  %v3754_v60 = vmul.f32 %v5618_v17, %v2374_v6  ;;  %v2377_v51 = vmax.f32 %v1363_v3, 0.0  ;;  %v5309_v59 = vld [vmem:[%s5520_s29 + $0x1c8] sm:$0xff]   ;;  %5133 = vmatprep.mubr.bf16.mxu1 %v5334_v42  ;;  %v5873_v23 = vld [vmem:[%s5503_s11 + $0x10] sm:$0xff] }
 0x111   : > { %7517 = vst [vmem:[#allocation37_spill] sm:$0xff] %v5843_v9  ;;  %7518 = vst [vmem:[#allocation38_spill] sm:$0xff] %v5845_v49  ;;  %v2375_v28 = vmax.f32 %v1355_v2, 0.0 }
 0x112   : > { %3176 = vbcast.lane.b32.xlu1 %v5824_v33, 280  ;;  %3172 = vbcast.lane.b32.xlu0 %v5824_v33, 272  ;;  %v4899_v41 = vpop.f32.mrb[4].mxu0  ;;  %v5868_v3 = vpop.f32.mrb[4].mxu1  ;;  %v3757_v42 = vmul.f32 %v5622_v20, %v2377_v51 }
 0x113   : > { %v3755_v9 = vmul.f32 %v5624_v21, %v2375_v28  ;;  %v1367_v49 = vpop.f32.mrb[5].mxu0  ;;  %v1376_v17 = vadd.f32 %v4899_v41, %v5820_v32  ;;  %v5876_v41 = vpop.f32.mrb[5].mxu1 }
 0x114   : > { %v1368_v47 = vadd.f32 %v5820_v32, %v1367_v49  ;;  %v5858_v2 = vpop.permute.xlu1 %2931  ;;  %v5860_v14 = vpop.permute.xlu0 %2927 }
 0x115   : > { %7521 = vst [vmem:[#allocation41_spill] sm:$0xff] %v5858_v2  ;;  %7522 = vst [vmem:[#allocation42_spill] sm:$0xff] %v5860_v14  ;;  %v4010_v8 = vmax.f32 %v3754_v60, %v3755_v9  ;;  %v4900_v6 = vpop.f32.mrb[6].mxu0  ;;  %v5335_v9 = vld [vmem:[%s5520_s29 + $0x3c8] sm:$0xff]   ;;  %v5336_v2 = vld [vmem:[%s5520_s29 + $0x3d0] sm:$0xff]   ;;  %v2380_v14 = vmax.f32 %v1376_v17, 0.0 }
 0x116   : > { %v2378_v21 = vmax.f32 %v1368_v47, 0.0  ;;  %v1379_v28 = vadd.f32 %v4900_v6, %v5820_v32  ;;  %v1370_v1 = vpop.f32.mrb[7].mxu0  ;;  %3184 = vbcast.lane.b32.xlu1 %v5824_v33, 296  ;;  %3180 = vbcast.lane.b32.xlu0 %v5824_v33, 288 }
 0x117   : > { %v4011_v49 = vmax.f32 %v4010_v8, %v3756_v56  ;;  %v1371_v16 = vadd.f32 %v5820_v32, %v1370_v1  ;;  %5006 = vmatmul.mubr.bf16.gmra.mrb[112].mxu0 %v5309_v59  ;;  %v5884_v56 = vpop.f32.mrb[6].mxu1  ;;  %5134 = vmatmul.mubr.bf16.gmra.mrb[112].mxu1 %v5335_v9 }
 0x118   : > { %v3758_v60 = vmul.f32 %v5633_v26, %v2378_v21  ;;  %v5879_v47 = vpop.permute.xlu1 %2939  ;;  %v5881_v6 = vpop.permute.xlu0 %2935  ;;  %5009 = vmatprep.mubr.bf16.mxu0 %v5311_v10  ;;  %v2381_v51 = vmax.f32 %v1379_v28, 0.0  ;;  %v5890_v26 = vrot.slane %v5873_v23, %v5495_v4  ;;  %5137 = vmatprep.mubr.bf16.mxu1 %v5336_v2 }
 0x119   : > { %7523 = vst [vmem:[#allocation43_spill] sm:$0xff] %v5879_v47  ;;  %7524 = vst [vmem:[#allocation44_spill] sm:$0xff] %v5881_v6  ;;  %v4012_v20 = vmax.f32 %v4011_v49, %v3757_v42  ;;  %v2379_v8 = vmax.f32 %v1371_v16, 0.0  ;;  %v5892_v21 = vpop.f32.mrb[7].mxu1  ;;  %v5313_v42 = vld [vmem:[%s5520_s29 + $0x1d8] sm:$0xff]   ;;  %v3760_v47 = vmul.f32 %v5640_v31, %v2380_v14 }
 0x11a   : > { %3192 = vbcast.lane.b32.xlu1 %v5824_v33, 312  ;;  %3188 = vbcast.lane.b32.xlu0 %v5824_v33, 304  ;;  %v4903_v59 = vpop.f32.mrb[8].mxu0  ;;  %v5315_v33 = vld [vmem:[%s5520_s29 + $0x1e0] sm:$0xff]   ;;  %v5907_v9 = vpop.f32.mrb[8].mxu1  ;;  %v5337_v14 = vld [vmem:[%s5520_s29 + $0x3d8] sm:$0xff]  }
 0x11b   : > { %v4013_v10 = vmax.f32 %v4012_v20, %v3758_v60  ;;  %v3759_v17 = vmul.f32 %v5631_v25, %v2379_v8  ;;  %v1383_v1 = vpop.f32.mrb[9].mxu0  ;;  %v1392_v4 = vadd.f32 %v4903_v59, %v5820_v32  ;;  %v3761_v25 = vmul.f32 %v5638_v30, %v2381_v51  ;;  %v5912_v59 = vpop.f32.mrb[9].mxu1  ;;  %v5338_v51 = vld [vmem:[%s5520_s29 + $0x3e0] sm:$0xff]  }
 0x11c   : > { %v1384_v49 = vadd.f32 %v5820_v32, %v1383_v1  ;;  %v5897_v28 = vpop.permute.xlu1 %2947  ;;  %v5899_v16 = vpop.permute.xlu0 %2943 }
 0x11d   : > { %7525 = vst [vmem:[#allocation45_spill] sm:$0xff] %v5897_v28  ;;  %7526 = vst [vmem:[#allocation46_spill] sm:$0xff] %v5899_v16  ;;  %v4014_v6 = vmax.f32 %v4013_v10, %v3759_v17  ;;  %v4904_v60 = vpop.f32.mrb[10].mxu0  ;;  %v2384_v28 = vmax.f32 %v1392_v4, 0.0 }
 0x11e   : > { %v1386_v20 = vpop.f32.mrb[11].mxu0  ;;  %3203 = vbcast.lane.b32.xlu1 %v5890_v26, 264  ;;  %3199 = vbcast.lane.b32.xlu0 %v5890_v26, 256  ;;  %v2382_v1 = vmax.f32 %v1384_v49, 0.0  ;;  %v1395_v2 = vadd.f32 %v4904_v60, %v5820_v32 }
 0x11f   : > { %v4015_v8 = vmax.f32 %v4014_v6, %v3760_v47  ;;  %v1387_v31 = vadd.f32 %v5820_v32, %v1386_v20  ;;  %5010 = vmatmul.mubr.bf16.gmra.mrb[116].mxu0 %v5313_v42  ;;  %v5919_v6 = vpop.f32.mrb[10].mxu1  ;;  %5138 = vmatmul.mubr.bf16.gmra.mrb[116].mxu1 %v5337_v14  ;;  %v3764_v16 = vmul.f32 %v5652_v40, %v2384_v28  ;;  %v5339_v28 = vld [vmem:[%s5520_s29 + $0x3e8] sm:$0xff]  }
 0x120   : > { %v5914_v10 = vpop.permute.xlu1 %2958  ;;  %v5916_v30 = vpop.permute.xlu0 %2954  ;;  %5013 = vmatprep.mubr.bf16.mxu0 %v5315_v33  ;;  %v3762_v60 = vmul.f32 %v5646_v35, %v2382_v1  ;;  %v2385_v20 = vmax.f32 %v1395_v2, 0.0  ;;  %5141 = vmatprep.mubr.bf16.mxu1 %v5338_v51 }
 0x121   : > { %7527 = vst [vmem:[#allocation47_spill] sm:$0xff] %v5914_v10  ;;  %7528 = vst [vmem:[#allocation48_spill] sm:$0xff] %v5916_v30  ;;  %v4016_v17 = vmax.f32 %v4015_v8, %v3761_v25  ;;  %v2383_v47 = vmax.f32 %v1387_v31, 0.0  ;;  %v5923_v49 = vpop.f32.mrb[11].mxu1  ;;  %v5317_v30 = vld [vmem:[%s5520_s29 + $0x1e8] sm:$0xff]   ;;  %v5319_v31 = vld [vmem:[%s5520_s29 + $0x1f0] sm:$0xff]  }
 0x122   : > { %3211 = vbcast.lane.b32.xlu1 %v5890_v26, 280  ;;  %3207 = vbcast.lane.b32.xlu0 %v5890_v26, 272  ;;  %v4907_v42 = vpop.f32.mrb[12].mxu0  ;;  %7529 = vst [vmem:[#allocation49_spill] sm:$0xff] %v5923_v49 }
 0x123   : > { %v3763_v10 = vmul.f32 %v5644_v34, %v2383_v47  ;;  %v1399_v33 = vpop.f32.mrb[13].mxu0  ;;  %v1408_v35 = vadd.f32 %v4907_v42, %v5820_v32  ;;  %v5939_v47 = vpop.f32.mrb[12].mxu1  ;;  %v4017_v42 = vrot.slane %v4016_v17, 4 }
 0x124   : > { %v1400_v4 = vadd.f32 %v5820_v32, %v1399_v33  ;;  %v5929_v25 = vpop.permute.xlu1 %2966  ;;  %v5931_v8 = vpop.permute.xlu0 %2962  ;;  %7532 = vst [vmem:[#allocation52_spill] sm:$0xff] %v5939_v47  ;;  %v3765_v33 = vmul.f32 %v5650_v38, %v2385_v20 }
 0x125   : > { %7530 = vst [vmem:[#allocation50_spill] sm:$0xff] %v5929_v25  ;;  %7531 = vst [vmem:[#allocation51_spill] sm:$0xff] %v5931_v8  ;;  %v4023_v49 = vmax.f32 %v3762_v60, %v3763_v10  ;;  %v4908_v1 = vpop.f32.mrb[14].mxu0  ;;  %v5944_v10 = vpop.f32.mrb[13].mxu1  ;;  %v5340_v25 = vld [vmem:[%s5520_s29 + $0x3f0] sm:$0xff]   ;;  %v2388_v8 = vmax.f32 %v1408_v35, 0.0 }
 0x126   : > { %v2386_v2 = vmax.f32 %v1400_v4, 0.0  ;;  %v1411_v34 = vadd.f32 %v4908_v1, %v5820_v32  ;;  %v1402_v14 = vpop.f32.mrb[15].mxu0  ;;  %3219 = vbcast.lane.b32.xlu1 %v5890_v26, 296  ;;  %3215 = vbcast.lane.b32.xlu0 %v5890_v26, 288 }
 0x127   : > { %v4024_v51 = vmax.f32 %v4023_v49, %v3764_v16  ;;  %v1403_v40 = vadd.f32 %v5820_v32, %v1402_v14  ;;  %5014 = vmatmul.mubr.bf16.gmra.mrb[120].mxu0 %v5317_v30  ;;  %v5952_v16 = vpop.f32.mrb[14].mxu1  ;;  %v5321_v14 = vld [vmem:[%s5520_s29 + $0x1f8] sm:$0xff]   ;;  %5142 = vmatmul.mubr.bf16.gmra.mrb[120].mxu1 %v5339_v28 }
 0x128   : > { %v3766_v60 = vmul.f32 %v5658_v44, %v2386_v2  ;;  %v5947_v4 = vpop.permute.xlu1 %2974  ;;  %v5949_v1 = vpop.permute.xlu0 %2970  ;;  %5017 = vmatprep.mubr.bf16.mxu0 %v5319_v31  ;;  %v2389_v49 = vmax.f32 %v1411_v34, 0.0  ;;  %v5958_v44 = vrot.slane %v5873_v23, %v5527_v12  ;;  %5145 = vmatprep.mubr.bf16.mxu1 %v5340_v25 }
 0x129   : > { %7533 = vst [vmem:[#allocation53_spill] sm:$0xff] %v5947_v4  ;;  %7534 = vst [vmem:[#allocation54_spill] sm:$0xff] %v5949_v1  ;;  %v4025_v47 = vmax.f32 %v4024_v51, %v3765_v33  ;;  %v2387_v38 = vmax.f32 %v1403_v40, 0.0  ;;  %v5960_v20 = vpop.f32.mrb[15].mxu1  ;;  %v4018_v33 = vmax.f32 %v4016_v17, %v4017_v42 }
 0x12a   : > { %3227 = vbcast.lane.b32.xlu1 %v5890_v26, 312  ;;  %3223 = vbcast.lane.b32.xlu0 %v5890_v26, 304  ;;  %v4911_v30 = vpop.f32.mrb[16].mxu0  ;;  %v3768_v26 = vmul.f32 %v5666_v50, %v2388_v8  ;;  %v5974_v17 = vpop.f32.mrb[16].mxu1  ;;  %v5341_v50 = vld [vmem:[%s5520_s29 + $0x3f8] sm:$0xff]  }
 0x12b   : > { %v4026_v2 = vmax.f32 %v4025_v47, %v3766_v60  ;;  %v3767_v31 = vmul.f32 %v5656_v43, %v2387_v38  ;;  %v1415_v35 = vpop.f32.mrb[17].mxu0  ;;  %v1424_v1 = vadd.f32 %v4911_v30, %v5820_v32  ;;  %v3769_v43 = vmul.f32 %v5664_v48, %v2389_v49  ;;  %v5979_v8 = vpop.f32.mrb[17].mxu1 }
 0x12c   : > { %v1416_v34 = vadd.f32 %v5820_v32, %v1415_v35  ;;  %v5965_v51 = vpop.permute.xlu1 %2982  ;;  %v5967_v40 = vpop.permute.xlu0 %2978  ;;  %v4019_v30 = vrot.slane %v4018_v33, 2 }
 0x12d   : > { %7535 = vst [vmem:[#allocation55_spill] sm:$0xff] %v5965_v51  ;;  %7536 = vst [vmem:[#allocation56_spill] sm:$0xff] %v5967_v40  ;;  %v4027_v4 = vmax.f32 %v4026_v2, %v3767_v31  ;;  %v4912_v47 = vpop.f32.mrb[18].mxu0  ;;  %v2392_v31 = vmax.f32 %v1424_v1, 0.0  ;;  %v5985_v51 = vpop.f32.mrb[18].mxu1 }
 0x12e   : > { %v1418_v60 = vpop.f32.mrb[19].mxu0  ;;  %3238 = vbcast.lane.b32.xlu1 %v5958_v44, 264  ;;  %3234 = vbcast.lane.b32.xlu0 %v5958_v44, 256  ;;  %v2390_v42 = vmax.f32 %v1416_v34, 0.0  ;;  %v1427_v38 = vadd.f32 %v4912_v47, %v5820_v32  ;;  %7539 = vst [vmem:[#allocation59_spill] sm:$0xff] %v5985_v51  ;;  %v5989_v34 = vpop.f32.mrb[19].mxu1 }
 0x12f   : > { %v4028_v28 = vmax.f32 %v4027_v4, %v3768_v26  ;;  %v1419_v25 = vadd.f32 %v5820_v32, %v1418_v60  ;;  %5018 = vmatmul.mubr.bf16.gmra.mrb[124].mxu0 %v5321_v14  ;;  %7540 = vst [vmem:[#allocation60_spill] sm:$0xff] %v5989_v34  ;;  %5146 = vmatmul.mubr.bf16.gmra.mrb[124].mxu1 %v5341_v50 }
 0x130   : > { %v5981_v2 = vpop.permute.xlu1 %2993  ;;  %v5983_v48 = vpop.permute.xlu0 %2989  ;;  %v3770_v26 = vmul.f32 %v5672_v54, %v2390_v42  ;;  %v2393_v47 = vmax.f32 %v1427_v38, 0.0  ;;  %v3772_v40 = vmul.f32 %v5678_v58, %v2392_v31 }
 0x131   : > { %7537 = vst [vmem:[#allocation57_spill] sm:$0xff] %v5981_v2  ;;  %7538 = vst [vmem:[#allocation58_spill] sm:$0xff] %v5983_v48  ;;  %v4029_v49 = vmax.f32 %v4028_v28, %v3769_v43  ;;  %v2391_v35 = vmax.f32 %v1419_v25, 0.0  ;;  %v4020_v43 = vmax.f32 %v4018_v33, %v4019_v30 }
 0x132   : > { %3246 = vbcast.lane.b32.xlu1 %v5958_v44, 280  ;;  %3242 = vbcast.lane.b32.xlu0 %v5958_v44, 272  ;;  %v4915_v4 = vpop.f32.mrb[20].mxu0  ;;  %v6003_v33 = vpop.f32.mrb[20].mxu1  ;;  %v3773_v50 = vmul.f32 %v5676_v57, %v2393_v47  ;;  %v6020_v57 = vrot.slane %v5873_v23, %v5540_v18 }
 0x133   : > { %v4030_v14 = vrot.slane %v4029_v49, 4  ;;  %v3771_v60 = vmul.f32 %v5670_v53, %v2391_v35  ;;  %v1431_v2 = vpop.f32.mrb[21].mxu0  ;;  %v1440_v34 = vadd.f32 %v4915_v4, %v5820_v32 }
 0x134   : > { %v1432_v1 = vadd.f32 %v5820_v32, %v1431_v2  ;;  %v5994_v28 = vpop.permute.xlu1 %3001  ;;  %v5996_v25 = vpop.permute.xlu0 %2997 }
 0x135   : > { %7541 = vst [vmem:[#allocation61_spill] sm:$0xff] %v5994_v28  ;;  %7542 = vst [vmem:[#allocation62_spill] sm:$0xff] %v5996_v25  ;;  %v4031_v48 = vmax.f32 %v4029_v49, %v4030_v14  ;;  %v4036_v12 = vmax.f32 %v3770_v26, %v3771_v60  ;;  %v4916_v51 = vpop.f32.mrb[22].mxu0  ;;  %v6007_v2 = vpop.f32.mrb[21].mxu1  ;;  %v4021_v49 = vrot.slane %v4020_v43, 1  ;;  %v2396_v14 = vmax.f32 %v1440_v34, 0.0 }
 0x136   : > { %v2394_v54 = vmax.f32 %v1432_v1, 0.0  ;;  %v1443_v42 = vadd.f32 %v4916_v51, %v5820_v32  ;;  %v1434_v53 = vpop.f32.mrb[23].mxu0  ;;  %3254 = vbcast.lane.b32.xlu1 %v5958_v44, 296  ;;  %3250 = vbcast.lane.b32.xlu0 %v5958_v44, 288  ;;  %v6014_v1 = vpop.f32.mrb[22].mxu1 }
 0x137   : > { %v4032_v38 = vrot.slane %v4031_v48, 2  ;;  %v4037_v30 = vmax.f32 %v4036_v12, %v3772_v40  ;;  %v1435_v58 = vadd.f32 %v5820_v32, %v1434_v53 }
 0x138   : > { %v3774_v31 = vmul.f32 %v5684_v63, %v2394_v54  ;;  %v6010_v35 = vpop.permute.xlu1 %3009  ;;  %v6012_v51 = vpop.permute.xlu0 %3005  ;;  %v2397_v28 = vmax.f32 %v1443_v42, 0.0  ;;  %v4022_v54 = vmax.f32 %v4020_v43, %v4021_v49 }
 0x139   : > { %7543 = vst [vmem:[#allocation63_spill] sm:$0xff] %v6010_v35  ;;  %7544 = vst [vmem:[#allocation64_spill] sm:$0xff] %v6012_v51  ;;  %v4033_v4 = vmax.f32 %v4031_v48, %v4032_v38  ;;  %v4038_v26 = vmax.f32 %v4037_v30, %v3773_v50  ;;  %v2395_v60 = vmax.f32 %v1435_v58, 0.0  ;;  %v6022_v63 = vpop.f32.mrb[23].mxu1  ;;  %v3776_v50 = vmul.f32 %v5692_v7, %v2396_v14 }
 0x13a   : > { %3262 = vbcast.lane.b32.xlu1 %v5958_v44, 312  ;;  %3258 = vbcast.lane.b32.xlu0 %v5958_v44, 304  ;;  %v4919_v12 = vpop.f32.mrb[24].mxu0  ;;  %v6035_v43 = vpop.f32.mrb[24].mxu1 }
 0x13b   : > { %v4034_v40 = vrot.slane %v4033_v4, 1  ;;  %v4039_v47 = vmax.f32 %v4038_v26, %v3774_v31  ;;  %v3775_v48 = vmul.f32 %v5682_v62, %v2395_v60  ;;  %v1447_v34 = vpop.f32.mrb[25].mxu0  ;;  %v1456_v58 = vadd.f32 %v4919_v12, %v5820_v32  ;;  %v6042_v14 = vpop.f32.mrb[25].mxu1 }
 0x13c   : > { %v1448_v53 = vadd.f32 %v5820_v32, %v1447_v34  ;;  %v6026_v42 = vpop.permute.xlu1 %3017  ;;  %v6028_v38 = vpop.permute.xlu0 %3013  ;;  %v3777_v31 = vmul.f32 %v5690_v5, %v2397_v28 }
 0x13d   : > { %7545 = vst [vmem:[#allocation65_spill] sm:$0xff] %v6026_v42  ;;  %7546 = vst [vmem:[#allocation66_spill] sm:$0xff] %v6028_v38  ;;  %v4035_v44 = vmax.f32 %v4033_v4, %v4034_v40  ;;  %v4040_v30 = vmax.f32 %v4039_v47, %v3775_v48  ;;  %v4920_v35 = vpop.f32.mrb[26].mxu0  ;;  %v2400_v40 = vmax.f32 %v1456_v58, 0.0  ;;  %v6048_v48 = vpop.f32.mrb[26].mxu1 }
 0x13e   : > { %v2398_v26 = vmax.f32 %v1448_v53, 0.0  ;;  %v1450_v62 = vpop.f32.mrb[27].mxu0  ;;  %3273 = vbcast.lane.b32.xlu1 %v6020_v57, 264  ;;  %3269 = vbcast.lane.b32.xlu0 %v6020_v57, 256  ;;  %v1459_v60 = vadd.f32 %v4920_v35, %v5820_v32  ;;  %v6052_v34 = vpop.f32.mrb[27].mxu1 }
 0x13f   : > { %v4041_v49 = vmax.f32 %v4040_v30, %v3776_v50  ;;  %v1451_v4 = vadd.f32 %v5820_v32, %v1450_v62  ;;  %v6040_v7 = vsel %vm4458_vm0, %v4035_v44, %v4022_v54 }
 0x140   : > { %v6044_v12 = vpop.permute.xlu1 %3028  ;;  %v6046_v5 = vpop.permute.xlu0 %3024  ;;  %v3778_v53 = vmul.f32 %v5698_v13, %v2398_v26  ;;  %v2401_v44 = vmax.f32 %v1459_v60, 0.0 }
 0x141   : > { %7547 = vst [vmem:[#allocation67_spill] sm:$0xff] %v6044_v12  ;;  %7548 = vst [vmem:[#allocation68_spill] sm:$0xff] %v6046_v5  ;;  %v4042_v28 = vmax.f32 %v4041_v49, %v3777_v31  ;;  %v2399_v47 = vmax.f32 %v1451_v4, 0.0  ;;  %v3780_v4 = vmul.f32 %v5704_v19, %v2400_v40 }
 0x142   : > { %3281 = vbcast.lane.b32.xlu1 %v6020_v57, 280  ;;  %3277 = vbcast.lane.b32.xlu0 %v6020_v57, 272  ;;  %v4923_v35 = vpop.f32.mrb[28].mxu0 }
 0x143   : > { %v4043_v54 = vrot.slane %v4042_v28, 4  ;;  %v3779_v50 = vmul.f32 %v5696_v11, %v2399_v47  ;;  %v1463_v30 = vpop.f32.mrb[29].mxu0  ;;  %v1472_v5 = vadd.f32 %v4923_v35, %v5820_v32  ;;  %v6066_v11 = vpop.f32.mrb[28].mxu1  ;;  %v3781_v47 = vmul.f32 %v5702_v15, %v2401_v44 }
 0x144   : > { %v1464_v31 = vadd.f32 %v5820_v32, %v1463_v30  ;;  %v6057_v58 = vpop.permute.xlu1 %3036  ;;  %v6059_v62 = vpop.permute.xlu0 %3032 }
 0x145   : > { %7549 = vst [vmem:[#allocation69_spill] sm:$0xff] %v6057_v58  ;;  %7550 = vst [vmem:[#allocation70_spill] sm:$0xff] %v6059_v62  ;;  %v4044_v49 = vmax.f32 %v4042_v28, %v4043_v54  ;;  %v4049_v12 = vmax.f32 %v3778_v53, %v3779_v50  ;;  %v4924_v42 = vpop.f32.mrb[30].mxu0  ;;  %v6070_v40 = vpop.f32.mrb[29].mxu1  ;;  %v2404_v50 = vmax.f32 %v1472_v5, 0.0 }
 0x146   : > { %v2402_v38 = vmax.f32 %v1464_v31, 0.0  ;;  %v1475_v13 = vadd.f32 %v4924_v42, %v5820_v32  ;;  %v1466_v26 = vpop.f32.mrb[31].mxu0  ;;  %3289 = vbcast.lane.b32.xlu1 %v6020_v57, 296  ;;  %3285 = vbcast.lane.b32.xlu0 %v6020_v57, 288  ;;  %v6077_v58 = vpop.f32.mrb[30].mxu1 }
 0x147   : > { %v4045_v60 = vrot.slane %v4044_v49, 2  ;;  %v4050_v28 = vmax.f32 %v4049_v12, %v3780_v4  ;;  %v1467_v19 = vadd.f32 %v5820_v32, %v1466_v26  ;;  %v6083_v12 = vrot.slane %v5873_v23, %v5554_v29 }
 0x148   : > { %v3782_v35 = vmul.f32 %v5710_v27, %v2402_v38  ;;  %v6073_v54 = vpop.permute.xlu1 %3044  ;;  %v6075_v42 = vpop.permute.xlu0 %3040  ;;  %v2405_v62 = vmax.f32 %v1475_v13, 0.0 }
 0x149   : > { %7551 = vst [vmem:[#allocation71_spill] sm:$0xff] %v6073_v54  ;;  %7552 = vst [vmem:[#allocation72_spill] sm:$0xff] %v6075_v42  ;;  %v4046_v53 = vmax.f32 %v4044_v49, %v4045_v60  ;;  %v4051_v30 = vmax.f32 %v4050_v28, %v3781_v47  ;;  %v2403_v31 = vmax.f32 %v1467_v19, 0.0  ;;  %v6085_v27 = vpop.f32.mrb[31].mxu1  ;;  %v3784_v60 = vmul.f32 %v5718_v37, %v2404_v50 }
 0x14a   : > { %3297 = vbcast.lane.b32.xlu1 %v6020_v57, 312  ;;  %3293 = vbcast.lane.b32.xlu0 %v6020_v57, 304  ;;  %v4927_v15 = vpop.f32.mrb[32].mxu0  ;;  %v3785_v54 = vmul.f32 %v5716_v36, %v2405_v62 }
 0x14b   : > { %v4047_v38 = vrot.slane %v4046_v53, 1  ;;  %v4052_v44 = vmax.f32 %v4051_v30, %v3782_v35  ;;  %v3783_v5 = vmul.f32 %v5708_v24, %v2403_v31  ;;  %v1479_v49 = vpop.f32.mrb[33].mxu0  ;;  %v1488_v28 = vadd.f32 %v4927_v15, %v5820_v32  ;;  %v6098_v24 = vpop.f32.mrb[32].mxu1 }
 0x14c   : > { %v1480_v4 = vadd.f32 %v5820_v32, %v1479_v49  ;;  %v6089_v26 = vpop.permute.xlu1 %3052  ;;  %v6091_v13 = vpop.permute.xlu0 %3048 }
 0x14d   : > { %7553 = vst [vmem:[#allocation73_spill] sm:$0xff] %v6089_v26  ;;  %7554 = vst [vmem:[#allocation74_spill] sm:$0xff] %v6091_v13  ;;  %v4048_v57 = vmax.f32 %v4046_v53, %v4047_v38  ;;  %v4053_v47 = vmax.f32 %v4052_v44, %v3783_v5  ;;  %v4928_v19 = vpop.f32.mrb[34].mxu0  ;;  %v6106_v50 = vpop.f32.mrb[33].mxu1  ;;  %v2408_v38 = vmax.f32 %v1488_v28, 0.0 }
 0x14e   : > { %v2406_v35 = vmax.f32 %v1480_v4, 0.0  ;;  %v1482_v30 = vpop.f32.mrb[35].mxu0  ;;  %3308 = vbcast.lane.b32.xlu1 %v6083_v12, 264  ;;  %3304 = vbcast.lane.b32.xlu0 %v6083_v12, 256  ;;  %v1491_v49 = vadd.f32 %v4928_v19, %v5820_v32  ;;  %v6112_v5 = vpop.f32.mrb[34].mxu1 }
 0x14f   : > { %v4054_v31 = vmax.f32 %v4053_v47, %v3784_v60  ;;  %v1483_v53 = vadd.f32 %v5820_v32, %v1482_v30  ;;  %v6104_v37 = vsel %vm4460_vm1, %v4048_v57, %v6040_v7  ;;  %v6116_v60 = vpop.f32.mrb[35].mxu1 }
 0x150   : > { %v6108_v36 = vpop.permute.xlu1 %3063  ;;  %v6110_v62 = vpop.permute.xlu0 %3059  ;;  %v3786_v57 = vmul.f32 %v5724_v46, %v2406_v35  ;;  %v2409_v47 = vmax.f32 %v1491_v49, 0.0 }
 0x151   : > { %7555 = vst [vmem:[#allocation75_spill] sm:$0xff] %v6108_v36  ;;  %7556 = vst [vmem:[#allocation76_spill] sm:$0xff] %v6110_v62  ;;  %v4055_v15 = vmax.f32 %v4054_v31, %v3785_v54  ;;  %v2407_v44 = vmax.f32 %v1483_v53, 0.0  ;;  %v3788_v36 = vmul.f32 %v5730_v55, %v2408_v38 }
 0x152   : > { %3316 = vbcast.lane.b32.xlu1 %v6083_v12, 280  ;;  %3312 = vbcast.lane.b32.xlu0 %v6083_v12, 272  ;;  %v4931_v4 = vpop.f32.mrb[36].mxu0 }
 0x153   : > { %v4056_v7 = vrot.slane %v4055_v15, 4  ;;  %v3787_v19 = vmul.f32 %v5722_v45, %v2407_v44  ;;  %v1495_v30 = vpop.f32.mrb[37].mxu0  ;;  %v1504_v26 = vadd.f32 %v4931_v4, %v5820_v32  ;;  %v6130_v45 = vpop.f32.mrb[36].mxu1  ;;  %v3789_v44 = vmul.f32 %v5728_v52, %v2409_v47 }
 0x154   : > { %v1496_v54 = vadd.f32 %v5820_v32, %v1495_v30  ;;  %v6121_v28 = vpop.permute.xlu1 %3071  ;;  %v6123_v31 = vpop.permute.xlu0 %3067 }
 0x155   : > { %7557 = vst [vmem:[#allocation77_spill] sm:$0xff] %v6121_v28  ;;  %7558 = vst [vmem:[#allocation78_spill] sm:$0xff] %v6123_v31  ;;  %v4057_v53 = vmax.f32 %v4055_v15, %v4056_v7  ;;  %v4062_v62 = vmax.f32 %v3786_v57, %v3787_v19  ;;  %v4932_v13 = vpop.f32.mrb[38].mxu0  ;;  %v6134_v38 = vpop.f32.mrb[37].mxu1  ;;  %v2412_v19 = vmax.f32 %v1504_v26, 0.0 }
 0x156   : > { %v2410_v42 = vmax.f32 %v1496_v54, 0.0  ;;  %v1507_v46 = vadd.f32 %v4932_v13, %v5820_v32  ;;  %v1498_v35 = vpop.f32.mrb[39].mxu0  ;;  %3324 = vbcast.lane.b32.xlu1 %v6083_v12, 296  ;;  %3320 = vbcast.lane.b32.xlu0 %v6083_v12, 288  ;;  %v6141_v28 = vpop.f32.mrb[38].mxu1 }
 0x157   : > { %v4058_v49 = vrot.slane %v4057_v53, 2  ;;  %v4063_v15 = vmax.f32 %v4062_v62, %v3788_v36  ;;  %v1499_v55 = vadd.f32 %v5820_v32, %v1498_v35  ;;  %v6147_v36 = vrot.slane %v5873_v23, %v5567_v39 }
 0x158   : > { %v3790_v4 = vmul.f32 %v5736_v0, %v2410_v42  ;;  %v6137_v7 = vpop.permute.xlu1 %3079  ;;  %v6139_v13 = vpop.permute.xlu0 %3075  ;;  %v2413_v31 = vmax.f32 %v1507_v46, 0.0 }
 0x159   : > { %7559 = vst [vmem:[#allocation79_spill] sm:$0xff] %v6137_v7  ;;  %7560 = vst [vmem:[#allocation80_spill] sm:$0xff] %v6139_v13  ;;  %v4059_v57 = vmax.f32 %v4057_v53, %v4058_v49  ;;  %v4064_v30 = vmax.f32 %v4063_v15, %v3789_v44  ;;  %v2411_v54 = vmax.f32 %v1499_v55, 0.0  ;;  %v6149_v0 = vpop.f32.mrb[39].mxu1  ;;  %v6154_v53 = vadd.f32 %v5836_v22, %v5820_v32  ;;  %v7563_v49 = vld [vmem:[#allocation36_spill] sm:$0xff]  ;;  %v7564_v15 = vld [vmem:[#allocation39_spill] sm:$0xff] }
 0x15a   : > { %3332 = vbcast.lane.b32.xlu1 %v6083_v12, 312  ;;  %3328 = vbcast.lane.b32.xlu0 %v6083_v12, 304  ;;  %v4935_v52 = vpop.f32.mrb[40].mxu0  ;;  %v6163_v44 = vadd.f32 %v5820_v32, %v7563_v49  ;;  %v6167_v55 = vadd.f32 %v7564_v15, %v5820_v32  ;;  %v6180_v15 = vadd.f32 %v5868_v3, %v5820_v32 }
 0x15b   : > { %v4060_v42 = vrot.slane %v4059_v57, 1  ;;  %v4065_v62 = vmax.f32 %v4064_v30, %v3790_v4  ;;  %v3791_v26 = vmul.f32 %v5734_v61, %v2411_v54  ;;  %v1511_v47 = vpop.f32.mrb[41].mxu0  ;;  %v7566_v61 = vld [vmem:[#allocation40_spill] sm:$0xff]  ;;  %v7567_v30 = vld [vmem:[#allocation11_spill] sm:$0xff] }
 0x15c   : > { %v1512_v46 = vadd.f32 %v5820_v32, %v1511_v47  ;;  %v6157_v12 = vpop.permute.xlu1 %3087  ;;  %v6159_v35 = vpop.permute.xlu0 %3083  ;;  %7565 = vst [vmem:[#allocation36_spill] sm:$0xff] %v6167_v55  ;;  %v6171_v4 = vadd.f32 %v5820_v32, %v7566_v61  ;;  %v3792_v54 = vmul.f32 %v7567_v30, %v2412_v19  ;;  %7569 = vst [vmem:[#allocation39_spill] sm:$0xff] %v6180_v15 }
 0x15d   : > { %7561 = vst [vmem:[#allocation81_spill] sm:$0xff] %v6157_v12  ;;  %7562 = vst [vmem:[#allocation82_spill] sm:$0xff] %v6159_v35  ;;  %v4061_v22 = vmax.f32 %v4059_v57, %v4060_v42  ;;  %v4066_v47 = vmax.f32 %v4065_v62, %v3791_v26  ;;  %v1520_v12 = vadd.f32 %v4935_v52, %v5820_v32  ;;  %v4936_v7 = vpop.f32.mrb[42].mxu0  ;;  %v7568_v35 = vld [vmem:[#allocation10_spill] sm:$0xff]  ;;  %v6186_v19 = vpop.f32.mrb[40].mxu1 }
 0x15e   : > { %v3793_v13 = vmul.f32 %v7568_v35, %v2413_v31  ;;  %v2414_v51 = vmax.f32 %v1512_v46, 0.0  ;;  %v1514_v49 = vpop.f32.mrb[43].mxu0  ;;  %3343 = vbcast.lane.b32.xlu1 %v6147_v36, 264  ;;  %3339 = vbcast.lane.b32.xlu0 %v6147_v36, 256  ;;  %v6184_v57 = vadd.f32 %v5820_v32, %v5876_v41  ;;  %v1523_v42 = vadd.f32 %v4936_v7, %v5820_v32  ;;  %v6194_v26 = vpop.f32.mrb[41].mxu1 }
 0x15f   : > { %v4067_v52 = vmax.f32 %v4066_v47, %v3792_v54  ;;  %v1515_v31 = vadd.f32 %v5820_v32, %v1514_v49  ;;  %v6192_v62 = vsel %vm4462_vm2, %v4061_v22, %v6104_v37  ;;  %v2416_v7 = vmax.f32 %v1520_v12, 0.0  ;;  %v6204_v49 = vpop.f32.mrb[42].mxu1  ;;  %v7577_v47 = vld [vmem:[#allocation12_spill] sm:$0xff] }
 0x160   : > { %7570 = vst [vmem:[#allocation40_spill] sm:$0xff] %v6184_v57  ;;  %v6196_v46 = vpop.permute.xlu1 %3098  ;;  %v6198_v3 = vpop.permute.xlu0 %3094  ;;  %7573 = vst [vmem:[#allocation83_spill] sm:$0xff] %v6204_v49  ;;  %v6212_v35 = vadd.f32 %v5884_v56, %v5820_v32  ;;  %v2417_v61 = vmax.f32 %v1523_v42, 0.0  ;;  %v6225_v41 = vadd.f32 %v5820_v32, %v5892_v21  ;;  %v6229_v56 = vadd.f32 %v5907_v9, %v5820_v32  ;;  %v7590_v9 = vld [vmem:[#allocation49_spill] sm:$0xff] }
 0x161   : > { %7571 = vst [vmem:[#allocation11_spill] sm:$0xff] %v6196_v46  ;;  %7572 = vst [vmem:[#allocation10_spill] sm:$0xff] %v6198_v3  ;;  %v4068_v30 = vmax.f32 %v4067_v52, %v3793_v13  ;;  %v2415_v54 = vmax.f32 %v1515_v31, 0.0  ;;  %v6214_v13 = vpop.f32.mrb[43].mxu1  ;;  %v7576_v52 = vld [vmem:[#allocation13_spill] sm:$0xff] }
 0x162   : > { %3351 = vbcast.lane.b32.xlu1 %v6147_v36, 280  ;;  %3347 = vbcast.lane.b32.xlu0 %v6147_v36, 272  ;;  %v4939_v37 = vpop.f32.mrb[44].mxu0  ;;  %7574 = vst [vmem:[#allocation84_spill] sm:$0xff] %v6212_v35  ;;  %7575 = vst [vmem:[#allocation85_spill] sm:$0xff] %v6214_v13  ;;  %v3794_v31 = vmul.f32 %v7576_v52, %v2414_v51  ;;  %v6233_v51 = vadd.f32 %v5820_v32, %v5912_v59 }
 0x163   : > { %v4069_v12 = vrot.slane %v4068_v30, 4  ;;  %v3795_v46 = vmul.f32 %v7577_v47, %v2415_v54  ;;  %v1527_v3 = vpop.f32.mrb[45].mxu0  ;;  %7580 = vst [vmem:[#allocation86_spill] sm:$0xff] %v6229_v56  ;;  %v7582_v54 = vld [vmem:[#allocation15_spill] sm:$0xff]  ;;  %v1536_v52 = vadd.f32 %v4939_v37, %v5820_v32  ;;  %v6243_v59 = vadd.f32 %v5919_v6, %v5820_v32 }
 0x164   : > { %v1528_v25 = vadd.f32 %v5820_v32, %v1527_v3  ;;  %v6219_v55 = vpop.permute.xlu1 %3106  ;;  %v6221_v22 = vpop.permute.xlu0 %3102  ;;  %7581 = vst [vmem:[#allocation87_spill] sm:$0xff] %v6233_v51  ;;  %v3796_v3 = vmul.f32 %v7582_v54, %v2416_v7  ;;  %v7585_v7 = vld [vmem:[#allocation14_spill] sm:$0xff] }
 0x165   : > { %7578 = vst [vmem:[#allocation13_spill] sm:$0xff] %v6219_v55  ;;  %7579 = vst [vmem:[#allocation12_spill] sm:$0xff] %v6221_v22  ;;  %v4070_v42 = vmax.f32 %v4068_v30, %v4069_v12  ;;  %v4075_v47 = vmax.f32 %v3794_v31, %v3795_v46  ;;  %v4940_v55 = vpop.f32.mrb[46].mxu0  ;;  %v6245_v30 = vpop.f32.mrb[44].mxu1  ;;  %v3797_v37 = vmul.f32 %v7585_v7, %v2417_v61  ;;  %v7586_v31 = vld [vmem:[#allocation17_spill] sm:$0xff]  ;;  %v2420_v49 = vmax.f32 %v1536_v52, 0.0 }
 0x166   : > { %v2418_v22 = vmax.f32 %v1528_v25, 0.0  ;;  %v1539_v21 = vadd.f32 %v4940_v55, %v5820_v32  ;;  %v1530_v15 = vpop.f32.mrb[47].mxu0  ;;  %3359 = vbcast.lane.b32.xlu1 %v6147_v36, 296  ;;  %3355 = vbcast.lane.b32.xlu0 %v6147_v36, 288  ;;  %7583 = vst [vmem:[#allocation15_spill] sm:$0xff] %v6243_v59  ;;  %7584 = vst [vmem:[#allocation88_spill] sm:$0xff] %v6245_v30 }
 0x167   : > { %v4071_v46 = vrot.slane %v4070_v42, 2  ;;  %v4076_v12 = vmax.f32 %v4075_v47, %v3796_v3  ;;  %v1531_v25 = vadd.f32 %v5820_v32, %v1530_v15  ;;  %v6249_v55 = vpop.f32.mrb[45].mxu1  ;;  %v7589_v7 = vld [vmem:[#allocation7_spill] sm:$0xff] }
 0x168   : > { %v3798_v54 = vmul.f32 %v7586_v31, %v2418_v22  ;;  %v6252_v57 = vpop.permute.xlu1 %3114  ;;  %v6254_v13 = vpop.permute.xlu0 %3110  ;;  %v2421_v15 = vmax.f32 %v1539_v21, 0.0  ;;  %v6265_v31 = vrot.slane %v5873_v23, %v7589_v7  ;;  %v7593_v21 = vld [vmem:[#allocation16_spill] sm:$0xff] }
 0x169   : > { %7587 = vst [vmem:[#allocation14_spill] sm:$0xff] %v6252_v57  ;;  %7588 = vst [vmem:[#allocation17_spill] sm:$0xff] %v6254_v13  ;;  %v4072_v30 = vmax.f32 %v4070_v42, %v4071_v46  ;;  %v4077_v61 = vmax.f32 %v4076_v12, %v3797_v37  ;;  %v2419_v3 = vmax.f32 %v1531_v25, 0.0  ;;  %v6259_v47 = vpop.f32.mrb[46].mxu1  ;;  %v6270_v42 = vadd.f32 %v5820_v32, %v7590_v9 }
 0x16a   : > { %3367 = vbcast.lane.b32.xlu1 %v6147_v36, 312  ;;  %3363 = vbcast.lane.b32.xlu0 %v6147_v36, 304  ;;  %v4943_v22 = vpop.f32.mrb[48].mxu0  ;;  %v6272_v52 = vpop.f32.mrb[47].mxu1  ;;  %v7594_v36 = vld [vmem:[#allocation52_spill] sm:$0xff]  ;;  %v6286_v9 = vadd.f32 %v5820_v32, %v5944_v10 }
 0x16b   : > { %7591 = vst [vmem:[#allocation7_spill] sm:$0xff] %v6270_v42  ;;  %7592 = vst [vmem:[#allocation49_spill] sm:$0xff] %v6272_v52  ;;  %v4073_v46 = vrot.slane %v4072_v30, 1  ;;  %v4078_v37 = vmax.f32 %v4077_v61, %v3798_v54  ;;  %v3799_v12 = vmul.f32 %v7593_v21, %v2419_v3  ;;  %v1543_v25 = vpop.f32.mrb[49].mxu0  ;;  %v6277_v35 = vadd.f32 %v7594_v36, %v5820_v32  ;;  %v7601_v21 = vld [vmem:[#allocation19_spill] sm:$0xff] }
 0x16c   : > { %v1544_v57 = vadd.f32 %v5820_v32, %v1543_v25  ;;  %v6280_v13 = vpop.permute.xlu1 %3122  ;;  %v6282_v6 = vpop.permute.xlu0 %3118  ;;  %7598 = vst [vmem:[#allocation90_spill] sm:$0xff] %v6286_v9  ;;  %v6290_v54 = vadd.f32 %v5952_v16, %v5820_v32  ;;  %v6294_v61 = vadd.f32 %v5820_v32, %v5960_v20  ;;  %v3800_v36 = vmul.f32 %v7601_v21, %v2420_v49 }
 0x16d   : > { %7595 = vst [vmem:[#allocation16_spill] sm:$0xff] %v6277_v35  ;;  %7596 = vst [vmem:[#allocation52_spill] sm:$0xff] %v6280_v13  ;;  %v4074_v3 = vmax.f32 %v4072_v30, %v4073_v46  ;;  %v4079_v25 = vmax.f32 %v4078_v37, %v3799_v12  ;;  %v1552_v13 = vadd.f32 %v4943_v22, %v5820_v32  ;;  %v4944_v59 = vpop.f32.mrb[50].mxu0  ;;  %v6309_v49 = vpop.f32.mrb[48].mxu1  ;;  %v7611_v37 = vld [vmem:[#allocation9_spill] sm:$0xff] }
 0x16e   : > { %7597 = vst [vmem:[#allocation89_spill] sm:$0xff] %v6282_v6  ;;  %7599 = vst [vmem:[#allocation91_spill] sm:$0xff] %v6290_v54  ;;  %v7602_v6 = vld [vmem:[#allocation18_spill] sm:$0xff]  ;;  %v2422_v51 = vmax.f32 %v1544_v57, 0.0  ;;  %v1546_v10 = vpop.f32.mrb[51].mxu0  ;;  %3378 = vbcast.lane.b32.xlu1 %v6265_v31, 264  ;;  %v6303_v16 = vadd.f32 %v5974_v17, %v5820_v32  ;;  %v6307_v20 = vadd.f32 %v5820_v32, %v5979_v8 }
 0x16f   : > { %7600 = vst [vmem:[#allocation92_spill] sm:$0xff] %v6294_v61  ;;  %v3801_v56 = vmul.f32 %v7602_v6, %v2421_v15  ;;  %3374 = vbcast.lane.b32.xlu0 %v6265_v31, 256  ;;  %7605 = vst [vmem:[#allocation93_spill] sm:$0xff] %v6309_v49  ;;  %v4080_v30 = vmax.f32 %v4079_v25, %v3800_v36  ;;  %v1555_v22 = vadd.f32 %v4944_v59, %v5820_v32  ;;  %v6317_v15 = vpop.f32.mrb[49].mxu1  ;;  %v7613_v59 = vld [vmem:[#allocation21_spill] sm:$0xff] }
 0x170   : > { %7603 = vst [vmem:[#allocation19_spill] sm:$0xff] %v6303_v16  ;;  %7604 = vst [vmem:[#allocation18_spill] sm:$0xff] %v6307_v20  ;;  %v1547_v57 = vadd.f32 %v5820_v32, %v1546_v10  ;;  %v6315_v6 = vsel %vm4464_vm3, %v4074_v3, %v6192_v62  ;;  %v6319_v46 = vpop.permute.xlu1 %3133  ;;  %v6321_v17 = vpop.permute.xlu0 %3129  ;;  %v2424_v32 = vmax.f32 %v1552_v13, 0.0  ;;  %v7610_v10 = vld [vmem:[#allocation8_spill] sm:$0xff]  ;;  %v6338_v12 = vrot.slane %v5873_v23, %v7611_v37  ;;  %v6349_v61 = vld [vmem:[%s7446_s3] ss:$0 sm:$0xff] }
 0x171   : > { %7606 = vst [vmem:[#allocation94_spill] sm:$0xff] %v6317_v15  ;;  %7607 = vst [vmem:[#allocation95_spill] sm:$0xff] %v6319_v46  ;;  %v4081_v21 = vmax.f32 %v4080_v30, %v3801_v56  ;;  %v6328_v3 = vpop.f32.mrb[50].mxu1  ;;  %v6334_v8 = vrot.slane %v5873_v23, %v7610_v10  ;;  %v3802_v62 = vmul.f32 %v7613_v59, %v2422_v51  ;;  %v2425_v46 = vmax.f32 %v1555_v22, 0.0  ;;  %v7617_v56 = vld [vmem:[#allocation59_spill] sm:$0xff]  ;;  %v7618_v51 = vld [vmem:[#allocation60_spill] sm:$0xff] }
 0x172   : > { %7608 = vst [vmem:[#allocation96_spill] sm:$0xff] %v6321_v17  ;;  %v2423_v36 = vmax.f32 %v1547_v57, 0.0  ;;  %7609 = vst [vmem:[#allocation97_spill] sm:$0xff] %v6328_v3  ;;  %3386 = vbcast.lane.b32.xlu1 %v6265_v31, 280  ;;  %v4947_v25 = vpop.f32.mrb[52].mxu0  ;;  %v6342_v30 = vpop.f32.mrb[51].mxu1  ;;  %v6358_v16 = vadd.f32 %v6349_v61, %v7617_v56  ;;  %v6362_v22 = vadd.f32 %v6349_v61, %v7618_v51 }
 0x173   : > { %3382 = vbcast.lane.b32.xlu0 %v6265_v31, 272  ;;  %7612 = vst [vmem:[#allocation8_spill] sm:$0xff] %v6342_v30  ;;  %v4082_v57 = vrot.slane %v4081_v21, 4  ;;  %v7614_v17 = vld [vmem:[#allocation20_spill] sm:$0xff]  ;;  %v1559_v35 = vpop.f32.mrb[53].mxu0 }
 0x174   : > { %v3803_v54 = vmul.f32 %v7614_v17, %v2423_v36  ;;  %v1560_v23 = vadd.f32 %v6349_v61, %v1559_v35  ;;  %v6352_v3 = vpop.permute.xlu1 %3141  ;;  %v6354_v13 = vpop.permute.xlu0 %3137  ;;  %v6366_v17 = vadd.f32 %v6349_v61, %v6003_v33  ;;  %v7619_v36 = vld [vmem:[#allocation23_spill] sm:$0xff]  ;;  %v6375_v33 = vadd.f32 %v6349_v61, %v6007_v2 }
 0x175   : > { %7615 = vst [vmem:[#allocation9_spill] sm:$0xff] %v6352_v3  ;;  %7616 = vst [vmem:[#allocation21_spill] sm:$0xff] %v6354_v13  ;;  %v4083_v59 = vmax.f32 %v4081_v21, %v4082_v57  ;;  %v3804_v35 = vmul.f32 %v7619_v36, %v2424_v32  ;;  %v1568_v13 = vadd.f32 %v6349_v61, %v4947_v25  ;;  %v4948_v20 = vpop.f32.mrb[54].mxu0  ;;  %v7622_v36 = vld [vmem:[#allocation25_spill] sm:$0xff] }
 0x176   : > { %v4088_v3 = vmax.f32 %v3802_v62, %v3803_v54  ;;  %v2426_v30 = vmax.f32 %v1560_v23, 0.0  ;;  %v1571_v56 = vadd.f32 %v6349_v61, %v4948_v20  ;;  %v1562_v9 = vpop.f32.mrb[55].mxu0  ;;  %3394 = vbcast.lane.b32.xlu1 %v6265_v31, 296  ;;  %v6379_v21 = vadd.f32 %v6349_v61, %v6014_v1  ;;  %v6381_v54 = vpop.f32.mrb[52].mxu1  ;;  %v7621_v62 = vld [vmem:[#allocation22_spill] sm:$0xff]  ;;  %v6386_v23 = vld [vmem:[%s5503_s11 + $0x18] sm:$0xff] }
 0x177   : > { %3390 = vbcast.lane.b32.xlu0 %v6265_v31, 288  ;;  %7620 = vst [vmem:[#allocation20_spill] sm:$0xff] %v6381_v54  ;;  %v4084_v32 = vrot.slane %v4083_v59, 2  ;;  %v3805_v25 = vmul.f32 %v7621_v62, %v2425_v46  ;;  %v1563_v20 = vadd.f32 %v6349_v61, %v1562_v9  ;;  %v6388_v51 = vpop.f32.mrb[53].mxu1  ;;  %v7627_v1 = vld [vmem:[#allocation6_spill] sm:$0xff] }
 0x178   : > { %v4089_v57 = vmax.f32 %v4088_v3, %v3804_v35  ;;  %v3806_v15 = vmul.f32 %v7622_v36, %v2426_v30  ;;  %v6391_v2 = vpop.permute.xlu1 %3149  ;;  %v6393_v49 = vpop.permute.xlu0 %3145  ;;  %v2428_v3 = vmax.f32 %v1568_v13, 0.0  ;;  %v2429_v52 = vmax.f32 %v1571_v56, 0.0  ;;  %v7626_v36 = vld [vmem:[#allocation5_spill] sm:$0xff]  ;;  %v7629_v56 = vld [vmem:[#allocation24_spill] sm:$0xff] }
 0x179   : > { %7623 = vst [vmem:[#allocation59_spill] sm:$0xff] %v6391_v2  ;;  %7624 = vst [vmem:[#allocation60_spill] sm:$0xff] %v6393_v49  ;;  %v4085_v46 = vmax.f32 %v4083_v59, %v4084_v32  ;;  %v2427_v9 = vmax.f32 %v1563_v20, 0.0  ;;  %v6398_v62 = vpop.f32.mrb[54].mxu1  ;;  %v6404_v2 = vrot.slane %v6386_v23, %v7626_v36  ;;  %v6408_v54 = vrot.slane %v6386_v23, %v7627_v1 }
 0x17a   : > { %v4090_v35 = vmax.f32 %v4089_v57, %v3805_v25  ;;  %7625 = vst [vmem:[#allocation23_spill] sm:$0xff] %v6398_v62  ;;  %3402 = vbcast.lane.b32.xlu1 %v6265_v31, 312  ;;  %v4951_v30 = vpop.f32.mrb[56].mxu0  ;;  %v6411_v59 = vpop.f32.mrb[55].mxu1  ;;  %v6422_v1 = vadd.f32 %v6349_v61, %v6022_v63  ;;  %v6426_v13 = vadd.f32 %v6349_v61, %v6035_v43 }
 0x17b   : > { %3398 = vbcast.lane.b32.xlu0 %v6265_v31, 304  ;;  %7628 = vst [vmem:[#allocation22_spill] sm:$0xff] %v6411_v59  ;;  %v4086_v32 = vrot.slane %v4085_v46, 1  ;;  %v3807_v57 = vmul.f32 %v7629_v56, %v2427_v9  ;;  %v1575_v20 = vpop.f32.mrb[57].mxu0  ;;  %v7632_v9 = vld [vmem:[#allocation27_spill] sm:$0xff]  ;;  %v1584_v31 = vadd.f32 %v6349_v61, %v4951_v30  ;;  %v6439_v43 = vadd.f32 %v6349_v61, %v6048_v48 }
 0x17c   : > { %v4091_v25 = vmax.f32 %v4090_v35, %v3806_v15  ;;  %v1576_v42 = vadd.f32 %v6349_v61, %v1575_v20  ;;  %v6416_v49 = vpop.permute.xlu1 %3157  ;;  %v6418_v36 = vpop.permute.xlu0 %3153  ;;  %v6430_v15 = vadd.f32 %v6349_v61, %v6042_v14  ;;  %v3808_v56 = vmul.f32 %v7632_v9, %v2428_v3 }
 0x17d   : > { %7630 = vst [vmem:[#allocation25_spill] sm:$0xff] %v6416_v49  ;;  %7631 = vst [vmem:[#allocation5_spill] sm:$0xff] %v6418_v36  ;;  %v4087_v35 = vmax.f32 %v4085_v46, %v4086_v32  ;;  %v4952_v49 = vpop.f32.mrb[58].mxu0  ;;  %v7633_v36 = vld [vmem:[#allocation26_spill] sm:$0xff]  ;;  %v6443_v14 = vadd.f32 %v6349_v61, %v6052_v34  ;;  %v6445_v46 = vpop.f32.mrb[56].mxu1 }
 0x17e   : > { %v4092_v20 = vmax.f32 %v4091_v25, %v3807_v57  ;;  %v3809_v59 = vmul.f32 %v7633_v36, %v2429_v52  ;;  %v2430_v62 = vmax.f32 %v1576_v42, 0.0  ;;  %v1578_v63 = vpop.f32.mrb[59].mxu0  ;;  %3413 = vbcast.lane.b32.xlu1 %v6334_v8, 264  ;;  %7634 = vst [vmem:[#allocation6_spill] sm:$0xff] %v6445_v46  ;;  %v1587_v30 = vadd.f32 %v6349_v61, %v4952_v49  ;;  %v6453_v32 = vpop.f32.mrb[57].mxu1 }
 0x17f   : > { %3409 = vbcast.lane.b32.xlu0 %v6334_v8, 256  ;;  %v1579_v42 = vadd.f32 %v6349_v61, %v1578_v63  ;;  %v6451_v52 = vsel %vm4466_vm4, %v4087_v35, %v6315_v6  ;;  %7635 = vst [vmem:[#allocation24_spill] sm:$0xff] %v6453_v32  ;;  %v6463_v36 = vadd.f32 %v6349_v61, %v6066_v11  ;;  %v2432_v35 = vmax.f32 %v1584_v31, 0.0 }
 0x180   : > { %v4093_v3 = vmax.f32 %v4092_v20, %v3808_v56  ;;  %v6455_v25 = vpop.permute.xlu1 %3168  ;;  %v6457_v48 = vpop.permute.xlu0 %3164  ;;  %v6467_v49 = vadd.f32 %v6349_v61, %v6070_v40  ;;  %v6478_v40 = vrot.slane %v6386_v23, %v5540_v18  ;;  %v2433_v34 = vmax.f32 %v1587_v30, 0.0 }
 0x181   : > { %7636 = vst [vmem:[#allocation27_spill] sm:$0xff] %v6455_v25  ;;  %7637 = vst [vmem:[#allocation26_spill] sm:$0xff] %v6457_v48  ;;  %v2431_v9 = vmax.f32 %v1579_v42, 0.0  ;;  %v6470_v20 = vpop.f32.mrb[58].mxu1  ;;  %v7641_v42 = vld [vmem:[#allocation29_spill] sm:$0xff]  ;;  %v7642_v25 = vld [vmem:[#allocation28_spill] sm:$0xff] }
 0x182   : > { %7638 = vst [vmem:[#allocation98_spill] sm:$0xff] %v6463_v36  ;;  %v4094_v6 = vmax.f32 %v4093_v3, %v3809_v59  ;;  %7639 = vst [vmem:[#allocation99_spill] sm:$0xff] %v6470_v20  ;;  %3421 = vbcast.lane.b32.xlu1 %v6334_v8, 280  ;;  %v4955_v63 = vpop.f32.mrb[60].mxu0  ;;  %v6482_v59 = vrot.slane %v6386_v23, %v5554_v29  ;;  %v6484_v31 = vpop.f32.mrb[59].mxu1  ;;  %v3810_v56 = vmul.f32 %v7641_v42, %v2430_v62  ;;  %v7645_v62 = vld [vmem:[#allocation31_spill] sm:$0xff] }
 0x183   : > { %3417 = vbcast.lane.b32.xlu0 %v6334_v8, 272  ;;  %7640 = vst [vmem:[#allocation100_spill] sm:$0xff] %v6484_v31  ;;  %v3811_v48 = vmul.f32 %v7642_v25, %v2431_v9  ;;  %v1591_v20 = vpop.f32.mrb[61].mxu0  ;;  %v6497_v31 = vadd.f32 %v6349_v61, %v6077_v58  ;;  %v3812_v30 = vmul.f32 %v7645_v62, %v2432_v35 }
 0x184   : > { %v4095_v3 = vrot.slane %v4094_v6, 4  ;;  %v1592_v57 = vadd.f32 %v6349_v61, %v1591_v20  ;;  %v6489_v11 = vpop.permute.xlu1 %3176  ;;  %v6491_v46 = vpop.permute.xlu0 %3172  ;;  %v1600_v25 = vadd.f32 %v6349_v61, %v4955_v63  ;;  %v6506_v58 = vadd.f32 %v6349_v61, %v6085_v27 }
 0x185   : > { %7643 = vst [vmem:[#allocation29_spill] sm:$0xff] %v6489_v11  ;;  %7644 = vst [vmem:[#allocation28_spill] sm:$0xff] %v6491_v46  ;;  %v4101_v42 = vmax.f32 %v3810_v56, %v3811_v48  ;;  %v4956_v9 = vpop.f32.mrb[62].mxu0  ;;  %v6512_v48 = vpop.f32.mrb[60].mxu1  ;;  %v7647_v56 = vld [vmem:[#allocation30_spill] sm:$0xff] }
 0x186   : > { %v4096_v32 = vmax.f32 %v4094_v6, %v4095_v3  ;;  %v2434_v20 = vmax.f32 %v1592_v57, 0.0  ;;  %v1603_v11 = vadd.f32 %v6349_v61, %v4956_v9  ;;  %v1594_v46 = vpop.f32.mrb[63].mxu0  ;;  %3429 = vbcast.lane.b32.xlu1 %v6334_v8, 296  ;;  %v6510_v6 = vadd.f32 %v6349_v61, %v6098_v24  ;;  %7646 = vst [vmem:[#allocation31_spill] sm:$0xff] %v6512_v48  ;;  %v6516_v62 = vpop.f32.mrb[61].mxu1  ;;  %v7649_v9 = vld [vmem:[#allocation33_spill] sm:$0xff] }
 0x187   : > { %3425 = vbcast.lane.b32.xlu0 %v6334_v8, 288  ;;  %v3813_v57 = vmul.f32 %v7647_v56, %v2433_v34  ;;  %v4102_v63 = vmax.f32 %v4101_v42, %v3812_v30  ;;  %v1595_v3 = vadd.f32 %v6349_v61, %v1594_v46  ;;  %7648 = vst [vmem:[#allocation30_spill] sm:$0xff] %v6516_v62  ;;  %v2436_v46 = vmax.f32 %v1600_v25, 0.0  ;;  %v6532_v62 = vpop.f32.mrb[62].mxu1 }
 0x188   : > { %v4097_v35 = vrot.slane %v4096_v32, 2  ;;  %v3814_v18 = vmul.f32 %v7649_v9, %v2434_v20  ;;  %v6519_v29 = vpop.permute.xlu1 %3184  ;;  %v6521_v27 = vpop.permute.xlu0 %3180  ;;  %v6526_v24 = vadd.f32 %v6349_v61, %v6106_v50  ;;  %v6530_v34 = vadd.f32 %v6349_v61, %v6112_v5  ;;  %7652 = vst [vmem:[#allocation102_spill] sm:$0xff] %v6532_v62 }
 0x189   : > { %7650 = vst [vmem:[#allocation33_spill] sm:$0xff] %v6519_v29  ;;  %7651 = vst [vmem:[#allocation101_spill] sm:$0xff] %v6521_v27  ;;  %v4103_v42 = vmax.f32 %v4102_v63, %v3813_v57  ;;  %v2435_v56 = vmax.f32 %v1595_v3, 0.0  ;;  %v2437_v20 = vmax.f32 %v1603_v11, 0.0  ;;  %v6539_v50 = vrot.slane %v6386_v23, %v5567_v39  ;;  %v7654_v11 = vld [vmem:[#allocation32_spill] sm:$0xff] }
 0x18a   : > { %v4098_v30 = vmax.f32 %v4096_v32, %v4097_v35  ;;  %3437 = vbcast.lane.b32.xlu1 %v6334_v8, 312  ;;  %v4959_v9 = vpop.f32.mrb[64].mxu0  ;;  %v6543_v5 = vadd.f32 %v6349_v61, %v6116_v60  ;;  %v6545_v32 = vpop.f32.mrb[63].mxu1  ;;  %v6558_v27 = vadd.f32 %v6349_v61, %v6130_v45  ;;  %v6568_v45 = vadd.f32 %v6349_v61, %v6134_v38 }
 0x18b   : > { %3433 = vbcast.lane.b32.xlu0 %v6334_v8, 304  ;;  %7653 = vst [vmem:[#allocation103_spill] sm:$0xff] %v6545_v32  ;;  %v4104_v35 = vmax.f32 %v4103_v42, %v3814_v18  ;;  %v3815_v57 = vmul.f32 %v7654_v11, %v2435_v56  ;;  %v1607_v63 = vpop.f32.mrb[65].mxu0  ;;  %v1616_v3 = vadd.f32 %v6349_v61, %v4959_v9  ;;  %v7657_v42 = vld [vmem:[#allocation35_spill] sm:$0xff]  ;;  %v7658_v9 = vld [vmem:[#allocation34_spill] sm:$0xff] }
 0x18c   : > { %v4099_v25 = vrot.slane %v4098_v30, 1  ;;  %v1608_v36 = vadd.f32 %v6349_v61, %v1607_v63  ;;  %v6551_v29 = vpop.permute.xlu1 %3192  ;;  %v6553_v39 = vpop.permute.xlu0 %3188  ;;  %v3816_v56 = vmul.f32 %v7657_v42, %v2436_v46  ;;  %v3817_v32 = vmul.f32 %v7658_v9, %v2437_v20 }
 0x18d   : > { %7655 = vst [vmem:[#allocation32_spill] sm:$0xff] %v6551_v29  ;;  %7656 = vst [vmem:[#allocation104_spill] sm:$0xff] %v6553_v39  ;;  %v4105_v11 = vmax.f32 %v4104_v35, %v3815_v57  ;;  %v4960_v62 = vpop.f32.mrb[66].mxu0  ;;  %v6574_v46 = vpop.f32.mrb[64].mxu1  ;;  %v2440_v9 = vmax.f32 %v1616_v3, 0.0  ;;  %v6583_v29 = vadd.f32 %v6349_v61, %v6149_v0  ;;  %v7665_v3 = vmax.f32 %v6163_v44, 0.0 }
 0x18e   : > { %v4100_v18 = vmax.f32 %v4098_v30, %v4099_v25  ;;  %v1610_v63 = vpop.f32.mrb[67].mxu0  ;;  %3448 = vbcast.lane.b32.xlu1 %v6338_v12, 264  ;;  %v6572_v30 = vadd.f32 %v6349_v61, %v6141_v28  ;;  %7660 = vst [vmem:[#allocation34_spill] sm:$0xff] %v6574_v46  ;;  %v2438_v35 = vmax.f32 %v1608_v36, 0.0  ;;  %v1619_v20 = vadd.f32 %v6349_v61, %v4960_v62  ;;  %v6578_v42 = vpop.f32.mrb[65].mxu1  ;;  %v7681_v39 = vld [vmem:[#allocation36_spill] sm:$0xff] }
 0x18f   : > { %3444 = vbcast.lane.b32.xlu0 %v6338_v12, 256  ;;  %v4106_v25 = vmax.f32 %v4105_v11, %v3816_v56  ;;  %v1611_v57 = vadd.f32 %v6349_v61, %v1610_v63  ;;  %7661 = vst [vmem:[#allocation105_spill] sm:$0xff] %v6578_v42  ;;  %v7664_v56 = vmax.f32 %v6171_v4, 0.0  ;;  %v6595_v46 = vpop.f32.mrb[66].mxu1  ;;  %v6607_v4 = vrot.slane %v6386_v23, %v7610_v10 }
 0x190   : > { %7659 = vst [vmem:[#allocation35_spill] sm:$0xff] %v6572_v30  ;;  %v3204_v8 = vpop.permute.xlu1 %3203  ;;  %v3200_v60 = vpop.permute.xlu0 %3199  ;;  %v6587_v28 = vsel %vm4468_vm5, %v4100_v18, %v6451_v52  ;;  %7666 = vst [vmem:[#allocation108_spill] sm:$0xff] %v6595_v46  ;;  %v6601_v52 = vrot.slane %v6386_v23, %v7589_v7  ;;  %v6617_v18 = vadd.f32 %v6349_v61, %v6186_v19 }
 0x191   : > { %7662 = vst [vmem:[#allocation106_spill] sm:$0xff] %v6587_v28  ;;  %v6589_v36 = vmax.f32 %v4106_v25, %v3817_v32  ;;  %v2439_v62 = vmax.f32 %v1611_v57, 0.0  ;;  %v3883_v11 = vmul.f32 %v3204_v8, %v7664_v56  ;;  %v3882_v63 = vmul.f32 %v3200_v60, %v7665_v3  ;;  %v6609_v44 = vpop.f32.mrb[67].mxu1  ;;  %v7668_v8 = vld [vmem:[#allocation38_spill] sm:$0xff]  ;;  %v7669_v57 = vld [vmem:[#allocation37_spill] sm:$0xff] }
 0x192   : > { %3456 = vbcast.lane.b32.xlu1 %v6338_v12, 280  ;;  %v4963_v0 = vpop.f32.mrb[68].mxu0  ;;  %7667 = vst [vmem:[#allocation109_spill] sm:$0xff] %v6609_v44  ;;  %v3818_v60 = vmul.f32 %v7668_v8, %v2438_v35  ;;  %v2441_v25 = vmax.f32 %v1619_v20, 0.0  ;;  %7670 = vst [vmem:[#allocation38_spill] sm:$0xff] %v6617_v18  ;;  %v6621_v10 = vadd.f32 %v6349_v61, %v6194_v26  ;;  %v7671_v35 = vld [vmem:[#allocation42_spill] sm:$0xff] }
 0x193   : > { %7663 = vst [vmem:[#allocation107_spill] sm:$0xff] %v6589_v36  ;;  %3452 = vbcast.lane.b32.xlu0 %v6338_v12, 272  ;;  %v3819_v56 = vmul.f32 %v7669_v57, %v2439_v62  ;;  %v4218_v3 = vmax.f32 %v3882_v63, %v3883_v11  ;;  %v1623_v38 = vpop.f32.mrb[69].mxu0  ;;  %v3820_v20 = vmul.f32 %v7671_v35, %v2440_v9  ;;  %v7673_v57 = vmax.f32 %v6154_v53, 0.0  ;;  %v7674_v26 = vld [vmem:[#allocation83_spill] sm:$0xff] }
 0x194   : > { %v1624_v7 = vadd.f32 %v6349_v61, %v1623_v38  ;;  %v3212_v28 = vpop.permute.xlu1 %3211  ;;  %v3208_v36 = vpop.permute.xlu0 %3207  ;;  %v1632_v62 = vadd.f32 %v6349_v61, %v4963_v0  ;;  %v6627_v38 = vrot.slane %v6386_v23, %v7611_v37  ;;  %v6635_v9 = vadd.f32 %v6349_v61, %v7674_v26  ;;  %v7678_v37 = vld [vmem:[#allocation41_spill] sm:$0xff] }
 0x195   : > { %v4114_v8 = vmax.f32 %v3818_v60, %v3819_v56  ;;  %v4964_v11 = vpop.f32.mrb[70].mxu0  ;;  %v3884_v32 = vmul.f32 %v3208_v36, %v7673_v57  ;;  %v7676_v60 = vld [vmem:[#allocation85_spill] sm:$0xff]  ;;  %v6641_v56 = vpop.f32.mrb[68].mxu1  ;;  %v3821_v23 = vmul.f32 %v7678_v37, %v2441_v25  ;;  %v7680_v57 = vld [vmem:[#allocation44_spill] sm:$0xff]  ;;  %v7682_v26 = vmax.f32 %v7681_v39, 0.0 }
 0x196   : > { %7672 = vst [vmem:[#allocation37_spill] sm:$0xff] %v6627_v38  ;;  %v2442_v63 = vmax.f32 %v1624_v7, 0.0  ;;  %v1626_v19 = vpop.f32.mrb[71].mxu0  ;;  %3464 = vbcast.lane.b32.xlu1 %v6338_v12, 296  ;;  %7675 = vst [vmem:[#allocation42_spill] sm:$0xff] %v6635_v9  ;;  %v6639_v0 = vadd.f32 %v6349_v61, %v7676_v60  ;;  %v1635_v53 = vadd.f32 %v6349_v61, %v4964_v11  ;;  %v6646_v35 = vpop.f32.mrb[69].mxu1 }
 0x197   : > { %3460 = vbcast.lane.b32.xlu0 %v6338_v12, 288  ;;  %7677 = vst [vmem:[#allocation83_spill] sm:$0xff] %v6641_v56  ;;  %v4115_v7 = vmax.f32 %v4114_v8, %v3820_v20  ;;  %v1627_v36 = vadd.f32 %v6349_v61, %v1626_v19  ;;  %7679 = vst [vmem:[#allocation85_spill] sm:$0xff] %v6646_v35  ;;  %v3885_v44 = vmul.f32 %v3212_v28, %v7682_v26  ;;  %v7683_v20 = vld [vmem:[#allocation88_spill] sm:$0xff]  ;;  %v6656_v11 = vpop.f32.mrb[70].mxu1 }
 0x198   : > { %v3822_v46 = vmul.f32 %v7680_v57, %v2442_v63  ;;  %v4219_v42 = vmax.f32 %v4218_v3, %v3884_v32  ;;  %v3220_v48 = vpop.permute.xlu1 %3219  ;;  %v3216_v60 = vpop.permute.xlu0 %3215  ;;  %v2444_v56 = vmax.f32 %v1632_v62, 0.0  ;;  %v6654_v8 = vadd.f32 %v6349_v61, %v7683_v20  ;;  %7685 = vst [vmem:[#allocation44_spill] sm:$0xff] %v6656_v11  ;;  %v7686_v19 = vld [vmem:[#allocation40_spill] sm:$0xff]  ;;  %v7691_v32 = vld [vmem:[#allocation46_spill] sm:$0xff] }
 0x199   : > { %v4116_v38 = vmax.f32 %v4115_v7, %v3821_v23  ;;  %v2443_v25 = vmax.f32 %v1627_v36, 0.0  ;;  %v7687_v37 = vmax.f32 %v7686_v19, 0.0  ;;  %v6664_v3 = vpop.f32.mrb[71].mxu1  ;;  %v2445_v23 = vmax.f32 %v1635_v53, 0.0  ;;  %v7689_v7 = vld [vmem:[#allocation43_spill] sm:$0xff] }
 0x19a   : > { %7684 = vst [vmem:[#allocation41_spill] sm:$0xff] %v6654_v8  ;;  %v4220_v57 = vmax.f32 %v4219_v42, %v3885_v44  ;;  %3472 = vbcast.lane.b32.xlu1 %v6338_v12, 312  ;;  %v4967_v39 = vpop.f32.mrb[72].mxu0  ;;  %7688 = vst [vmem:[#allocation36_spill] sm:$0xff] %v6664_v3  ;;  %v7690_v42 = vmax.f32 %v6225_v41, 0.0  ;;  %v3824_v28 = vmul.f32 %v7691_v32, %v2444_v56  ;;  %v7693_v41 = vld [vmem:[#allocation39_spill] sm:$0xff] }
 0x19b   : > { %v3886_v63 = vmul.f32 %v3216_v60, %v7687_v37  ;;  %3468 = vbcast.lane.b32.xlu0 %v6338_v12, 304  ;;  %v4117_v62 = vmax.f32 %v4116_v38, %v3822_v46  ;;  %v3823_v36 = vmul.f32 %v7689_v7, %v2443_v25  ;;  %v1639_v26 = vpop.f32.mrb[73].mxu0  ;;  %v1648_v12 = vadd.f32 %v6349_v61, %v4967_v39  ;;  %v6686_v32 = vpop.f32.mrb[72].mxu1 }
 0x19c   : > { %v3887_v44 = vmul.f32 %v3220_v48, %v7690_v42  ;;  %v1640_v19 = vadd.f32 %v6349_v61, %v1639_v26  ;;  %v3228_v37 = vpop.permute.xlu1 %3227  ;;  %v3224_v30 = vpop.permute.xlu0 %3223  ;;  %v6676_v53 = vadd.f32 %v6349_v61, %v6249_v55  ;;  %v7694_v48 = vmax.f32 %v7693_v41, 0.0  ;;  %7696 = vst [vmem:[#allocation43_spill] sm:$0xff] %v6686_v32 }
 0x19d   : > { %v4221_v60 = vmax.f32 %v4220_v57, %v3886_v63  ;;  %v4118_v11 = vmax.f32 %v4117_v62, %v3823_v36  ;;  %v4968_v46 = vpop.f32.mrb[74].mxu0  ;;  %v6684_v56 = vadd.f32 %v6349_v61, %v6259_v47  ;;  %v7697_v62 = vld [vmem:[#allocation45_spill] sm:$0xff]  ;;  %v2448_v42 = vmax.f32 %v1648_v12, 0.0  ;;  %v7708_v12 = vld [vmem:[#allocation48_spill] sm:$0xff] }
 0x19e   : > { %7692 = vst [vmem:[#allocation88_spill] sm:$0xff] %v6676_v53  ;;  %v2446_v25 = vmax.f32 %v1640_v19, 0.0  ;;  %v3888_v63 = vmul.f32 %v3224_v30, %v7694_v48  ;;  %v1642_v39 = vpop.f32.mrb[75].mxu0  ;;  %3483 = vbcast.lane.b32.xlu1 %v6404_v2, 264  ;;  %v3825_v7 = vmul.f32 %v7697_v62, %v2445_v23  ;;  %v1651_v36 = vadd.f32 %v6349_v61, %v4968_v46  ;;  %v6691_v30 = vpop.f32.mrb[73].mxu1  ;;  %v7701_v47 = vld [vmem:[#allocation49_spill] sm:$0xff] }
 0x19f   : > { %v4222_v57 = vmax.f32 %v4221_v60, %v3887_v44  ;;  %3479 = vbcast.lane.b32.xlu0 %v6404_v2, 256  ;;  %7695 = vst [vmem:[#allocation40_spill] sm:$0xff] %v6684_v56  ;;  %v4119_v55 = vmax.f32 %v4118_v11, %v3824_v28  ;;  %v1643_v26 = vadd.f32 %v6349_v61, %v1642_v39  ;;  %7698 = vst [vmem:[#allocation46_spill] sm:$0xff] %v6691_v30  ;;  %v7699_v44 = vld [vmem:[#allocation84_spill] sm:$0xff]  ;;  %v7703_v11 = vld [vmem:[#allocation7_spill] sm:$0xff]  ;;  %v6703_v30 = vpop.f32.mrb[74].mxu1 }
 0x1a0   : > { %v7700_v60 = vmax.f32 %v7699_v44, 0.0  ;;  %v3239_v48 = vpop.permute.xlu1 %3238  ;;  %v3235_v38 = vpop.permute.xlu0 %3234  ;;  %v6697_v20 = vadd.f32 %v6349_v61, %v7701_v47  ;;  %v7704_v28 = vmax.f32 %v7703_v11, 0.0  ;;  %v7705_v62 = vld [vmem:[#allocation87_spill] sm:$0xff]  ;;  %7707 = vst [vmem:[#allocation45_spill] sm:$0xff] %v6703_v30  ;;  %v3826_v44 = vmul.f32 %v7708_v12, %v2446_v25  ;;  %v7725_v53 = vld [vmem:[#allocation90_spill] sm:$0xff] }
 0x1a1   : > { %v4223_v41 = vmax.f32 %v4222_v57, %v3888_v63  ;;  %v4120_v32 = vmax.f32 %v4119_v55, %v3825_v7  ;;  %v2447_v23 = vmax.f32 %v1643_v26, 0.0  ;;  %v7706_v39 = vmax.f32 %v7705_v62, 0.0  ;;  %v6710_v55 = vpop.f32.mrb[75].mxu1  ;;  %v7713_v57 = vld [vmem:[#allocation51_spill] sm:$0xff] }
 0x1a2   : > { %v3889_v19 = vmul.f32 %v3228_v37, %v7700_v60  ;;  %7702 = vst [vmem:[#allocation39_spill] sm:$0xff] %v6697_v20  ;;  %v3891_v46 = vmul.f32 %v3239_v48, %v7704_v28  ;;  %3491 = vbcast.lane.b32.xlu1 %v6404_v2, 280  ;;  %v4971_v63 = vpop.f32.mrb[76].mxu0  ;;  %7709 = vst [vmem:[#allocation84_spill] sm:$0xff] %v6710_v55  ;;  %v2449_v60 = vmax.f32 %v1651_v36, 0.0  ;;  %v7710_v48 = vld [vmem:[#allocation47_spill] sm:$0xff] }
 0x1a3   : > { %v3890_v3 = vmul.f32 %v3235_v38, %v7706_v39  ;;  %3487 = vbcast.lane.b32.xlu0 %v6404_v2, 272  ;;  %v4121_v26 = vrot.slane %v4120_v32, 4  ;;  %v3827_v38 = vmul.f32 %v7710_v48, %v2447_v23  ;;  %v1655_v11 = vpop.f32.mrb[77].mxu0  ;;  %v7711_v39 = vld [vmem:[#allocation93_spill] sm:$0xff]  ;;  %v3828_v30 = vmul.f32 %v7713_v57, %v2448_v42  ;;  %v7714_v48 = vld [vmem:[#allocation86_spill] sm:$0xff] }
 0x1a4   : > { %v4224_v37 = vmax.f32 %v4223_v41, %v3889_v19  ;;  %v1656_v25 = vadd.f32 %v6349_v61, %v1655_v11  ;;  %v3247_v19 = vpop.permute.xlu1 %3246  ;;  %v3243_v41 = vpop.permute.xlu0 %3242  ;;  %v6717_v12 = vadd.f32 %v6349_v61, %v7711_v39  ;;  %v1664_v36 = vadd.f32 %v6349_v61, %v4971_v63  ;;  %v7718_v57 = vld [vmem:[#allocation94_spill] sm:$0xff] }
 0x1a5   : > { %v4231_v47 = vmax.f32 %v3890_v3, %v3891_v46  ;;  %v4122_v7 = vmax.f32 %v4120_v32, %v4121_v26  ;;  %v4127_v55 = vmax.f32 %v3826_v44, %v3827_v38  ;;  %v4972_v23 = vpop.f32.mrb[78].mxu0  ;;  %v7715_v35 = vmax.f32 %v7714_v48, 0.0  ;;  %v6726_v39 = vpop.f32.mrb[76].mxu1  ;;  %v7717_v32 = vld [vmem:[#allocation50_spill] sm:$0xff] }
 0x1a6   : > { %v4225_v28 = vrot.slane %v4224_v37, 4  ;;  %7712 = vst [vmem:[#allocation49_spill] sm:$0xff] %v6717_v12  ;;  %v2450_v46 = vmax.f32 %v1656_v25, 0.0  ;;  %v1667_v56 = vadd.f32 %v6349_v61, %v4972_v23  ;;  %v1658_v8 = vpop.f32.mrb[79].mxu0  ;;  %3499 = vbcast.lane.b32.xlu1 %v6404_v2, 296  ;;  %7716 = vst [vmem:[#allocation7_spill] sm:$0xff] %v6726_v39  ;;  %v3829_v42 = vmul.f32 %v7717_v32, %v2449_v60 }
 0x1a7   : > { %v3892_v11 = vmul.f32 %v3243_v41, %v7715_v35  ;;  %3495 = vbcast.lane.b32.xlu0 %v6404_v2, 288  ;;  %v4128_v44 = vmax.f32 %v4127_v55, %v3828_v30  ;;  %v1659_v63 = vadd.f32 %v6349_v61, %v1658_v8  ;;  %v6734_v26 = vpop.f32.mrb[77].mxu1  ;;  %v4123_v35 = vrot.slane %v4122_v7, 2  ;;  %v7721_v38 = vld [vmem:[#allocation54_spill] sm:$0xff]  ;;  %v7722_v25 = vld [vmem:[#allocation15_spill] sm:$0xff]  ;;  %v7734_v8 = vld [vmem:[#allocation8_spill] sm:$0xff] }
 0x1a8   : > { %v4226_v3 = vmax.f32 %v4224_v37, %v4225_v28  ;;  %v6732_v37 = vadd.f32 %v6349_v61, %v7718_v57  ;;  %7720 = vst [vmem:[#allocation48_spill] sm:$0xff] %v6734_v26  ;;  %v3830_v28 = vmul.f32 %v7721_v38, %v2450_v46  ;;  %v7723_v41 = vmax.f32 %v7722_v25, 0.0  ;;  %v3255_v62 = vpop.permute.xlu1 %3254  ;;  %v3251_v39 = vpop.permute.xlu0 %3250 }
 0x1a9   : > { %v4232_v48 = vmax.f32 %v4231_v47, %v3892_v11  ;;  %v2452_v20 = vmax.f32 %v1664_v36, 0.0  ;;  %v4129_v60 = vmax.f32 %v4128_v44, %v3829_v42  ;;  %v2451_v30 = vmax.f32 %v1659_v63, 0.0  ;;  %v6740_v55 = vpop.f32.mrb[78].mxu1  ;;  %v7728_v11 = vld [vmem:[#allocation53_spill] sm:$0xff] }
 0x1aa   : > { %7719 = vst [vmem:[#allocation87_spill] sm:$0xff] %v6732_v37  ;;  %v3893_v23 = vmul.f32 %v3247_v19, %v7723_v41  ;;  %7724 = vst [vmem:[#allocation47_spill] sm:$0xff] %v6740_v55  ;;  %v4227_v32 = vrot.slane %v4226_v3, 2  ;;  %v2453_v57 = vmax.f32 %v1667_v56, 0.0  ;;  %v7726_v26 = vmax.f32 %v7725_v53, 0.0  ;;  %3507 = vbcast.lane.b32.xlu1 %v6404_v2, 312 }
 0x1ab   : > { %v4975_v46 = vpop.f32.mrb[80].mxu0  ;;  %v6745_v19 = vpop.f32.mrb[79].mxu1  ;;  %v4130_v47 = vmax.f32 %v4129_v60, %v3830_v28  ;;  %v3831_v36 = vmul.f32 %v7728_v11, %v2451_v30  ;;  %3503 = vbcast.lane.b32.xlu0 %v6404_v2, 304  ;;  %v7729_v63 = vld [vmem:[#allocation97_spill] sm:$0xff]  ;;  %v4124_v53 = vmax.f32 %v4122_v7, %v4123_v35  ;;  %v6761_v44 = vadd.f32 %v6349_v61, %v7734_v8  ;;  %v7735_v7 = vld [vmem:[#allocation55_spill] sm:$0xff] }
 0x1ac   : > { %v3894_v9 = vmul.f32 %v3251_v39, %v7726_v26  ;;  %v4233_v18 = vmax.f32 %v4232_v48, %v3893_v23  ;;  %7727 = vst [vmem:[#allocation93_spill] sm:$0xff] %v6745_v19  ;;  %v1671_v42 = vpop.f32.mrb[81].mxu0  ;;  %v6752_v56 = vadd.f32 %v6349_v61, %v7729_v63  ;;  %v7731_v39 = vld [vmem:[#allocation92_spill] sm:$0xff]  ;;  %v3263_v23 = vpop.permute.xlu1 %3262  ;;  %v1680_v2 = vadd.f32 %v6349_v61, %v4975_v46 }
 0x1ad   : > { %v7732_v26 = vmax.f32 %v7731_v39, 0.0  ;;  %v1672_v41 = vadd.f32 %v6349_v61, %v1671_v42  ;;  %v3259_v28 = vpop.permute.xlu0 %3258  ;;  %v7733_v48 = vld [vmem:[#allocation56_spill] sm:$0xff]  ;;  %v4131_v30 = vmax.f32 %v4130_v47, %v3831_v36  ;;  %v4976_v11 = vpop.f32.mrb[82].mxu0  ;;  %v6763_v63 = vmax.f32 %v4226_v3, %v4227_v32 }
 0x1ae   : > { %7730 = vst [vmem:[#allocation51_spill] sm:$0xff] %v6752_v56  ;;  %v4234_v25 = vmax.f32 %v4233_v18, %v3894_v9  ;;  %v3832_v60 = vmul.f32 %v7733_v48, %v2452_v20  ;;  %v3833_v35 = vmul.f32 %v7735_v7, %v2453_v57  ;;  %v1674_v39 = vpop.f32.mrb[83].mxu0  ;;  %3518 = vbcast.lane.b32.xlu1 %v6408_v54, 264  ;;  %v6769_v20 = vpop.f32.mrb[80].mxu1  ;;  %v4125_v32 = vrot.slane %v4124_v53, 1  ;;  %v7740_v57 = vld [vmem:[#allocation91_spill] sm:$0xff] }
 0x1af   : > { %v3895_v38 = vmul.f32 %v3255_v62, %v7732_v26  ;;  %v7736_v62 = vld [vmem:[#allocation16_spill] sm:$0xff]  ;;  %7738 = vst [vmem:[#allocation86_spill] sm:$0xff] %v6769_v20  ;;  %v2454_v46 = vmax.f32 %v1672_v41, 0.0  ;;  %v1683_v36 = vadd.f32 %v6349_v61, %v4976_v11  ;;  %v1675_v8 = vadd.f32 %v6349_v61, %v1674_v39  ;;  %3514 = vbcast.lane.b32.xlu0 %v6408_v54, 256  ;;  %v6774_v3 = vpop.f32.mrb[81].mxu1 }
 0x1b0   : > { %v7737_v18 = vmax.f32 %v7736_v62, 0.0  ;;  %v4132_v47 = vmax.f32 %v4131_v30, %v3832_v60  ;;  %7739 = vst [vmem:[#allocation50_spill] sm:$0xff] %v6774_v3  ;;  %v7741_v26 = vmax.f32 %v7740_v57, 0.0  ;;  %v2456_v60 = vmax.f32 %v1680_v2, 0.0  ;;  %v7744_v3 = vld [vmem:[#allocation18_spill] sm:$0xff] }
 0x1b1   : > { %v4235_v42 = vmax.f32 %v4234_v25, %v3895_v38  ;;  %v3274_v25 = vpop.permute.xlu1 %3273  ;;  %v3270_v48 = vpop.permute.xlu0 %3269  ;;  %v2455_v41 = vmax.f32 %v1675_v8, 0.0  ;;  %v7742_v30 = vmax.f32 %v6362_v22, 0.0  ;;  %v4229_v39 = vrot.slane %v6763_v63, 1  ;;  %v7748_v22 = vld [vmem:[#allocation58_spill] sm:$0xff] }
 0x1b2   : > { %v3896_v9 = vmul.f32 %v3259_v28, %v7737_v18  ;;  %v3897_v28 = vmul.f32 %v3263_v23, %v7741_v26  ;;  %v4133_v62 = vmax.f32 %v4132_v47, %v3833_v35  ;;  %v6781_v18 = vpop.f32.mrb[82].mxu1  ;;  %v7745_v55 = vmax.f32 %v7744_v3, 0.0  ;;  %3526 = vbcast.lane.b32.xlu1 %v6408_v54, 280  ;;  %v4979_v23 = vpop.f32.mrb[84].mxu0  ;;  %v7749_v26 = vld [vmem:[#allocation57_spill] sm:$0xff] }
 0x1b3   : > { %v3899_v11 = vmul.f32 %v3274_v25, %v7742_v30  ;;  %7743 = vst [vmem:[#allocation94_spill] sm:$0xff] %v6781_v18  ;;  %v6791_v2 = vpop.f32.mrb[83].mxu1  ;;  %v3834_v47 = vmul.f32 %v7748_v22, %v2454_v46  ;;  %v2457_v8 = vmax.f32 %v1683_v36, 0.0  ;;  %v3835_v25 = vmul.f32 %v7749_v26, %v2455_v41  ;;  %3522 = vbcast.lane.b32.xlu0 %v6408_v54, 272  ;;  %v7750_v18 = vld [vmem:[#allocation62_spill] sm:$0xff]  ;;  %v7751_v26 = vld [vmem:[#allocation19_spill] sm:$0xff] }
 0x1b4   : > { %v4236_v38 = vmax.f32 %v4235_v42, %v3896_v9  ;;  %v3898_v57 = vmul.f32 %v3270_v48, %v7745_v55  ;;  %v7746_v9 = vld [vmem:[#allocation20_spill] sm:$0xff]  ;;  %7747 = vst [vmem:[#allocation54_spill] sm:$0xff] %v6791_v2  ;;  %v4134_v35 = vrot.slane %v4133_v62, 4  ;;  %v6796_v3 = vmax.f32 %v4124_v53, %v4125_v32 }
 0x1b5   : > { %v6789_v42 = vadd.f32 %v6349_v61, %v7746_v9  ;;  %v3282_v30 = vpop.permute.xlu1 %3281  ;;  %v3278_v9 = vpop.permute.xlu0 %3277  ;;  %v3836_v2 = vmul.f32 %v7750_v18, %v2456_v60  ;;  %v4140_v19 = vmax.f32 %v3834_v47, %v3835_v25  ;;  %v1696_v46 = vadd.f32 %v6349_v61, %v4979_v23  ;;  %v7756_v47 = vld [vmem:[#allocation64_spill] sm:$0xff] }
 0x1b6   : > { %v4237_v20 = vmax.f32 %v4236_v38, %v3897_v28  ;;  %v1687_v28 = vpop.f32.mrb[85].mxu0  ;;  %v4244_v38 = vmax.f32 %v3898_v57, %v3899_v11  ;;  %v4135_v7 = vmax.f32 %v4133_v62, %v4134_v35  ;;  %v7752_v56 = vmax.f32 %v7751_v26, 0.0  ;;  %3534 = vbcast.lane.b32.xlu1 %v6408_v54, 296  ;;  %v6805_v11 = vpop.f32.mrb[84].mxu1  ;;  %v7754_v62 = vld [vmem:[#allocation61_spill] sm:$0xff] }
 0x1b7   : > { %v1688_v48 = vadd.f32 %v6349_v61, %v1687_v28  ;;  %v4980_v36 = vpop.f32.mrb[86].mxu0  ;;  %7753 = vst [vmem:[#allocation15_spill] sm:$0xff] %v6805_v11  ;;  %v3837_v35 = vmul.f32 %v7754_v62, %v2457_v8  ;;  %v4141_v60 = vmax.f32 %v4140_v19, %v3836_v2  ;;  %3530 = vbcast.lane.b32.xlu0 %v6408_v54, 288  ;;  %v7757_v25 = vmax.f32 %v6358_v16, 0.0 }
 0x1b8   : > { %v4238_v55 = vrot.slane %v4237_v20, 4  ;;  %v3900_v12 = vmul.f32 %v3278_v9, %v7752_v56  ;;  %v1699_v53 = vadd.f32 %v6349_v61, %v4980_v36  ;;  %v1690_v32 = vpop.f32.mrb[87].mxu0  ;;  %v4136_v57 = vrot.slane %v4135_v7, 2 }
 0x1b9   : > { %v2458_v41 = vmax.f32 %v1688_v48, 0.0  ;;  %v1691_v18 = vadd.f32 %v6349_v61, %v1690_v32  ;;  %v3901_v28 = vmul.f32 %v3282_v30, %v7757_v25  ;;  %v3290_v48 = vpop.permute.xlu1 %3289  ;;  %v3286_v9 = vpop.permute.xlu0 %3285  ;;  %v2460_v26 = vmax.f32 %v1696_v46, 0.0  ;;  %v7761_v30 = vld [vmem:[#allocation63_spill] sm:$0xff]  ;;  %v7763_v25 = vld [vmem:[#allocation66_spill] sm:$0xff] }
 0x1ba   : > { %v4239_v22 = vmax.f32 %v4237_v20, %v4238_v55  ;;  %v6810_v20 = vpop.f32.mrb[85].mxu1  ;;  %v4245_v55 = vmax.f32 %v4244_v38, %v3900_v12  ;;  %v4137_v36 = vmax.f32 %v4135_v7, %v4136_v57  ;;  %v4142_v11 = vmax.f32 %v4141_v60, %v3837_v35  ;;  %3542 = vbcast.lane.b32.xlu1 %v6408_v54, 312 }
 0x1bb   : > { %7755 = vst [vmem:[#allocation90_spill] sm:$0xff] %v6810_v20  ;;  %v3838_v56 = vmul.f32 %v7756_v47, %v2458_v41  ;;  %v2459_v8 = vmax.f32 %v1691_v18, 0.0  ;;  %v6815_v19 = vpop.f32.mrb[86].mxu1  ;;  %v2461_v32 = vmax.f32 %v1699_v53, 0.0  ;;  %v7759_v62 = vmax.f32 %v6375_v33, 0.0  ;;  %v4983_v41 = vpop.f32.mrb[88].mxu0 }
 0x1bc   : > { %v4240_v23 = vrot.slane %v4239_v22, 2  ;;  %7758 = vst [vmem:[#allocation53_spill] sm:$0xff] %v6815_v19  ;;  %v4246_v37 = vmax.f32 %v4245_v55, %v3901_v28  ;;  %v6820_v16 = vpop.f32.mrb[87].mxu1  ;;  %v4230_v12 = vmax.f32 %v6763_v63, %v4229_v39  ;;  %v4138_v38 = vrot.slane %v4137_v36, 1  ;;  %3538 = vbcast.lane.b32.xlu0 %v6408_v54, 304  ;;  %v1703_v57 = vpop.f32.mrb[89].mxu0 }
 0x1bd   : > { %v3902_v20 = vmul.f32 %v3286_v9, %v7759_v62  ;;  %7760 = vst [vmem:[#allocation97_spill] sm:$0xff] %v6820_v16  ;;  %v4143_v7 = vmax.f32 %v4142_v11, %v3838_v56  ;;  %v3839_v46 = vmul.f32 %v7761_v30, %v2459_v8  ;;  %v7762_v53 = vmax.f32 %v6422_v1, 0.0  ;;  %v3298_v18 = vpop.permute.xlu1 %3297  ;;  %v4984_v11 = vpop.f32.mrb[90].mxu0  ;;  %v7764_v55 = vld [vmem:[#allocation65_spill] sm:$0xff] }
 0x1be   : > { %v4241_v2 = vmax.f32 %v4239_v22, %v4240_v23  ;;  %v1704_v60 = vadd.f32 %v6349_v61, %v1703_v57  ;;  %v3294_v23 = vpop.permute.xlu0 %3293  ;;  %v4139_v47 = vmax.f32 %v4137_v36, %v4138_v38  ;;  %v3840_v28 = vmul.f32 %v7763_v25, %v2460_v26  ;;  %3553 = vbcast.lane.b32.xlu1 %v6478_v40, 264 }
 0x1bf   : > { %v3903_v33 = vmul.f32 %v3290_v48, %v7762_v53  ;;  %v4247_v35 = vmax.f32 %v4246_v37, %v3902_v20  ;;  %v4144_v63 = vmax.f32 %v4143_v7, %v3839_v46  ;;  %v1712_v39 = vadd.f32 %v6349_v61, %v4983_v41  ;;  %v1706_v48 = vpop.f32.mrb[91].mxu0  ;;  %v6834_v37 = vpop.f32.mrb[88].mxu1 }
 0x1c0   : > { %v4242_v22 = vrot.slane %v4241_v2, 1  ;;  %v3841_v54 = vmul.f32 %v7764_v55, %v2461_v32  ;;  %v7765_v9 = vmax.f32 %v6366_v17, 0.0  ;;  %v6838_v20 = vsel %vm4458_vm0, %v4139_v47, %v6796_v3  ;;  %3549 = vbcast.lane.b32.xlu0 %v6478_v40, 256  ;;  %v6844_v17 = vpop.f32.mrb[89].mxu1 }
 0x1c1   : > { %v4248_v1 = vmax.f32 %v4247_v35, %v3903_v33  ;;  %v4145_v36 = vmax.f32 %v4144_v63, %v3840_v28  ;;  %v7766_v26 = vmax.f32 %v6379_v21, 0.0  ;;  %v2462_v41 = vmax.f32 %v1704_v60, 0.0  ;;  %v3309_v30 = vpop.permute.xlu1 %3308  ;;  %v6854_v35 = vpop.f32.mrb[90].mxu1 }
 0x1c2   : > { %v4243_v56 = vmax.f32 %v4241_v2, %v4242_v22  ;;  %v3904_v8 = vmul.f32 %v3294_v23, %v7765_v9  ;;  %v1715_v2 = vadd.f32 %v6349_v61, %v4984_v11  ;;  %v1707_v7 = vadd.f32 %v6349_v61, %v1706_v48  ;;  %v3305_v3 = vpop.permute.xlu0 %3304  ;;  %3588 = vbcast.lane.b32.xlu1 %v6482_v59, 264  ;;  %v6862_v25 = vpop.f32.mrb[91].mxu1  ;;  %v7769_v11 = vld [vmem:[#allocation68_spill] sm:$0xff] }
 0x1c3   : > { %v3905_v62 = vmul.f32 %v3298_v18, %v7766_v26  ;;  %v4146_v46 = vmax.f32 %v4145_v36, %v3841_v54  ;;  %v2464_v57 = vmax.f32 %v1712_v39, 0.0  ;;  %v7767_v21 = vmax.f32 %v6443_v14, 0.0  ;;  %v7770_v54 = vld [vmem:[#allocation67_spill] sm:$0xff]  ;;  %v7771_v36 = vld [vmem:[#allocation70_spill] sm:$0xff] }
 0x1c4   : > { %v6847_v32 = vsel %vm4458_vm0, %v4243_v56, %v4230_v12  ;;  %v4249_v38 = vmax.f32 %v4248_v1, %v3904_v8  ;;  %v7768_v53 = vmax.f32 %v6430_v15, 0.0  ;;  %v2463_v23 = vmax.f32 %v1707_v7, 0.0  ;;  %v4987_v12 = vpop.f32.mrb[92].mxu0  ;;  %3584 = vbcast.lane.b32.xlu0 %v6482_v59, 256 }
 0x1c5   : > { %v3907_v22 = vmul.f32 %v3309_v30, %v7767_v21  ;;  %v6860_v47 = vadd.f32 %v6349_v61, %v6388_v51  ;;  %v4147_v14 = vrot.slane %v4146_v46, 4  ;;  %v2465_v28 = vmax.f32 %v1715_v2, 0.0  ;;  %v1719_v15 = vpop.f32.mrb[93].mxu0  ;;  %v3317_v1 = vpop.permute.xlu1 %3316 }
 0x1c6   : > { %v3906_v33 = vmul.f32 %v3305_v3, %v7768_v53  ;;  %v4250_v18 = vmax.f32 %v4249_v38, %v3905_v62  ;;  %v3842_v56 = vmul.f32 %v7769_v11, %v2462_v41  ;;  %v3843_v9 = vmul.f32 %v7770_v54, %v2463_v23  ;;  %v3313_v51 = vpop.permute.xlu0 %3312  ;;  %v4988_v7 = vpop.f32.mrb[94].mxu0  ;;  %3619 = vbcast.lane.b32.xlu1 %v6539_v50, 256 }
 0x1c7   : > { %v1720_v8 = vadd.f32 %v6349_v61, %v1719_v15  ;;  %v4148_v48 = vmax.f32 %v4146_v46, %v4147_v14  ;;  %v3844_v26 = vmul.f32 %v7771_v36, %v2464_v57  ;;  %v1728_v62 = vadd.f32 %v6349_v61, %v4987_v12  ;;  %v6875_v53 = vpop.f32.mrb[92].mxu1  ;;  %v7774_v46 = vld [vmem:[#allocation69_spill] sm:$0xff]  ;;  %v7775_v15 = vld [vmem:[#allocation72_spill] sm:$0xff] }
 0x1c8   : > { %v4257_v63 = vmax.f32 %v3906_v33, %v3907_v22  ;;  %v4251_v55 = vrot.slane %v4250_v18, 4  ;;  %v7772_v2 = vmax.f32 %v6426_v13, 0.0  ;;  %v4153_v3 = vmax.f32 %v3842_v56, %v3843_v9  ;;  %v1722_v22 = vpop.f32.mrb[95].mxu0  ;;  %7773 = vst [vmem:[#allocation92_spill] sm:$0xff] %v6875_v53  ;;  %3557 = vbcast.lane.b32.xlu0 %v6478_v40, 272  ;;  %v6880_v13 = vpop.f32.mrb[93].mxu1 }
 0x1c9   : > { %v2466_v21 = vmax.f32 %v1720_v8, 0.0  ;;  %v1731_v41 = vadd.f32 %v6349_v61, %v4988_v7  ;;  %v4149_v33 = vrot.slane %v4148_v48, 2  ;;  %v3845_v23 = vmul.f32 %v7774_v46, %v2465_v28  ;;  %v3325_v54 = vpop.permute.xlu1 %3324 }
 0x1ca   : > { %v3908_v38 = vmul.f32 %v3313_v51, %v7772_v2  ;;  %v4252_v30 = vmax.f32 %v4250_v18, %v4251_v55  ;;  %v1723_v12 = vadd.f32 %v6349_v61, %v1722_v22  ;;  %v4154_v14 = vmax.f32 %v4153_v3, %v3844_v26  ;;  %v3321_v9 = vpop.permute.xlu0 %3320  ;;  %v6887_v61 = vpop.f32.mrb[94].mxu1  ;;  %3592 = vbcast.lane.b32.xlu1 %v6482_v59, 272 }
 0x1cb   : > { %v3846_v11 = vmul.f32 %v7775_v15, %v2466_v21  ;;  %v7776_v56 = vmax.f32 %v6439_v43, 0.0  ;;  %v4150_v8 = vmax.f32 %v4148_v48, %v4149_v33  ;;  %v2468_v51 = vmax.f32 %v1728_v62, 0.0  ;;  %7778 = vst [vmem:[#allocation56_spill] sm:$0xff] %v6887_v61  ;;  %v4991_v26 = vpop.f32.mrb[96].mxu0  ;;  %v6890_v3 = vpop.f32.mrb[95].mxu1  ;;  %v7783_v15 = vld [vmem:[#allocation74_spill] sm:$0xff] }
 0x1cc   : > { %v4258_v57 = vmax.f32 %v4257_v63, %v3908_v38  ;;  %v4253_v18 = vrot.slane %v4252_v30, 2  ;;  %v2467_v36 = vmax.f32 %v1723_v12, 0.0  ;;  %v7777_v28 = vmax.f32 %v6467_v49, 0.0  ;;  %7779 = vst [vmem:[#allocation8_spill] sm:$0xff] %v6890_v3  ;;  %3623 = vbcast.lane.b32.xlu0 %v6539_v50, 264  ;;  %v1735_v49 = vpop.f32.mrb[97].mxu0 }
 0x1cd   : > { %v3909_v55 = vmul.f32 %v3317_v1, %v7776_v56  ;;  %v4155_v38 = vmax.f32 %v4154_v14, %v3845_v23  ;;  %v2469_v7 = vmax.f32 %v1731_v41, 0.0  ;;  %v4151_v43 = vrot.slane %v4150_v8, 1  ;;  %v7780_v1 = vld [vmem:[#allocation71_spill] sm:$0xff] }
 0x1ce   : > { %v3910_v63 = vmul.f32 %v3321_v9, %v7777_v28  ;;  %v4254_v2 = vmax.f32 %v4252_v30, %v4253_v18  ;;  %v3847_v21 = vmul.f32 %v7780_v1, %v2467_v36  ;;  %v7781_v48 = vmax.f32 %v6506_v58, 0.0  ;;  %v6899_v30 = vld [vmem:[%s7446_s3] ss:$0 sm:$0xff]  ;;  %v7782_v41 = vld [vmem:[#allocation23_spill] sm:$0xff]  ;;  %v3333_v18 = vpop.permute.xlu1 %3332  ;;  %v3329_v58 = vpop.permute.xlu0 %3328  ;;  %3658 = vbcast.lane.b32.xlu1 %v6601_v52, 264 }
 0x1cf   : > { %v4259_v22 = vmax.f32 %v4258_v57, %v3909_v55  ;;  %v6903_v33 = vadd.f32 %v6899_v30, %v7782_v41  ;;  %v4156_v23 = vmax.f32 %v4155_v38, %v3846_v11  ;;  %v1736_v12 = vadd.f32 %v6899_v30, %v1735_v49  ;;  %v4992_v28 = vpop.f32.mrb[98].mxu0 }
 0x1d0   : > { %v3911_v62 = vmul.f32 %v3325_v54, %v7781_v48  ;;  %v4255_v46 = vrot.slane %v4254_v2, 1  ;;  %v4152_v14 = vmax.f32 %v4150_v8, %v4151_v43  ;;  %v3848_v56 = vmul.f32 %v7783_v15, %v2468_v51  ;;  %v7784_v54 = vld [vmem:[#allocation98_spill] sm:$0xff]  ;;  %v7786_v48 = vld [vmem:[#allocation73_spill] sm:$0xff]  ;;  %v1738_v11 = vpop.f32.mrb[99].mxu0  ;;  %3654 = vbcast.lane.b32.xlu0 %v6601_v52, 256 }
 0x1d1   : > { %v4260_v57 = vmax.f32 %v4259_v22, %v3910_v63  ;;  %v1744_v55 = vadd.f32 %v6899_v30, %v4991_v26  ;;  %v7785_v9 = vmax.f32 %v7784_v54, 0.0  ;;  %v3849_v41 = vmul.f32 %v7786_v48, %v2469_v7  ;;  %v6912_v63 = vpop.f32.mrb[96].mxu1 }
 0x1d2   : > { %v4256_v1 = vmax.f32 %v4254_v2, %v4255_v46  ;;  %v4157_v39 = vmax.f32 %v4156_v23, %v3847_v21  ;;  %v6916_v8 = vsel %vm4460_vm1, %v4152_v14, %v6838_v20  ;;  %v2470_v51 = vmax.f32 %v1736_v12, 0.0  ;;  %v6921_v2 = vpop.f32.mrb[97].mxu1  ;;  %v3344_v20 = vpop.permute.xlu1 %3343  ;;  %3627 = vbcast.lane.b32.xlu1 %v6539_v50, 272 }
 0x1d3   : > { %v3912_v36 = vmul.f32 %v3329_v58, %v7785_v9  ;;  %v4261_v60 = vmax.f32 %v4260_v57, %v3911_v62  ;;  %v1747_v38 = vadd.f32 %v6899_v30, %v4992_v28  ;;  %v1739_v22 = vadd.f32 %v6899_v30, %v1738_v11  ;;  %v3340_v49 = vpop.permute.xlu0 %3339  ;;  %v6933_v15 = vpop.f32.mrb[98].mxu1  ;;  %v7791_v9 = vld [vmem:[#allocation75_spill] sm:$0xff] }
 0x1d4   : > { %v6925_v7 = vsel %vm4460_vm1, %v4256_v1, %v6847_v32  ;;  %v4158_v26 = vmax.f32 %v4157_v39, %v3848_v56  ;;  %v7787_v43 = vmax.f32 %v6497_v31, 0.0  ;;  %v2472_v46 = vmax.f32 %v1744_v55, 0.0  ;;  %v4995_v39 = vpop.f32.mrb[100].mxu0  ;;  %v7790_v56 = vld [vmem:[#allocation76_spill] sm:$0xff]  ;;  %3561 = vbcast.lane.b32.xlu0 %v6478_v40, 280 }
 0x1d5   : > { %v4262_v62 = vmax.f32 %v4261_v60, %v3912_v36  ;;  %v2471_v23 = vmax.f32 %v1739_v22, 0.0  ;;  %v7788_v57 = vmax.f32 %v6543_v5, 0.0  ;;  %v7789_v58 = vmax.f32 %v6526_v24, 0.0  ;;  %v1751_v28 = vpop.f32.mrb[101].mxu0 }
 0x1d6   : > { %v3913_v21 = vmul.f32 %v3333_v18, %v7787_v43  ;;  %v4159_v54 = vmax.f32 %v4158_v26, %v3849_v41  ;;  %v6938_v18 = vpop.f32.mrb[99].mxu1  ;;  %v3850_v55 = vmul.f32 %v7790_v56, %v2470_v51  ;;  %v2473_v5 = vmax.f32 %v1747_v38, 0.0  ;;  %v3352_v11 = vpop.permute.xlu1 %3351  ;;  %v7792_v26 = vld [vmem:[#allocation22_spill] sm:$0xff]  ;;  %3693 = vbcast.lane.b32.xlu1 %v6607_v4, 264 }
 0x1d7   : > { %v3915_v12 = vmul.f32 %v3344_v20, %v7788_v57  ;;  %v3914_v14 = vmul.f32 %v3340_v49, %v7789_v58  ;;  %v3851_v36 = vmul.f32 %v7791_v9, %v2471_v23  ;;  %v1752_v41 = vadd.f32 %v6899_v30, %v1751_v28  ;;  %v3348_v22 = vpop.permute.xlu0 %3347  ;;  %v4996_v23 = vpop.f32.mrb[102].mxu0  ;;  %v7796_v28 = vld [vmem:[#allocation77_spill] sm:$0xff] }
 0x1d8   : > { %v4263_v32 = vmax.f32 %v4262_v62, %v3913_v21  ;;  %v4160_v1 = vrot.slane %v4159_v54, 4  ;;  %v6946_v43 = vadd.f32 %v6899_v30, %v7792_v26  ;;  %v7793_v21 = vld [vmem:[#allocation78_spill] sm:$0xff]  ;;  %v1760_v38 = vadd.f32 %v6899_v30, %v4995_v39  ;;  %v1754_v56 = vpop.f32.mrb[103].mxu0  ;;  %v6954_v9 = vpop.f32.mrb[100].mxu1  ;;  %3689 = vbcast.lane.b32.xlu0 %v6607_v4, 256 }
 0x1d9   : > { %v4270_v24 = vmax.f32 %v3914_v14, %v3915_v12  ;;  %v3852_v62 = vmul.f32 %v7793_v21, %v2472_v46  ;;  %v4166_v51 = vmax.f32 %v3850_v55, %v3851_v36  ;;  %v7794_v20 = vmax.f32 %v6510_v6, 0.0  ;;  %7795 = vst [vmem:[#allocation55_spill] sm:$0xff] %v6954_v9  ;;  %v6959_v6 = vpop.f32.mrb[101].mxu1  ;;  %v7798_v36 = vld [vmem:[#allocation80_spill] sm:$0xff] }
 0x1da   : > { %v4264_v48 = vrot.slane %v4263_v32, 4  ;;  %v4161_v57 = vmax.f32 %v4159_v54, %v4160_v1  ;;  %v2474_v58 = vmax.f32 %v1752_v41, 0.0  ;;  %v1763_v14 = vadd.f32 %v6899_v30, %v4996_v23  ;;  %7797 = vst [vmem:[#allocation16_spill] sm:$0xff] %v6959_v6  ;;  %3662 = vbcast.lane.b32.xlu1 %v6601_v52, 272 }
 0x1db   : > { %v3916_v49 = vmul.f32 %v3348_v22, %v7794_v20  ;;  %v3853_v26 = vmul.f32 %v7796_v28, %v2473_v5  ;;  %v4167_v46 = vmax.f32 %v4166_v51, %v3852_v62  ;;  %v1755_v39 = vadd.f32 %v6899_v30, %v1754_v56  ;;  %v3360_v22 = vpop.permute.xlu1 %3359  ;;  %v3356_v21 = vpop.permute.xlu0 %3355 }
 0x1dc   : > { %v4265_v12 = vmax.f32 %v4263_v32, %v4264_v48  ;;  %v4162_v54 = vrot.slane %v4161_v57, 2  ;;  %v3854_v1 = vmul.f32 %v7798_v36, %v2474_v58  ;;  %v7799_v48 = vmax.f32 %v6530_v34, 0.0  ;;  %v6966_v51 = vpop.f32.mrb[102].mxu1  ;;  %v4999_v58 = vpop.f32.mrb[104].mxu0  ;;  %3596 = vbcast.lane.b32.xlu0 %v6482_v59, 280 }
 0x1dd   : > { %v4271_v55 = vmax.f32 %v4270_v24, %v3916_v49  ;;  %v2476_v20 = vmax.f32 %v1760_v38, 0.0  ;;  %v4168_v23 = vmax.f32 %v4167_v46, %v3853_v26  ;;  %v2475_v5 = vmax.f32 %v1755_v39, 0.0  ;;  %7801 = vst [vmem:[#allocation91_spill] sm:$0xff] %v6966_v51  ;;  %v6969_v36 = vpop.f32.mrb[103].mxu1  ;;  %v7805_v46 = vld [vmem:[#allocation24_spill] sm:$0xff] }
 0x1de   : > { %v4266_v32 = vrot.slane %v4265_v12, 2  ;;  %v3917_v41 = vmul.f32 %v3352_v11, %v7799_v48  ;;  %v7800_v24 = vmax.f32 %v6568_v45, 0.0  ;;  %v4163_v49 = vmax.f32 %v4161_v57, %v4162_v54  ;;  %7802 = vst [vmem:[#allocation18_spill] sm:$0xff] %v6969_v36  ;;  %v7803_v11 = vld [vmem:[#allocation79_spill] sm:$0xff]  ;;  %v1767_v45 = vpop.f32.mrb[105].mxu0 }
 0x1df   : > { %v2477_v28 = vmax.f32 %v1763_v14, 0.0  ;;  %v4169_v34 = vmax.f32 %v4168_v23, %v3854_v1  ;;  %v3855_v48 = vmul.f32 %v7803_v11, %v2475_v5  ;;  %v7804_v38 = vmax.f32 %v6583_v29, 0.0  ;;  %v3368_v54 = vpop.permute.xlu1 %3367  ;;  %v7806_v1 = vld [vmem:[#allocation82_spill] sm:$0xff]  ;;  %v5000_v5 = vpop.f32.mrb[106].mxu0 }
 0x1e0   : > { %v3918_v62 = vmul.f32 %v3356_v21, %v7800_v24  ;;  %v4267_v56 = vmax.f32 %v4265_v12, %v4266_v32  ;;  %v4272_v60 = vmax.f32 %v4271_v55, %v3917_v41  ;;  %v6977_v57 = vadd.f32 %v6899_v30, %v7805_v46  ;;  %v3364_v32 = vpop.permute.xlu0 %3363  ;;  %v1770_v51 = vpop.f32.mrb[107].mxu0 }
 0x1e1   : > { %v3919_v26 = vmul.f32 %v3360_v22, %v7804_v38  ;;  %v4164_v12 = vrot.slane %v4163_v49, 1  ;;  %v1768_v39 = vadd.f32 %v6899_v30, %v1767_v45  ;;  %v3856_v41 = vmul.f32 %v7806_v1, %v2476_v20  ;;  %v7808_v38 = vld [vmem:[#allocation81_spill] sm:$0xff] }
 0x1e2   : > { %v4268_v14 = vrot.slane %v4267_v56, 1  ;;  %v4273_v55 = vmax.f32 %v4272_v60, %v3918_v62  ;;  %v4170_v21 = vmax.f32 %v4169_v34, %v3855_v48  ;;  %v1776_v29 = vadd.f32 %v6899_v30, %v4999_v58  ;;  %v7809_v60 = vld [vmem:[#allocation37_spill] sm:$0xff]  ;;  %v6986_v62 = vpop.f32.mrb[104].mxu1 }
 0x1e3   : > { %v7807_v22 = vmax.f32 %v6558_v27, 0.0  ;;  %v4165_v24 = vmax.f32 %v4163_v49, %v4164_v12  ;;  %v3857_v46 = vmul.f32 %v7808_v38, %v2477_v28  ;;  %3728 = vbcast.lane.b32.xlu1 %v7809_v60, 264  ;;  %v2478_v61 = vmax.f32 %v1768_v39, 0.0  ;;  %3724 = vbcast.lane.b32.xlu0 %v7809_v60, 256  ;;  %v6991_v27 = vpop.f32.mrb[105].mxu1  ;;  %v7810_v28 = vld [vmem:[#allocation35_spill] sm:$0xff]  ;;  %v3379_v12 = vpop.permute.xlu1 %3378 }
 0x1e4   : > { %v4269_v11 = vmax.f32 %v4267_v56, %v4268_v14  ;;  %v4274_v31 = vmax.f32 %v4273_v55, %v3919_v26  ;;  %v4171_v45 = vmax.f32 %v4170_v21, %v3856_v41  ;;  %v1779_v20 = vadd.f32 %v6899_v30, %v5000_v5  ;;  %v3375_v14 = vpop.permute.xlu0 %3374  ;;  %v7005_v41 = vpop.f32.mrb[106].mxu1  ;;  %v7817_v38 = vld [vmem:[#allocation11_spill] sm:$0xff] }
 0x1e5   : > { %v3920_v23 = vmul.f32 %v3364_v32, %v7807_v22  ;;  %v1771_v58 = vadd.f32 %v6899_v30, %v1770_v51  ;;  %v6995_v49 = vsel %vm4462_vm2, %v4165_v24, %v6916_v8  ;;  %v7811_v34 = vmax.f32 %v7810_v28, 0.0  ;;  %7813 = vst [vmem:[#allocation20_spill] sm:$0xff] %v7005_v41 }
 0x1e6   : > { %v6999_v56 = vsel %vm4462_vm2, %v4269_v11, %v6925_v7  ;;  %v4172_v55 = vmax.f32 %v4171_v45, %v3857_v46  ;;  %v2480_v51 = vmax.f32 %v1776_v29, 0.0  ;;  %v7812_v32 = vmax.f32 %v6639_v0, 0.0  ;;  %v5003_v7 = vpop.f32.mrb[108].mxu0  ;;  %v7015_v29 = vpop.f32.mrb[107].mxu1  ;;  %v7816_v0 = vld [vmem:[#allocation10_spill] sm:$0xff] }
 0x1e7   : > { %v3921_v48 = vmul.f32 %v3368_v54, %v7811_v34  ;;  %v4275_v26 = vmax.f32 %v4274_v31, %v3920_v23  ;;  %v2479_v39 = vmax.f32 %v1771_v58, 0.0  ;;  %v7814_v21 = vmax.f32 %v6621_v10, 0.0  ;;  %3631 = vbcast.lane.b32.xlu1 %v6539_v50, 280  ;;  %v7815_v31 = vld [vmem:[#allocation6_spill] sm:$0xff]  ;;  %3565 = vbcast.lane.b32.xlu0 %v6478_v40, 288  ;;  %v1783_v10 = vpop.f32.mrb[109].mxu0  ;;  %v3387_v34 = vpop.permute.xlu1 %3386 }
 0x1e8   : > { %v3923_v1 = vmul.f32 %v3379_v12, %v7812_v32  ;;  %v7013_v23 = vadd.f32 %v6899_v30, %v7815_v31  ;;  %v4173_v5 = vrot.slane %v4172_v55, 4  ;;  %v3858_v24 = vmul.f32 %v7816_v0, %v2478_v61  ;;  %v7819_v0 = vld [vmem:[#allocation38_spill] sm:$0xff] }
 0x1e9   : > { %v4276_v8 = vmax.f32 %v4275_v26, %v3921_v48  ;;  %v3922_v22 = vmul.f32 %v3375_v14, %v7814_v21  ;;  %v2481_v11 = vmax.f32 %v1779_v20, 0.0  ;;  %v3859_v46 = vmul.f32 %v7817_v38, %v2479_v39  ;;  %v3383_v48 = vpop.permute.xlu0 %3382  ;;  %v7818_v14 = vld [vmem:[#allocation12_spill] sm:$0xff]  ;;  %v5004_v20 = vpop.f32.mrb[110].mxu0 }
 0x1ea   : > { %v1784_v28 = vadd.f32 %v6899_v30, %v1783_v10  ;;  %v4174_v12 = vmax.f32 %v4172_v55, %v4173_v5  ;;  %v3860_v32 = vmul.f32 %v7818_v14, %v2480_v51  ;;  %v1792_v61 = vadd.f32 %v6899_v30, %v5003_v7  ;;  %v7028_v10 = vpop.f32.mrb[108].mxu1  ;;  %v7822_v55 = vld [vmem:[#allocation13_spill] sm:$0xff] }
 0x1eb   : > { %v4277_v45 = vrot.slane %v4276_v8, 4  ;;  %v4283_v58 = vmax.f32 %v3922_v22, %v3923_v1  ;;  %v4179_v21 = vmax.f32 %v3858_v24, %v3859_v46  ;;  %v7820_v38 = vmax.f32 %v7819_v0, 0.0  ;;  %v1786_v22 = vpop.f32.mrb[111].mxu0  ;;  %3600 = vbcast.lane.b32.xlu1 %v6482_v59, 288  ;;  %7821 = vst [vmem:[#allocation58_spill] sm:$0xff] %v7028_v10  ;;  %3697 = vbcast.lane.b32.xlu0 %v6607_v4, 272  ;;  %v3395_v0 = vpop.permute.xlu1 %3394 }
 0x1ec   : > { %v2482_v39 = vmax.f32 %v1784_v28, 0.0  ;;  %v1795_v1 = vadd.f32 %v6899_v30, %v5004_v20  ;;  %v4175_v26 = vrot.slane %v4174_v12, 2  ;;  %v3861_v5 = vmul.f32 %v7822_v55, %v2481_v11  ;;  %v7824_v46 = vld [vmem:[#allocation17_spill] sm:$0xff]  ;;  %v7825_v28 = vld [vmem:[#allocation42_spill] sm:$0xff]  ;;  %v7828_v55 = vld [vmem:[#allocation88_spill] sm:$0xff] }
 0x1ed   : > { %v4278_v31 = vmax.f32 %v4276_v8, %v4277_v45  ;;  %v3924_v54 = vmul.f32 %v3383_v48, %v7820_v38  ;;  %v4180_v51 = vmax.f32 %v4179_v21, %v3860_v32  ;;  %v1787_v24 = vadd.f32 %v6899_v30, %v1786_v22  ;;  %v7033_v8 = vpop.f32.mrb[109].mxu1  ;;  %v3391_v38 = vpop.permute.xlu0 %3390 }
 0x1ee   : > { %7823 = vst [vmem:[#allocation57_spill] sm:$0xff] %v7033_v8  ;;  %v3862_v45 = vmul.f32 %v7824_v46, %v2482_v39  ;;  %v7826_v48 = vmax.f32 %v7825_v28, 0.0  ;;  %v4176_v10 = vmax.f32 %v4174_v12, %v4175_v26  ;;  %v2484_v19 = vmax.f32 %v1792_v61, 0.0  ;;  %v7038_v32 = vpop.f32.mrb[110].mxu1  ;;  %v5007_v39 = vpop.f32.mrb[112].mxu0  ;;  %v7832_v61 = vld [vmem:[#allocation100_spill] sm:$0xff] }
 0x1ef   : > { %v4279_v7 = vrot.slane %v4278_v31, 2  ;;  %v4284_v20 = vmax.f32 %v4283_v58, %v3924_v54  ;;  %v4181_v9 = vmax.f32 %v4180_v51, %v3861_v5  ;;  %v2483_v11 = vmax.f32 %v1787_v24, 0.0  ;;  %7827 = vst [vmem:[#allocation62_spill] sm:$0xff] %v7038_v32  ;;  %3732 = vbcast.lane.b32.xlu1 %v7809_v60, 272  ;;  %v7043_v46 = vpop.f32.mrb[111].mxu1  ;;  %3666 = vbcast.lane.b32.xlu0 %v6601_v52, 280  ;;  %v3403_v28 = vpop.permute.xlu1 %3402 }
 0x1f0   : > { %v3925_v14 = vmul.f32 %v3387_v34, %v7826_v48  ;;  %v2485_v22 = vmax.f32 %v1795_v1, 0.0  ;;  %v7829_v53 = vmax.f32 %v7828_v55, 0.0  ;;  %7830 = vst [vmem:[#allocation19_spill] sm:$0xff] %v7043_v46  ;;  %v4177_v54 = vrot.slane %v4176_v10, 1  ;;  %v7831_v34 = vld [vmem:[#allocation14_spill] sm:$0xff]  ;;  %v1799_v12 = vpop.f32.mrb[113].mxu0 }
 0x1f1   : > { %v4280_v21 = vmax.f32 %v4278_v31, %v4279_v7  ;;  %v4182_v58 = vmax.f32 %v4181_v9, %v3862_v45  ;;  %v3863_v26 = vmul.f32 %v7831_v34, %v2483_v11  ;;  %v7049_v31 = vadd.f32 %v6899_v30, %v7832_v61  ;;  %v7833_v5 = vld [vmem:[#allocation39_spill] sm:$0xff]  ;;  %v3399_v48 = vpop.permute.xlu0 %3398  ;;  %v7835_v9 = vld [vmem:[#allocation89_spill] sm:$0xff]  ;;  %v5008_v11 = vpop.f32.mrb[114].mxu0  ;;  %v7836_v34 = vld [vmem:[#allocation52_spill] sm:$0xff] }
 0x1f2   : > { %v3926_v36 = vmul.f32 %v3391_v38, %v7829_v53  ;;  %v4285_v8 = vmax.f32 %v4284_v20, %v3925_v14  ;;  %v7834_v53 = vmax.f32 %v7833_v5, 0.0  ;;  %v1800_v7 = vadd.f32 %v6899_v30, %v1799_v12  ;;  %v7837_v32 = vld [vmem:[#allocation41_spill] sm:$0xff] }
 0x1f3   : > { %v4281_v1 = vrot.slane %v4280_v21, 1  ;;  %v4178_v14 = vmax.f32 %v4176_v10, %v4177_v54  ;;  %v3864_v45 = vmul.f32 %v7835_v9, %v2484_v19  ;;  %v4183_v20 = vmax.f32 %v4182_v58, %v3863_v26  ;;  %3635 = vbcast.lane.b32.xlu1 %v6539_v50, 288  ;;  %3569 = vbcast.lane.b32.xlu0 %v6478_v40, 296 }
 0x1f4   : > { %v3927_v51 = vmul.f32 %v3395_v0, %v7834_v53  ;;  %v4286_v24 = vmax.f32 %v4285_v8, %v3926_v36  ;;  %v1808_v38 = vadd.f32 %v6899_v30, %v5007_v39  ;;  %v3865_v61 = vmul.f32 %v7836_v34, %v2485_v22  ;;  %v1802_v0 = vpop.f32.mrb[115].mxu0  ;;  %v7060_v36 = vpop.f32.mrb[112].mxu1  ;;  %v7839_v8 = vld [vmem:[#allocation40_spill] sm:$0xff] }
 0x1f5   : > { %v4282_v55 = vmax.f32 %v4280_v21, %v4281_v1  ;;  %v7838_v46 = vmax.f32 %v7837_v32, 0.0  ;;  %v7064_v10 = vsel %vm4464_vm3, %v4178_v14, %v6995_v49  ;;  %v4184_v19 = vmax.f32 %v4183_v20, %v3864_v45  ;;  %v7070_v32 = vpop.f32.mrb[113].mxu1  ;;  %v3414_v49 = vpop.permute.xlu1 %3413 }
 0x1f6   : > { %v4287_v5 = vmax.f32 %v4286_v24, %v3927_v51  ;;  %v7840_v39 = vmax.f32 %v7839_v8, 0.0  ;;  %v1811_v21 = vadd.f32 %v6899_v30, %v5008_v11  ;;  %v1803_v26 = vadd.f32 %v6899_v30, %v1802_v0  ;;  %v3410_v12 = vpop.permute.xlu0 %3409  ;;  %v7081_v9 = vpop.f32.mrb[114].mxu1 }
 0x1f7   : > { %v3928_v3 = vmul.f32 %v3399_v48, %v7838_v46  ;;  %v7074_v22 = vsel %vm4464_vm3, %v4282_v55, %v6999_v56  ;;  %v2486_v46 = vmax.f32 %v1800_v7, 0.0  ;;  %v4185_v1 = vmax.f32 %v4184_v19, %v3865_v61  ;;  %7844 = vst [vmem:[#allocation61_spill] sm:$0xff] %v7081_v9  ;;  %3604 = vbcast.lane.b32.xlu1 %v6482_v59, 296  ;;  %v5011_v56 = vpop.f32.mrb[116].mxu0  ;;  %v7847_v19 = vld [vmem:[#allocation96_spill] sm:$0xff] }
 0x1f8   : > { %v3929_v54 = vmul.f32 %v3403_v28, %v7840_v39  ;;  %v2488_v53 = vmax.f32 %v1808_v38, 0.0  ;;  %v7841_v51 = vmax.f32 %v6761_v44, 0.0  ;;  %v7842_v28 = vld [vmem:[#allocation87_spill] sm:$0xff]  ;;  %v2487_v20 = vmax.f32 %v1803_v26, 0.0  ;;  %v7089_v38 = vpop.f32.mrb[115].mxu1  ;;  %3701 = vbcast.lane.b32.xlu0 %v6607_v4, 280 }
 0x1f9   : > { %v4288_v58 = vmax.f32 %v4287_v5, %v3928_v3  ;;  %v7843_v48 = vmax.f32 %v7842_v28, 0.0  ;;  %v7845_v3 = vld [vmem:[#allocation99_spill] sm:$0xff]  ;;  %v4186_v44 = vrot.slane %v4185_v1, 4  ;;  %v2489_v55 = vmax.f32 %v1811_v21, 0.0  ;;  %v1815_v61 = vpop.f32.mrb[117].mxu0  ;;  %v7849_v28 = vld [vmem:[#allocation21_spill] sm:$0xff] }
 0x1fa   : > { %v3931_v24 = vmul.f32 %v3414_v49, %v7841_v51  ;;  %v7086_v7 = vadd.f32 %v6899_v30, %v7845_v3  ;;  %v7846_v5 = vld [vmem:[#allocation31_spill] sm:$0xff]  ;;  %v3866_v8 = vmul.f32 %v7847_v19, %v2486_v46  ;;  %v1816_v26 = vadd.f32 %v6899_v30, %v1815_v61  ;;  %v3422_v49 = vpop.permute.xlu1 %3421  ;;  %v5012_v11 = vpop.f32.mrb[118].mxu0 }
 0x1fb   : > { %v3930_v14 = vmul.f32 %v3410_v12, %v7843_v48  ;;  %v4289_v45 = vmax.f32 %v4288_v58, %v3929_v54  ;;  %v7094_v0 = vadd.f32 %v6899_v30, %v7846_v5  ;;  %v7848_v54 = vld [vmem:[#allocation95_spill] sm:$0xff]  ;;  %v3418_v12 = vpop.permute.xlu0 %3417  ;;  %v4187_v51 = vmax.f32 %v4185_v1, %v4186_v44  ;;  %v7850_v48 = vld [vmem:[#allocation49_spill] sm:$0xff]  ;;  %v1818_v19 = vpop.f32.mrb[119].mxu0  ;;  %3736 = vbcast.lane.b32.xlu1 %v7809_v60, 280 }
 0x1fc   : > { %v3867_v58 = vmul.f32 %v7848_v54, %v2487_v20  ;;  %v3868_v21 = vmul.f32 %v7849_v28, %v2488_v53  ;;  %v2490_v16 = vmax.f32 %v1816_v26, 0.0  ;;  %v1827_v46 = vadd.f32 %v6899_v30, %v5012_v11  ;;  %v7105_v20 = vpop.f32.mrb[116].mxu1  ;;  %v7853_v1 = vld [vmem:[#allocation9_spill] sm:$0xff]  ;;  %3670 = vbcast.lane.b32.xlu0 %v6601_v52, 288  ;;  %v7856_v11 = vld [vmem:[#allocation51_spill] sm:$0xff] }
 0x1fd   : > { %v4296_v34 = vmax.f32 %v3930_v14, %v3931_v24  ;;  %v4290_v39 = vrot.slane %v4289_v45, 4  ;;  %v1824_v24 = vadd.f32 %v6899_v30, %v5011_v56  ;;  %v7851_v14 = vmax.f32 %v7850_v48, 0.0  ;;  %7852 = vst [vmem:[#allocation64_spill] sm:$0xff] %v7105_v20  ;;  %v7110_v54 = vpop.f32.mrb[117].mxu1 }
 0x1fe   : > { %v4192_v9 = vmax.f32 %v3866_v8, %v3867_v58  ;;  %v4188_v61 = vrot.slane %v4187_v51, 2  ;;  %v3869_v44 = vmul.f32 %v7853_v1, %v2489_v55  ;;  %v1819_v56 = vadd.f32 %v6899_v30, %v1818_v19  ;;  %7854 = vst [vmem:[#allocation63_spill] sm:$0xff] %v7110_v54  ;;  %v3430_v28 = vpop.permute.xlu1 %3429 }
 0x1ff   : > { %v3932_v3 = vmul.f32 %v3418_v12, %v7851_v14  ;;  %v4291_v5 = vmax.f32 %v4289_v45, %v4290_v39  ;;  %v7855_v39 = vld [vmem:[#allocation60_spill] sm:$0xff]  ;;  %v7857_v26 = vmax.f32 %v7856_v11, 0.0  ;;  %v3426_v48 = vpop.permute.xlu0 %3425  ;;  %v2492_v20 = vmax.f32 %v1824_v24, 0.0  ;;  %3639 = vbcast.lane.b32.xlu1 %v6539_v50, 296 }
 0x200   : > { %v4193_v8 = vmax.f32 %v4192_v9, %v3868_v21  ;;  %v3870_v58 = vmul.f32 %v7855_v39, %v2490_v16  ;;  %v4189_v14 = vmax.f32 %v4187_v51, %v4188_v61  ;;  %v2491_v6 = vmax.f32 %v1819_v56, 0.0  ;;  %v5015_v16 = vpop.f32.mrb[120].mxu0  ;;  %v7860_v21 = vld [vmem:[#allocation59_spill] sm:$0xff]  ;;  %3573 = vbcast.lane.b32.xlu0 %v6478_v40, 304  ;;  %v7862_v61 = vld [vmem:[#allocation30_spill] sm:$0xff] }
 0x201   : > { %v4297_v53 = vmax.f32 %v4296_v34, %v3932_v3  ;;  %v4292_v45 = vrot.slane %v4291_v5, 2  ;;  %v3933_v12 = vmul.f32 %v3422_v49, %v7857_v26  ;;  %v7858_v55 = vmax.f32 %v6860_v47, 0.0  ;;  %v7117_v3 = vpop.f32.mrb[118].mxu1  ;;  %v1831_v47 = vpop.f32.mrb[121].mxu0  ;;  %v7863_v26 = vld [vmem:[#allocation5_spill] sm:$0xff] }
 0x202   : > { %7859 = vst [vmem:[#allocation66_spill] sm:$0xff] %v7117_v3  ;;  %v4194_v1 = vmax.f32 %v4193_v8, %v3869_v44  ;;  %v2493_v54 = vmax.f32 %v1827_v46, 0.0  ;;  %v7120_v9 = vpop.f32.mrb[119].mxu1  ;;  %v4190_v49 = vrot.slane %v4189_v14, 1  ;;  %v3871_v39 = vmul.f32 %v7860_v21, %v2491_v6  ;;  %v7865_v21 = vld [vmem:[#allocation25_spill] sm:$0xff] }
 0x203   : > { %v3934_v34 = vmul.f32 %v3426_v48, %v7858_v55  ;;  %v4293_v19 = vmax.f32 %v4291_v5, %v4292_v45  ;;  %v4298_v41 = vmax.f32 %v4297_v53, %v3933_v12  ;;  %v7861_v51 = vmax.f32 %v6946_v43, 0.0  ;;  %v3438_v45 = vpop.permute.xlu1 %3437  ;;  %v3434_v8 = vpop.permute.xlu0 %3433  ;;  %3608 = vbcast.lane.b32.xlu1 %v6482_v59, 304 }
 0x204   : > { %v7128_v5 = vadd.f32 %v6899_v30, %v7862_v61  ;;  %v4195_v44 = vmax.f32 %v4194_v1, %v3870_v58  ;;  %v1832_v56 = vadd.f32 %v6899_v30, %v1831_v47  ;;  %v4191_v11 = vmax.f32 %v4189_v14, %v4190_v49  ;;  %v5016_v48 = vpop.f32.mrb[122].mxu0  ;;  %3705 = vbcast.lane.b32.xlu0 %v6607_v4, 288 }
 0x205   : > { %v3935_v24 = vmul.f32 %v3430_v28, %v7861_v51  ;;  %v4294_v46 = vrot.slane %v4293_v19, 1  ;;  %v4299_v53 = vmax.f32 %v4298_v41, %v3934_v34  ;;  %v3872_v6 = vmul.f32 %v7863_v26, %v2492_v20  ;;  %v1834_v58 = vpop.f32.mrb[123].mxu0  ;;  %v7137_v41 = vpop.f32.mrb[120].mxu1 }
 0x206   : > { %v1840_v43 = vadd.f32 %v6899_v30, %v5015_v16  ;;  %v7864_v12 = vmax.f32 %v6789_v42, 0.0  ;;  %v3873_v51 = vmul.f32 %v7865_v21, %v2493_v54  ;;  %v4196_v61 = vmax.f32 %v4195_v44, %v3871_v39 }
 0x207   : > { %v4295_v55 = vmax.f32 %v4293_v19, %v4294_v46  ;;  %v4300_v3 = vmax.f32 %v4299_v53, %v3935_v24  ;;  %v7141_v14 = vsel %vm4466_vm4, %v4191_v11, %v7064_v10  ;;  %v2494_v20 = vmax.f32 %v1832_v56, 0.0  ;;  %v7146_v19 = vpop.f32.mrb[121].mxu1  ;;  %v3449_v10 = vpop.permute.xlu1 %3448  ;;  %3740 = vbcast.lane.b32.xlu1 %v7809_v60, 288 }
 0x208   : > { %v3936_v28 = vmul.f32 %v3434_v8, %v7864_v12  ;;  %v1843_v34 = vadd.f32 %v6899_v30, %v5016_v48  ;;  %v1835_v42 = vadd.f32 %v6899_v30, %v1834_v58  ;;  %v4197_v1 = vmax.f32 %v4196_v61, %v3872_v6  ;;  %v3445_v24 = vpop.permute.xlu0 %3444  ;;  %v7158_v11 = vpop.f32.mrb[122].mxu1  ;;  %3674 = vbcast.lane.b32.xlu0 %v6601_v52, 296 }
 0x209   : > { %v7150_v54 = vsel %vm4466_vm4, %v4295_v55, %v7074_v22  ;;  %v7866_v16 = vmax.f32 %v6903_v33, 0.0  ;;  %v2496_v47 = vmax.f32 %v1840_v43, 0.0  ;;  %v7867_v44 = vmax.f32 %v7049_v31, 0.0  ;;  %v7869_v31 = vld [vmem:[#allocation26_spill] sm:$0xff] }
 0x20a   : > { %v4301_v39 = vmax.f32 %v4300_v3, %v3936_v28  ;;  %v2495_v46 = vmax.f32 %v1835_v42, 0.0  ;;  %v7868_v56 = vmax.f32 %v6977_v57, 0.0  ;;  %v7160_v26 = vmax.f32 %v4197_v1, %v3873_v51  ;;  %v5019_v3 = vpop.f32.mrb[124].mxu0  ;;  %v7870_v28 = vld [vmem:[#allocation27_spill] sm:$0xff]  ;;  %v7871_v42 = vld [vmem:[#allocation28_spill] sm:$0xff] }
 0x20b   : > { %v3937_v49 = vmul.f32 %v3438_v45, %v7866_v16  ;;  %v3939_v53 = vmul.f32 %v3449_v10, %v7867_v44  ;;  %v2560_v22 = vmax.f32 %v7013_v23, 0.0  ;;  %v2497_v33 = vmax.f32 %v1843_v34, 0.0  ;;  %v7164_v45 = vpop.f32.mrb[123].mxu1  ;;  %v1847_v55 = vpop.f32.mrb[125].mxu0  ;;  %v7872_v10 = vld [vmem:[#allocation29_spill] sm:$0xff]  ;;  %3643 = vbcast.lane.b32.xlu1 %v6539_v50, 304 }
 0x20c   : > { %v3938_v8 = vmul.f32 %v3445_v24, %v7868_v56  ;;  %v2561_v43 = vmax.f32 %v7086_v7, 0.0  ;;  %v3874_v12 = vmul.f32 %v7869_v31, %v2494_v20  ;;  %v3875_v57 = vmul.f32 %v7870_v28, %v2495_v46  ;;  %v3457_v58 = vpop.permute.xlu1 %3456  ;;  %v3453_v34 = vpop.permute.xlu0 %3452  ;;  %v7873_v46 = vld [vmem:[#allocation103_spill] sm:$0xff]  ;;  %3577 = vbcast.lane.b32.xlu0 %v6478_v40, 312 }
 0x20d   : > { %v4302_v6 = vmax.f32 %v4301_v39, %v3937_v49  ;;  %v2564_v23 = vmax.f32 %v7094_v0, 0.0  ;;  %v2562_v51 = vmax.f32 %v7128_v5, 0.0  ;;  %v1848_v61 = vadd.f32 %v6899_v30, %v1847_v55  ;;  %v5020_v49 = vpop.f32.mrb[126].mxu0  ;;  %v7179_v5 = vpop.f32.mrb[124].mxu1 }
 0x20e   : > { %v4309_v48 = vmax.f32 %v3938_v8, %v3939_v53  ;;  %v3876_v1 = vmul.f32 %v7871_v42, %v2496_v47  ;;  %v4205_v7 = vmax.f32 %v3874_v12, %v3875_v57  ;;  %v1856_v20 = vadd.f32 %v6899_v30, %v5019_v3  ;;  %v1850_v53 = vpop.f32.mrb[127].mxu0  ;;  %v7875_v12 = vld [vmem:[#allocation101_spill] sm:$0xff] }
 0x20f   : > { %v4303_v21 = vrot.slane %v4302_v6, 4  ;;  %v3940_v16 = vmul.f32 %v3453_v34, %v2560_v22  ;;  %v3877_v24 = vmul.f32 %v7872_v10, %v2497_v33  ;;  %v2107_v44 = vadd.f32 %v6899_v30, %v7873_v46  ;;  %v7184_v22 = vpop.f32.mrb[125].mxu1  ;;  %v7874_v33 = vld [vmem:[#allocation102_spill] sm:$0xff]  ;;  %3612 = vbcast.lane.b32.xlu1 %v6482_v59, 312 }
 0x210   : > { %v2498_v0 = vmax.f32 %v1848_v61, 0.0  ;;  %v4206_v56 = vmax.f32 %v4205_v7, %v3876_v1  ;;  %v1859_v47 = vadd.f32 %v6899_v30, %v5020_v49  ;;  %v1851_v3 = vadd.f32 %v6899_v30, %v1850_v53  ;;  %v3465_v55 = vpop.permute.xlu1 %3464  ;;  %v7189_v1 = vpop.f32.mrb[126].mxu1  ;;  %v7876_v49 = vld [vmem:[#allocation105_spill] sm:$0xff]  ;;  %3709 = vbcast.lane.b32.xlu0 %v6607_v4, 296 }
 0x211   : > { %v4304_v39 = vmax.f32 %v4302_v6, %v4303_v21  ;;  %v4310_v8 = vmax.f32 %v4309_v48, %v3940_v16  ;;  %v2115_v31 = vadd.f32 %v6899_v30, %v7874_v33  ;;  %v3941_v57 = vmul.f32 %v3457_v58, %v2561_v43  ;;  %v3461_v21 = vpop.permute.xlu0 %3460  ;;  %v7194_v46 = vpop.f32.mrb[127].mxu1  ;;  %v7877_v58 = vld [vmem:[#allocation33_spill] sm:$0xff] }
 0x212   : > { %v3878_v28 = vmul.f32 %v7875_v12, %v2498_v0  ;;  %v2500_v61 = vmax.f32 %v1856_v20, 0.0  ;;  %v4207_v34 = vmax.f32 %v4206_v56, %v3877_v24  ;;  %v2499_v48 = vmax.f32 %v1851_v3, 0.0  ;;  %v7878_v20 = vld [vmem:[#allocation109_spill] sm:$0xff] }
 0x213   : > { %v4305_v6 = vrot.slane %v4304_v39, 2  ;;  %v3942_v42 = vmul.f32 %v3461_v21, %v2562_v51  ;;  %v2563_v16 = vmax.f32 %v2107_v44, 0.0  ;;  %v4311_v40 = vmax.f32 %v4310_v8, %v3941_v57  ;;  %3744 = vbcast.lane.b32.xlu1 %v7809_v60, 296 }
 0x214   : > { %v2120_v10 = vadd.f32 %v6899_v30, %v7876_v49  ;;  %v4208_v0 = vmax.f32 %v4207_v34, %v3878_v28  ;;  %v2501_v43 = vmax.f32 %v1859_v47, 0.0  ;;  %v3879_v53 = vmul.f32 %v7877_v58, %v2499_v48  ;;  %v3473_v56 = vpop.permute.xlu1 %3472  ;;  %v7880_v28 = vld [vmem:[#allocation34_spill] sm:$0xff]  ;;  %v7881_v48 = vld [vmem:[#allocation32_spill] sm:$0xff]  ;;  %3678 = vbcast.lane.b32.xlu0 %v6601_v52, 304 }
 0x215   : > { %v4306_v7 = vmax.f32 %v4304_v39, %v4305_v6  ;;  %v2123_v51 = vadd.f32 %v6899_v30, %v7878_v20  ;;  %v3943_v39 = vmul.f32 %v3465_v55, %v2563_v16  ;;  %v4312_v44 = vmax.f32 %v4311_v40, %v3942_v42  ;;  %v3469_v8 = vpop.permute.xlu0 %3468  ;;  %v7879_v6 = vld [vmem:[#allocation104_spill] sm:$0xff] }
 0x216   : > { %v2565_v3 = vmax.f32 %v2115_v31, 0.0  ;;  %v3880_v33 = vmul.f32 %v7879_v6, %v2500_v61  ;;  %v4209_v59 = vmax.f32 %v4208_v0, %v3879_v53  ;;  %v3944_v12 = vmul.f32 %v3469_v8, %v2564_v23  ;;  %v7882_v55 = vld [vmem:[#allocation108_spill] sm:$0xff] }
 0x217   : > { %v4307_v24 = vrot.slane %v4306_v7, 1  ;;  %v2128_v47 = vadd.f32 %v6899_v30, %v7880_v28  ;;  %v2566_v21 = vmax.f32 %v2120_v10, 0.0  ;;  %v4313_v34 = vmax.f32 %v4312_v44, %v3943_v39  ;;  %3713 = vbcast.lane.b32.xlu1 %v6607_v4, 304 }
 0x218   : > { %v3881_v49 = vmul.f32 %v7881_v48, %v2501_v43  ;;  %v4210_v58 = vmax.f32 %v4209_v59, %v3880_v33  ;;  %v2131_v42 = vadd.f32 %v6899_v30, %v7882_v55  ;;  %v2567_v16 = vmax.f32 %v2123_v51, 0.0  ;;  %v7883_v51 = vld [vmem:[#allocation85_spill] sm:$0xff]  ;;  %3647 = vbcast.lane.b32.xlu0 %v6539_v50, 312  ;;  %v7887_v55 = vld [vmem:[#allocation83_spill] sm:$0xff] }
 0x219   : > { %v4308_v57 = vmax.f32 %v4306_v7, %v4307_v24  ;;  %v3945_v31 = vmul.f32 %v3473_v56, %v2565_v3  ;;  %v4314_v61 = vmax.f32 %v4313_v34, %v3944_v12  ;;  %v3484_v7 = vpop.permute.xlu1 %3483  ;;  %v3480_v40 = vpop.permute.xlu0 %3479  ;;  %v2568_v20 = vmax.f32 %v2128_v47, 0.0  ;;  %v7885_v12 = vld [vmem:[#allocation107_spill] sm:$0xff] }
 0x21a   : > { %v4211_v10 = vmax.f32 %v4210_v58, %v3881_v49  ;;  %v3947_v0 = vmul.f32 %v3484_v7, %v2567_v16  ;;  %v3946_v53 = vmul.f32 %v3480_v40, %v2566_v21  ;;  %v2569_v24 = vmax.f32 %v2131_v42, 0.0  ;;  %v7886_v21 = vld [vmem:[#allocation44_spill] sm:$0xff] }
 0x21b   : > { %v7210_v23 = vsel %vm4468_vm5, %v4308_v57, %v7150_v54  ;;  %v4315_v43 = vmax.f32 %v4314_v61, %v3945_v31  ;;  %v2136_v44 = vadd.f32 %v6899_v30, %v7883_v51  ;;  %v7884_v54 = vld [vmem:[#allocation36_spill] sm:$0xff]  ;;  %v4108_v57 = vrot.slane %v7885_v12, 4  ;;  %3748 = vbcast.lane.b32.xlu1 %v7809_v60, 304 }
 0x21c   : > { %v4322_v39 = vmax.f32 %v3946_v53, %v3947_v0  ;;  %v2139_v56 = vadd.f32 %v6899_v30, %v7884_v54  ;;  %v2147_v34 = vadd.f32 %v6899_v30, %v7886_v21  ;;  %3682 = vbcast.lane.b32.xlu0 %v6601_v52, 312  ;;  %v4199_v49 = vrot.slane %v7160_v26, 4 }
 0x21d   : > { %v4316_v8 = vrot.slane %v4315_v43, 4  ;;  %v3492_v3 = vpop.permute.xlu1 %3491  ;;  %v3488_v6 = vpop.permute.xlu0 %3487  ;;  %v2570_v47 = vmax.f32 %v2136_v44, 0.0  ;;  %v2144_v42 = vadd.f32 %v6899_v30, %v7887_v55  ;;  %v4212_v61 = vrot.slane %v4211_v10, 4 }
 0x21e   : > { %v3949_v33 = vmul.f32 %v3492_v3, %v2569_v24  ;;  %v3948_v59 = vmul.f32 %v3488_v6, %v2568_v20  ;;  %v2571_v48 = vmax.f32 %v2139_v56, 0.0  ;;  %v4109_v20 = vmax.f32 %v7885_v12, %v4108_v57  ;;  %v7888_v24 = vld [vmem:[#allocation84_spill] sm:$0xff]  ;;  %v7889_v56 = vld [vmem:[#allocation46_spill] sm:$0xff] }
 0x21f   : > { %v4317_v28 = vmax.f32 %v4315_v43, %v4316_v8  ;;  %3752 = vbcast.lane.b32.xlu1 %v7809_v60, 312  ;;  %v2573_v52 = vmax.f32 %v2147_v34, 0.0  ;;  %v4200_v51 = vmax.f32 %v7160_v26, %v4199_v49  ;;  %v2572_v54 = vmax.f32 %v2144_v42, 0.0  ;;  %v7891_v26 = vld [vmem:[#allocation45_spill] sm:$0xff] }
 0x220   : > { %v4323_v50 = vmax.f32 %v4322_v39, %v3948_v59  ;;  %3717 = vbcast.lane.b32.xlu0 %v6607_v4, 312  ;;  %v2155_v39 = vadd.f32 %v6899_v30, %v7888_v24  ;;  %v2152_v8 = vadd.f32 %v6899_v30, %v7889_v56  ;;  %v4213_v6 = vmax.f32 %v4211_v10, %v4212_v61 }
 0x221   : > { %v4318_v58 = vrot.slane %v4317_v28, 2  ;;  %v3500_v16 = vpop.permute.xlu1 %3499  ;;  %v3496_v31 = vpop.permute.xlu0 %3495  ;;  %v4110_v57 = vrot.slane %v4109_v20, 2  ;;  %v2163_v21 = vadd.f32 %v6899_v30, %v7891_v26 }
 0x222   : > { %v3951_v7 = vmul.f32 %v3500_v16, %v2571_v48  ;;  %v3950_v40 = vmul.f32 %v3496_v31, %v2570_v47  ;;  %v4324_v0 = vmax.f32 %v4323_v50, %v3949_v33  ;;  %v2575_v34 = vmax.f32 %v2155_v39, 0.0 }
 0x223   : > { %v4319_v53 = vmax.f32 %v4317_v28, %v4318_v58  ;;  %v7890_v28 = vld [vmem:[#allocation43_spill] sm:$0xff]  ;;  %v4201_v48 = vrot.slane %v4200_v51, 2  ;;  %v2574_v50 = vmax.f32 %v2152_v8, 0.0  ;;  %v4214_v55 = vrot.slane %v4213_v6, 2 }
 0x224   : > { %v4325_v43 = vmax.f32 %v4324_v0, %v3950_v40  ;;  %v2160_v47 = vadd.f32 %v6899_v30, %v7890_v28  ;;  %v2577_v40 = vmax.f32 %v2163_v21, 0.0  ;;  %v7892_v0 = vld [vmem:[#allocation93_spill] sm:$0xff] }
 0x225   : > { %v4320_v44 = vrot.slane %v4319_v53, 1  ;;  %v3508_v3 = vpop.permute.xlu1 %3507  ;;  %v3504_v33 = vpop.permute.xlu0 %3503 }
 0x226   : > { %v3953_v60 = vmul.f32 %v3508_v3, %v2573_v52  ;;  %v4326_v59 = vmax.f32 %v4325_v43, %v3951_v7  ;;  %v3952_v4 = vmul.f32 %v3504_v33, %v2572_v54  ;;  %v4111_v7 = vmax.f32 %v4109_v20, %v4110_v57 }
 0x227   : > { %v4321_v12 = vmax.f32 %v4319_v53, %v4320_v44  ;;  %v2171_v53 = vadd.f32 %v6899_v30, %v7892_v0  ;;  %v4202_v52 = vmax.f32 %v4200_v51, %v4201_v48  ;;  %v2576_v43 = vmax.f32 %v2160_v47, 0.0 }
 0x228   : > { %v4327_v49 = vmax.f32 %v4326_v59, %v3952_v4  ;;  %v4215_v54 = vmax.f32 %v4213_v6, %v4214_v55  ;;  %v4112_v33 = vrot.slane %v4111_v7, 1  ;;  %v7894_v59 = vld [vmem:[#allocation47_spill] sm:$0xff] }
 0x229   : > { %v4485_v10 = vsel %vm4470_vm6, %v4321_v12, %v7210_v23  ;;  %v3519_v58 = vpop.permute.xlu1 %3518  ;;  %v3515_v16 = vpop.permute.xlu0 %3514  ;;  %v7893_v23 = vld [vmem:[#allocation48_spill] sm:$0xff]  ;;  %v2579_v20 = vmax.f32 %v2171_v53, 0.0  ;;  %v4203_v12 = vrot.slane %v4202_v52, 1  ;;  %v7895_v4 = vld [vmem:[#allocation7_spill] sm:$0xff] }
 0x22a   : > { %4499 = vst [vmem:[%s7243_s27 + $0x10] sm:$0xff] %v4485_v10  ;;  %v3955_v42 = vmul.f32 %v3519_v58, %v2575_v34  ;;  %v4328_v31 = vmax.f32 %v4327_v49, %v3953_v60  ;;  %v3954_v61 = vmul.f32 %v3515_v16, %v2574_v50  ;;  %v2168_v24 = vadd.f32 %v6899_v30, %v7893_v23  ;;  %v7896_v58 = vld [vmem:[#allocation54_spill] sm:$0xff] }
 0x22b   : > { %v2179_v60 = vadd.f32 %v6899_v30, %v7894_v59  ;;  %v2176_v57 = vadd.f32 %v6899_v30, %v7895_v4  ;;  %v4216_v26 = vrot.slane %v4215_v54, 1  ;;  %v4113_v50 = vmax.f32 %v4111_v7, %v4112_v33 }
 0x22c   : > { %v4335_v39 = vmax.f32 %v3954_v61, %v3955_v42  ;;  %v2578_v51 = vmax.f32 %v2168_v24, 0.0  ;;  %v4329_v48 = vrot.slane %v4328_v31, 4  ;;  %v2187_v55 = vadd.f32 %v6899_v30, %v7896_v58  ;;  %v7897_v61 = vld [vmem:[#allocation50_spill] sm:$0xff] }
 0x22d   : > { %v3527_v44 = vpop.permute.xlu1 %3526  ;;  %v3523_v8 = vpop.permute.xlu0 %3522  ;;  %v2581_v49 = vmax.f32 %v2179_v60, 0.0  ;;  %v4204_v42 = vmax.f32 %v4202_v52, %v4203_v12  ;;  %v2580_v16 = vmax.f32 %v2176_v57, 0.0 }
 0x22e   : > { %v3957_v56 = vmul.f32 %v3527_v44, %v2577_v40  ;;  %v3956_v3 = vmul.f32 %v3523_v8, %v2576_v43  ;;  %v2184_v40 = vadd.f32 %v6899_v30, %v7897_v61  ;;  %v4217_v43 = vmax.f32 %v4215_v54, %v4216_v26  ;;  %v7899_v26 = vld [vmem:[#allocation86_spill] sm:$0xff] }
 0x22f   : > { %v4330_v44 = vmax.f32 %v4328_v31, %v4329_v48  ;;  %v2583_v8 = vmax.f32 %v2187_v55, 0.0 }
 0x230   : > { %v4336_v28 = vmax.f32 %v4335_v39, %v3956_v3  ;;  %v7261_v39 = vld [vmem:[%s7446_s3] ss:$0 sm:$0xff]  ;;  %v7898_v3 = vld [vmem:[#allocation106_spill] sm:$0xff]  ;;  %v2582_v33 = vmax.f32 %v2184_v40, 0.0 }
 0x231   : > { %v3535_v47 = vpop.permute.xlu1 %3534  ;;  %v3531_v34 = vpop.permute.xlu0 %3530  ;;  %v2219_v7 = vadd.f32 %v7261_v39, %v6862_v25  ;;  %v2216_v52 = vadd.f32 %v7261_v39, %v6844_v17  ;;  %v4471_v54 = vsel %vm4470_vm6, %v4113_v50, %v7898_v3  ;;  %v2248_v17 = vadd.f32 %v7261_v39, %v6921_v2 }
 0x232   : > { %v3959_v21 = vmul.f32 %v3535_v47, %v2579_v20  ;;  %v3958_v6 = vmul.f32 %v3531_v34, %v2578_v51  ;;  %v4337_v10 = vmax.f32 %v4336_v28, %v3957_v56  ;;  %v4477_v20 = vsel %vm4468_vm5, %v4204_v42, %v7141_v14  ;;  %4497 = vst [vmem:[%s7243_s27] sm:$0xff] %v4471_v54 }
 0x233   : > { %v2591_v12 = vmax.f32 %v2219_v7, 0.0  ;;  %v4478_v4 = vsel %vm4470_vm6, %v4217_v43, %v4477_v20  ;;  %v4331_v57 = vrot.slane %v4330_v44, 2  ;;  %v2590_v51 = vmax.f32 %v2216_v52, 0.0 }
 0x234   : > { %v4338_v0 = vmax.f32 %v4337_v10, %v3958_v6  ;;  %4498 = vst [vmem:[%s7243_s27 + $0x8] sm:$0xff] %v4478_v4  ;;  %v2224_v6 = vadd.f32 %v7261_v39, %v6834_v37  ;;  %v2598_v10 = vmax.f32 %v2248_v17, 0.0  ;;  %v2251_v2 = vadd.f32 %v7261_v39, %v6938_v18 }
 0x235   : > { %v3543_v53 = vpop.permute.xlu1 %3542  ;;  %v3539_v24 = vpop.permute.xlu0 %3538  ;;  %v4332_v58 = vmax.f32 %v4330_v44, %v4331_v57  ;;  %v2283_v37 = vadd.f32 %v7261_v39, %v7015_v29  ;;  %v2280_v18 = vadd.f32 %v7261_v39, %v6991_v27  ;;  %v2256_v3 = vadd.f32 %v7261_v39, %v6912_v63 }
 0x236   : > { %v3961_v23 = vmul.f32 %v3543_v53, %v2581_v49  ;;  %v3960_v56 = vmul.f32 %v3539_v24, %v2580_v16  ;;  %v4339_v30 = vmax.f32 %v4338_v0, %v3959_v21  ;;  %v2192_v21 = vadd.f32 %v7261_v39, %v7899_v26 }
 0x237   : > { %v2592_v53 = vmax.f32 %v2224_v6, 0.0  ;;  %v2599_v43 = vmax.f32 %v2251_v2, 0.0  ;;  %v4333_v7 = vrot.slane %v4332_v58, 1  ;;  %v2288_v6 = vadd.f32 %v7261_v39, %v6986_v62 }
 0x238   : > { %v4340_v59 = vmax.f32 %v4339_v30, %v3960_v56  ;;  %v2584_v16 = vmax.f32 %v2192_v21, 0.0  ;;  %v2312_v21 = vadd.f32 %v7261_v39, %v7070_v32 }
 0x239   : > { %v3554_v60 = vpop.permute.xlu1 %3553  ;;  %v3550_v31 = vpop.permute.xlu0 %3549  ;;  %v2608_v32 = vmax.f32 %v2288_v6, 0.0  ;;  %v7903_v6 = vld [vmem:[#allocation16_spill] sm:$0xff] }
 0x23a   : > { %v3963_v25 = vmul.f32 %v3554_v60, %v2583_v8  ;;  %v4341_v28 = vmax.f32 %v4340_v59, %v3961_v23  ;;  %v3962_v47 = vmul.f32 %v3550_v31, %v2582_v33  ;;  %v2607_v59 = vmax.f32 %v2283_v37, 0.0  ;;  %v7900_v31 = vld [vmem:[#allocation94_spill] sm:$0xff] }
 0x23b   : > { %v4334_v60 = vmax.f32 %v4332_v58, %v4333_v7  ;;  %v2195_v17 = vadd.f32 %v7261_v39, %v7900_v31  ;;  %v2614_v2 = vmax.f32 %v2312_v21, 0.0  ;;  %v2352_v31 = vadd.f32 %v7261_v39, %v7137_v41 }
 0x23c   : > { %v4342_v34 = vrot.slane %v4341_v28, 4  ;;  %v4348_v48 = vmax.f32 %v3962_v47, %v3963_v25  ;;  %v2315_v47 = vadd.f32 %v7261_v39, %v7089_v38  ;;  %v2227_v38 = vadd.f32 %v7261_v39, %v6854_v35 }
 0x23d   : > { %v3589_v14 = vpop.permute.xlu1 %3588  ;;  %v3585_v49 = vpop.permute.xlu0 %3584  ;;  %v2264_v41 = vadd.f32 %v7261_v39, %v7903_v6 }
 0x23e   : > { %v3971_v50 = vmul.f32 %v3589_v14, %v2591_v12  ;;  %v4343_v55 = vmax.f32 %v4341_v28, %v4342_v34  ;;  %v3970_v42 = vmul.f32 %v3585_v49, %v2590_v51  ;;  %v2606_v12 = vmax.f32 %v2280_v18, 0.0 }
 0x23f   : > { %v2600_v51 = vmax.f32 %v2256_v3, 0.0  ;;  %v2585_v34 = vmax.f32 %v2195_v17, 0.0  ;;  %v2615_v49 = vmax.f32 %v2315_v47, 0.0  ;;  %v2259_v18 = vadd.f32 %v7261_v39, %v6933_v15 }
 0x240   : > { %v4344_v61 = vrot.slane %v4343_v55, 2  ;;  %v4361_v40 = vmax.f32 %v3970_v42, %v3971_v50 }
 0x241   : > { %v3620_v0 = vpop.permute.xlu1 %3619  ;;  %v3558_v24 = vpop.permute.xlu0 %3557 }
 0x242   : > { %v3978_v23 = vmul.f32 %v3620_v0, %v2598_v10  ;;  %v4345_v52 = vmax.f32 %v4343_v55, %v4344_v61  ;;  %v3964_v56 = vmul.f32 %v3558_v24, %v2584_v16  ;;  %v2347_v0 = vadd.f32 %v7261_v39, %v7164_v45 }
 0x244   : > { %v4346_v44 = vrot.slane %v4345_v52, 1  ;;  %v7286_v30 = vmax.f32 %v4348_v48, %v3964_v56 }
 0x245   : > { %v3593_v8 = vpop.permute.xlu1 %3592  ;;  %v3624_v33 = vpop.permute.xlu0 %3623 }
 0x246   : > { %v3972_v54 = vmul.f32 %v3593_v8, %v2592_v53  ;;  %v4347_v20 = vmax.f32 %v4345_v52, %v4346_v44  ;;  %v3979_v29 = vmul.f32 %v3624_v33, %v2599_v43  ;;  %v2344_v53 = vadd.f32 %v7261_v39, %v7146_v19 }
 0x247   : > { %v2593_v43 = vmax.f32 %v2227_v38, 0.0  ;;  %v2623_v52 = vmax.f32 %v2347_v0, 0.0  ;;  %v2320_v33 = vadd.f32 %v7261_v39, %v7060_v36  ;;  %v2602_v0 = vmax.f32 %v2264_v41, 0.0 }
 0x248   : > { %v7290_v25 = vmax.f32 %v4361_v40, %v3972_v54  ;;  %v7295_v27 = vsel %vm4458_vm0, %v4347_v20, %v4334_v60  ;;  %v4374_v4 = vmax.f32 %v3978_v23, %v3979_v29  ;;  %v2622_v35 = vmax.f32 %v2344_v53, 0.0 }
 0x249   : > { %v3659_v57 = vpop.permute.xlu1 %3658  ;;  %v3655_v63 = vpop.permute.xlu0 %3654  ;;  %v2232_v60 = vadd.f32 %v7261_v39, %v6880_v13  ;;  %v2601_v20 = vmax.f32 %v2259_v18, 0.0  ;;  %v2624_v13 = vmax.f32 %v2352_v31, 0.0 }
 0x24a   : > { %v3987_v28 = vmul.f32 %v3659_v57, %v2607_v59  ;;  %v3986_v26 = vmul.f32 %v3655_v63, %v2606_v12 }
 0x24b   : > { %v2594_v63 = vmax.f32 %v2232_v60, 0.0 }
 0x24c   : > { %v4387_v48 = vmax.f32 %v3986_v26, %v3987_v28 }
 0x24d   : > { %v3628_v14 = vpop.permute.xlu1 %3627  ;;  %v3562_v50 = vpop.permute.xlu0 %3561 }
 0x24e   : > { %v3980_v10 = vmul.f32 %v3628_v14, %v2600_v51  ;;  %v3965_v58 = vmul.f32 %v3562_v50, %v2585_v34  ;;  %v2616_v51 = vmax.f32 %v2320_v33, 0.0  ;;  %v7904_v50 = vld [vmem:[#allocation97_spill] sm:$0xff] }
 0x250   : > { %v7303_v55 = vmax.f32 %v4374_v4, %v3980_v10  ;;  %v4350_v42 = vmax.f32 %v7286_v30, %v3965_v58  ;;  %v7901_v30 = vld [vmem:[#allocation90_spill] sm:$0xff] }
 0x251   : > { %v3694_v16 = vpop.permute.xlu1 %3693  ;;  %v3690_v40 = vpop.permute.xlu0 %3689  ;;  %v2200_v45 = vadd.f32 %v7261_v39, %v7901_v30  ;;  %v7907_v30 = vld [vmem:[#allocation57_spill] sm:$0xff] }
 0x252   : > { %v3995_v61 = vmul.f32 %v3694_v16, %v2615_v49  ;;  %v3994_v62 = vmul.f32 %v3690_v40, %v2614_v2  ;;  %v2203_v49 = vadd.f32 %v7261_v39, %v7904_v50 }
 0x253   : > { %v2586_v12 = vmax.f32 %v2200_v45, 0.0  ;;  %v2296_v45 = vadd.f32 %v7261_v39, %v7907_v30 }
 0x254   : > { %v4400_v23 = vmax.f32 %v3994_v62, %v3995_v61  ;;  %v7906_v61 = vld [vmem:[#allocation8_spill] sm:$0xff]  ;;  %v2587_v53 = vmax.f32 %v2203_v49, 0.0  ;;  %v7912_v49 = vld [vmem:[#allocation19_spill] sm:$0xff] }
 0x255   : > { %v3663_v24 = vpop.permute.xlu1 %3662  ;;  %v3597_v7 = vpop.permute.xlu0 %3596  ;;  %v2235_v40 = vadd.f32 %v7261_v39, %v7906_v61  ;;  %v7913_v61 = vld [vmem:[#allocation55_spill] sm:$0xff] }
 0x256   : > { %v3988_v37 = vmul.f32 %v3663_v24, %v2608_v32  ;;  %v3973_v56 = vmul.f32 %v3597_v7, %v2593_v43  ;;  %v7905_v32 = vld [vmem:[#allocation61_spill] sm:$0xff] }
 0x258   : > { %v7314_v44 = vmax.f32 %v4387_v48, %v3988_v37  ;;  %v4363_v8 = vmax.f32 %v7290_v25, %v3973_v56  ;;  %v7902_v25 = vld [vmem:[#allocation20_spill] sm:$0xff]  ;;  %v2355_v37 = vadd.f32 %v7261_v39, %v7158_v11  ;;  %v2595_v56 = vmax.f32 %v2235_v40, 0.0  ;;  %v7909_v11 = vld [vmem:[#allocation15_spill] sm:$0xff] }
 0x259   : > { %v3729_v3 = vpop.permute.xlu1 %3728  ;;  %v3725_v54 = vpop.permute.xlu0 %3724  ;;  %v2291_v57 = vadd.f32 %v7261_v39, %v7902_v25  ;;  %v7910_v25 = vld [vmem:[#allocation63_spill] sm:$0xff]  ;;  %v2272_v40 = vadd.f32 %v7261_v39, %v7913_v61 }
 0x25a   : > { %v4003_v19 = vmul.f32 %v3729_v3, %v2623_v52  ;;  %v4002_v59 = vmul.f32 %v3725_v54, %v2622_v35 }
 0x25b   : > { %v2609_v48 = vmax.f32 %v2291_v57, 0.0  ;;  %v2328_v57 = vadd.f32 %v7261_v39, %v7910_v25 }
 0x25c   : > { %v4413_v15 = vmax.f32 %v4002_v59, %v4003_v19  ;;  %v2625_v19 = vmax.f32 %v2355_v37, 0.0 }
 0x25d   : > { %v3632_v29 = vpop.permute.xlu1 %3631  ;;  %v3566_v4 = vpop.permute.xlu0 %3565  ;;  %v2618_v6 = vmax.f32 %v2328_v57, 0.0  ;;  %v7917_v57 = vld [vmem:[#allocation64_spill] sm:$0xff] }
 0x25e   : > { %v3981_v17 = vmul.f32 %v3632_v29, %v2601_v20  ;;  %v3966_v28 = vmul.f32 %v3566_v4, %v2586_v12  ;;  %v2208_v12 = vadd.f32 %v7261_v39, %v7909_v11 }
 0x260   : > { %v4376_v36 = vmax.f32 %v7303_v55, %v3981_v17  ;;  %v4351_v47 = vmax.f32 %v4350_v42, %v3966_v28  ;;  %v2323_v55 = vadd.f32 %v7261_v39, %v7905_v32  ;;  %v7911_v28 = vld [vmem:[#allocation92_spill] sm:$0xff] }
 0x261   : > { %v3601_v26 = vpop.permute.xlu1 %3600  ;;  %v3698_v34 = vpop.permute.xlu0 %3697 }
 0x262   : > { %v3974_v21 = vmul.f32 %v3601_v26, %v2594_v63  ;;  %v3996_v14 = vmul.f32 %v3698_v34, %v2616_v51  ;;  %v2617_v52 = vmax.f32 %v2323_v55, 0.0  ;;  %v2240_v63 = vadd.f32 %v7261_v39, %v7911_v28 }
 0x263   : > { %v2588_v26 = vmax.f32 %v2208_v12, 0.0 }
 0x264   : > { %v4364_v10 = vmax.f32 %v4363_v8, %v3974_v21  ;;  %v4401_v2 = vmax.f32 %v4400_v23, %v3996_v14  ;;  %v2360_v14 = vadd.f32 %v7261_v39, %v7184_v22 }
 0x265   : > { %v3733_v58 = vpop.permute.xlu1 %3732  ;;  %v3667_v16 = vpop.permute.xlu0 %3666 }
 0x266   : > { %v4004_v38 = vmul.f32 %v3733_v58, %v2624_v13  ;;  %v3989_v42 = vmul.f32 %v3667_v16, %v2609_v48  ;;  %v2626_v55 = vmax.f32 %v2360_v14, 0.0 }
 0x268   : > { %v4414_v62 = vmax.f32 %v4413_v15, %v4004_v38  ;;  %v4389_v43 = vmax.f32 %v7314_v44, %v3989_v42  ;;  %v7908_v44 = vld [vmem:[#allocation18_spill] sm:$0xff]  ;;  %v2610_v15 = vmax.f32 %v2296_v45, 0.0  ;;  %v2331_v45 = vadd.f32 %v7261_v39, %v7120_v9 }
 0x269   : > { %v3636_v24 = vpop.permute.xlu1 %3635  ;;  %v3570_v7 = vpop.permute.xlu0 %3569  ;;  %v2267_v60 = vadd.f32 %v7261_v39, %v7908_v44 }
 0x26a   : > { %v3982_v23 = vmul.f32 %v3636_v24, %v2602_v0  ;;  %v3967_v35 = vmul.f32 %v3570_v7, %v2587_v53  ;;  %v2619_v12 = vmax.f32 %v2331_v45, 0.0 }
 0x26c   : > { %v4377_v18 = vmax.f32 %v4376_v36, %v3982_v23  ;;  %v4352_v8 = vmax.f32 %v4351_v47, %v3967_v35  ;;  %v2603_v36 = vmax.f32 %v2267_v60, 0.0 }
 0x26d   : > { %v3605_v3 = vpop.permute.xlu1 %3604  ;;  %v3702_v33 = vpop.permute.xlu0 %3701 }
 0x26e   : > { %v3975_v54 = vmul.f32 %v3605_v3, %v2595_v56  ;;  %v3997_v59 = vmul.f32 %v3702_v33, %v2617_v52  ;;  %v7915_v52 = vld [vmem:[#allocation56_spill] sm:$0xff]  ;;  %v2604_v56 = vmax.f32 %v2272_v40, 0.0  ;;  %v2363_v33 = vadd.f32 %v7261_v39, %v7194_v46 }
 0x26f   : > { %v2243_v35 = vadd.f32 %v7261_v39, %v7915_v52 }
 0x270   : > { %v4365_v20 = vmax.f32 %v4364_v10, %v3975_v54  ;;  %v4402_v29 = vmax.f32 %v4401_v2, %v3997_v59  ;;  %v2596_v10 = vmax.f32 %v2240_v63, 0.0  ;;  %v2299_v2 = vadd.f32 %v7261_v39, %v7912_v49  ;;  %v7918_v63 = vld [vmem:[#allocation91_spill] sm:$0xff] }
 0x271   : > { %v3737_v31 = vpop.permute.xlu1 %3736  ;;  %v3671_v4 = vpop.permute.xlu0 %3670  ;;  %v2597_v44 = vmax.f32 %v2243_v35, 0.0  ;;  %v2627_v9 = vmax.f32 %v2363_v33, 0.0  ;;  %v2275_v46 = vadd.f32 %v7261_v39, %v7918_v63 }
 0x272   : > { %v4005_v17 = vmul.f32 %v3737_v31, %v2625_v19  ;;  %v3990_v51 = vmul.f32 %v3671_v4, %v2610_v15  ;;  %v2611_v53 = vmax.f32 %v2299_v2, 0.0 }
 0x273   : > { %v2605_v2 = vmax.f32 %v2275_v46, 0.0 }
 0x274   : > { %v4415_v47 = vmax.f32 %v4414_v62, %v4005_v17  ;;  %v7349_v13 = vmax.f32 %v4389_v43, %v3990_v51  ;;  %v7914_v62 = vld [vmem:[#allocation53_spill] sm:$0xff]  ;;  %v2336_v51 = vadd.f32 %v7261_v39, %v7917_v57 }
 0x275   : > { %v3640_v21 = vpop.permute.xlu1 %3639  ;;  %v3574_v48 = vpop.permute.xlu0 %3573  ;;  %v2211_v22 = vadd.f32 %v7261_v39, %v7914_v62 }
 0x276   : > { %v3983_v34 = vmul.f32 %v3640_v21, %v2603_v36  ;;  %v3968_v41 = vmul.f32 %v3574_v48, %v2588_v26 }
 0x277   : > { %v2589_v30 = vmax.f32 %v2211_v22, 0.0 }
 0x278   : > { %v4378_v50 = vmax.f32 %v4377_v18, %v3983_v34  ;;  %v4353_v58 = vmax.f32 %v4352_v8, %v3968_v41  ;;  %v2620_v41 = vmax.f32 %v2336_v51, 0.0 }
 0x279   : > { %v3609_v38 = vpop.permute.xlu1 %3608  ;;  %v3706_v32 = vpop.permute.xlu0 %3705 }
 0x27a   : > { %v3976_v16 = vmul.f32 %v3609_v38, %v2596_v10  ;;  %v3998_v42 = vmul.f32 %v3706_v32, %v2618_v6  ;;  %v2368_v10 = vadd.f32 %v7261_v39, %v7179_v5 }
 0x27c   : > { %v4366_v0 = vmax.f32 %v4365_v20, %v3976_v16  ;;  %v4403_v43 = vmax.f32 %v4402_v29, %v3998_v42  ;;  %v7916_v20 = vld [vmem:[#allocation58_spill] sm:$0xff]  ;;  %v2628_v22 = vmax.f32 %v2368_v10, 0.0 }
 0x27d   : > { %v3741_v24 = vpop.permute.xlu1 %3740  ;;  %v3675_v23 = vpop.permute.xlu0 %3674  ;;  %v2304_v11 = vadd.f32 %v7261_v39, %v7916_v20 }
 0x27e   : > { %v4006_v37 = vmul.f32 %v3741_v24, %v2626_v55  ;;  %v3991_v7 = vmul.f32 %v3675_v23, %v2611_v53  ;;  %v2371_v53 = vadd.f32 %v7261_v39, %v7189_v1 }
 0x27f   : > { %v2612_v36 = vmax.f32 %v2304_v11, 0.0 }
 0x280   : > { %v7361_v18 = vmax.f32 %v4415_v47, %v4006_v37  ;;  %v4391_v8 = vmax.f32 %v7349_v13, %v3991_v7  ;;  %v7920_v37 = vld [vmem:[#allocation66_spill] sm:$0xff] }
 0x281   : > { %v3644_v3 = vpop.permute.xlu1 %3643  ;;  %v3578_v54 = vpop.permute.xlu0 %3577  ;;  %v2339_v23 = vadd.f32 %v7261_v39, %v7920_v37 }
 0x282   : > { %v3984_v19 = vmul.f32 %v3644_v3, %v2604_v56  ;;  %v3969_v59 = vmul.f32 %v3578_v54, %v2589_v30 }
 0x283   : > { %v2621_v33 = vmax.f32 %v2339_v23, 0.0 }
 0x284   : > { %v4379_v60 = vmax.f32 %v4378_v50, %v3984_v19  ;;  %v4354_v15 = vmax.f32 %v4353_v58, %v3969_v59  ;;  %v7919_v58 = vld [vmem:[#allocation62_spill] sm:$0xff]  ;;  %v2629_v19 = vmax.f32 %v2371_v53, 0.0 }
 0x285   : > { %v3613_v29 = vpop.permute.xlu1 %3612  ;;  %v3710_v17 = vpop.permute.xlu0 %3709  ;;  %v2307_v38 = vadd.f32 %v7261_v39, %v7919_v58 }
 0x286   : > { %v3977_v31 = vmul.f32 %v3613_v29, %v2597_v44  ;;  %v4355_v4 = vrot.slane %v4354_v15, 4  ;;  %v3999_v25 = vmul.f32 %v3710_v17, %v2619_v12 }
 0x287   : > { %v2613_v24 = vmax.f32 %v2307_v38, 0.0 }
 0x288   : > { %v4367_v28 = vmax.f32 %v4366_v0, %v3977_v31  ;;  %v4356_v47 = vmax.f32 %v4354_v15, %v4355_v4  ;;  %v4404_v26 = vmax.f32 %v4403_v43, %v3999_v25 }
 0x289   : > { %v3745_v13 = vpop.permute.xlu1 %3744  ;;  %v3679_v48 = vpop.permute.xlu0 %3678 }
 0x28a   : > { %v4368_v21 = vrot.slane %v4367_v28, 4  ;;  %v4007_v34 = vmul.f32 %v3745_v13, %v2627_v9  ;;  %v4357_v14 = vrot.slane %v4356_v47, 2  ;;  %v3992_v6 = vmul.f32 %v3679_v48, %v2612_v36 }
 0x28c   : > { %v4369_v50 = vmax.f32 %v4367_v28, %v4368_v21  ;;  %v4417_v49 = vmax.f32 %v7361_v18, %v4007_v34  ;;  %v4358_v16 = vmax.f32 %v4356_v47, %v4357_v14  ;;  %v4392_v32 = vmax.f32 %v4391_v8, %v3992_v6 }
 0x28d   : > { %v3714_v55 = vpop.permute.xlu1 %3713  ;;  %v3648_v40 = vpop.permute.xlu0 %3647 }
 0x28e   : > { %v4370_v42 = vrot.slane %v4369_v50, 2  ;;  %v4000_v61 = vmul.f32 %v3714_v55, %v2620_v41  ;;  %v4359_v0 = vrot.slane %v4358_v16, 1  ;;  %v3985_v62 = vmul.f32 %v3648_v40, %v2605_v2 }
 0x290   : > { %v4371_v5 = vmax.f32 %v4369_v50, %v4370_v42  ;;  %v4405_v43 = vmax.f32 %v4404_v26, %v4000_v61  ;;  %v4360_v7 = vmax.f32 %v4358_v16, %v4359_v0  ;;  %v4380_v52 = vmax.f32 %v4379_v60, %v3985_v62 }
 0x291   : > { %v3749_v35 = vpop.permute.xlu1 %3748  ;;  %v3683_v30 = vpop.permute.xlu0 %3682 }
 0x292   : > { %v4372_v56 = vrot.slane %v4371_v5, 1  ;;  %v4008_v18 = vmul.f32 %v3749_v35, %v2628_v22  ;;  %v4487_v45 = vsel %vm4460_vm1, %v4360_v7, %v7295_v27  ;;  %v4381_v8 = vrot.slane %v4380_v52, 4 }
 0x293   : > { %v3993_v3 = vmul.f32 %v3683_v30, %v2613_v24 }
 0x294   : > { %v4373_v54 = vmax.f32 %v4371_v5, %v4372_v56  ;;  %v4418_v1 = vmax.f32 %v4417_v49, %v4008_v18  ;;  %v4382_v59 = vmax.f32 %v4380_v52, %v4381_v8 }
 0x295   : > { %v4393_v44 = vmax.f32 %v4392_v32, %v3993_v3  ;;  %v3753_v20 = vpop.permute.xlu1 %3752  ;;  %v3718_v60 = vpop.permute.xlu0 %3717 }
 0x296   : > { %v4488_v39 = vsel %vm4462_vm2, %v4373_v54, %v4487_v45  ;;  %v4009_v11 = vmul.f32 %v3753_v20, %v2629_v19  ;;  %v4383_v12 = vrot.slane %v4382_v59, 2  ;;  %v4001_v29 = vmul.f32 %v3718_v60, %v2621_v33 }
 0x297   : > { %v4394_v15 = vrot.slane %v4393_v44, 4 }
 0x298   : > { %v4419_v31 = vmax.f32 %v4418_v1, %v4009_v11  ;;  %v4384_v17 = vmax.f32 %v4382_v59, %v4383_v12  ;;  %v4406_v27 = vmax.f32 %v4405_v43, %v4001_v29 }
 0x299   : > { %v4395_v9 = vmax.f32 %v4393_v44, %v4394_v15 }
 0x29a   : > { %v4420_v4 = vrot.slane %v4419_v31, 4  ;;  %v4385_v25 = vrot.slane %v4384_v17, 1  ;;  %v4407_v51 = vrot.slane %v4406_v27, 4 }
 0x29b   : > { %v4396_v57 = vrot.slane %v4395_v9, 2 }
 0x29c   : > { %v4421_v28 = vmax.f32 %v4419_v31, %v4420_v4  ;;  %v4386_v63 = vmax.f32 %v4384_v17, %v4385_v25  ;;  %v4408_v36 = vmax.f32 %v4406_v27, %v4407_v51 }
 0x29d   : > { %v4397_v46 = vmax.f32 %v4395_v9, %v4396_v57 }
 0x29e   : > { %v4422_v47 = vrot.slane %v4421_v28, 2  ;;  %v4489_v26 = vsel %vm4464_vm3, %v4386_v63, %v4488_v39  ;;  %v4409_v21 = vrot.slane %v4408_v36, 2 }
 0x29f   : > { %v4398_v13 = vrot.slane %v4397_v46, 1 }
 0x2a0   : > { %v4423_v34 = vmax.f32 %v4421_v28, %v4422_v47  ;;  %v4410_v14 = vmax.f32 %v4408_v36, %v4409_v21 }
 0x2a1   : > { %v4399_v48 = vmax.f32 %v4397_v46, %v4398_v13 }
 0x2a2   : > { %v4424_v6 = vrot.slane %v4423_v34, 1  ;;  %v4411_v10 = vrot.slane %v4410_v14, 1 }
 0x2a3   : > { %v4490_v41 = vsel %vm4466_vm4, %v4399_v48, %v4489_v26 }
 0x2a4   : > { %v4425_v50 = vmax.f32 %v4423_v34, %v4424_v6  ;;  %v4412_v49 = vmax.f32 %v4410_v14, %v4411_v10 }
 0x2a6   : > { %v4491_v2 = vsel %vm4468_vm5, %v4412_v49, %v4490_v41 }
 0x2a7   : > { %v4492_v58 = vsel %vm4470_vm6, %v4425_v50, %v4491_v2 }
 0x2a8   : > { %4500 = vst [vmem:[%s7243_s27 + $0x18] sm:$0xff] %v4492_v58 }
 0x2a9   : > { %5358 = shalt.err (!%p5355_p4)
}
 0x2aa   : > { %s5359_s14 = scalar_lea.hbm %s7393_s8, 512  ;;  %s5363_s22 = scalar_lea.hbm %s7447_s4, 1024 }
 0x2ab   : > { %p5360_p7 = scmp.ne.s32.totalorder %s7393_s8, %s5359_s14  ;;  %p5364_p10 = scmp.lt.u32.totalorder %s7393_s8, %s7447_s4 }
 0x2ac   : > { %p5365_p11 = scmp.lt.u32.totalorder %s5363_s22, %s5359_s14  ;;  %p5367_p13 = scmp.lt.u32.totalorder %s5359_s14, %s7393_s8 }
 0x2ad   : > { %p5361_p8 = pnand %p5360_p7, %p5475_p5 }
 0x2ae   : > { %p5366_p12 = por %p5365_p11, %p5364_p10 }
 0x2af   : > { %p5362_p9 = pneg %p5361_p8 }
 0x2b0   : > { %p5368_p0 = por %p5367_p13, %p5366_p12 }
 0x2b2   : > { %p5369_p1 = pnand %p5368_p0, %p5362_p9 }
 0x2b4   : > { %5372 = shalt.err (!%p5369_p1)
}
 0x2b5   : > { %s5410_s28 = smov 128   ;;  %s5411_s29 = smov 8  }
 0x2b6   : > { %5165 = dma.vmem_to_hbm [thread:$0]  (%p5475_p5), %s7395_s5, 512, %s7393_s8, %s7402_s19, %s5410_s28, %s5410_s28, %s5411_s29  }
 0x2b7 PF: > { %p5171_p2 = scmp.ge.s32.totalorder %s5407_s18, 2  ;;  %s4530_s30 = sand.u32 1, %s5395_s15  }
 0x2b8   : > { %s4531_s6 = scalar_lea.sflag [#allocation3], %s4530_s30 }
 0x2b9   : > { %p5168_p3 = pnand %p5171_p2, %p5479_p6 }
 0x2bb   : > { %5390 = dma.done.wait (!%p5168_p3), %s4531_s6, 512  }
 0x2bc   : > { %5392 = vsyncadd (!%p5168_p3), %s4531_s6, 4294966784  ;;  %p14_p4 = scmp.ge.s32.totalorder %s5462_s21, 4   ;;  %s7921_s15 = smov %s5399_s16 }
 0x2bd   : > { %s7922_s16 = smov %s5403_s17  ;;  %s7923_s17 = smov %s5473_s24 }
 0x2be   : > { %s7924_s18 = smov %s5462_s21  ;;  %16 = sbr.rel (!%p14_p4) target bundleno = 3 (0x3), region = 74 }
 0x2c5   :  { %4536 = vsyncpa [#allocation3], 1 }
 0x2c6   :  { %4538 = vsyncpa [#allocation3 + $0x1], 1 }

</bundles_post_ra>
